<compile_context>
chip_gen: v5e
topology: v5e:2x2
jax: 0.10.0
libtpu: 0.0.40
codegen_flags: <defaults>
</compile_context>

<pallas_src>
import jax
import jax.numpy as jnp
from jax.experimental import pallas as pl
from jax.experimental.pallas import tpu as pltpu

BN_EPS = 1e-5


# ---------------------------------------------------------------------------
# Pallas kernels
# ---------------------------------------------------------------------------
def _matmul_stats_kernel(x_ref, w_ref, y_ref, st_ref):
    """Fused MXU matmul tile + per-tile BN partial statistics.

    x_ref : (1, tm, Kd)    bf16 phase patches
    w_ref : (1, Kd, Nc)    bf16 phase weight matrix
    y_ref : (1, tm, Nc)    f32  pre-BN activations
    st_ref: (1, 1, 8, Nc)  f32  row 0 = per-channel sum over the tile rows,
                                row 1 = per-channel sum of squares,
                                rows 2..7 = zero pad (8-sublane alignment).
    """
    acc = jnp.dot(x_ref[0], w_ref[0], preferred_element_type=jnp.float32)
    y_ref[0] = acc
    s = jnp.sum(acc, axis=0, keepdims=True)
    ss = jnp.sum(acc * acc, axis=0, keepdims=True)
    pad = jnp.zeros((6, acc.shape[1]), jnp.float32)
    st_ref[0, 0] = jnp.concatenate([s, ss, pad], axis=0)


def _matmul_bias_tanh_kernel(x_ref, w_ref, b_ref, o_ref):
    """Final layer: fused matmul + bias + tanh (Cout padded to lane width)."""
    acc = jnp.dot(x_ref[0], w_ref[0], preferred_element_type=jnp.float32)
    o_ref[0] = jnp.tanh(acc + b_ref[...])


def _bn_relu_kernel(y_ref, sc_ref, sh_ref, o_ref):
    """Elementwise y * scale + shift, ReLU, cast to bf16."""
    z = y_ref[0] * sc_ref[...] + sh_ref[...]
    o_ref[0] = jnp.maximum(z, 0.0).astype(o_ref.dtype)


# ---------------------------------------------------------------------------
# pallas_call wrappers
# ---------------------------------------------------------------------------
def _pick_tile(m, cap):
    t = cap
    while t >= 8:
        if m % t == 0:
            return t
        t //= 2
    return m  # tiny arrays: use the full dim (allowed by BlockSpec rules)


def _matmul_stats(xg, wg, *, tile_m=256):
    g, mp, kd = xg.shape
    nc = wg.shape[2]
    tm = _pick_tile(mp, tile_m)
    nm = mp // tm
    return pl.pallas_call(
        _matmul_stats_kernel,
        grid=(g, nm),
        in_specs=[
            pl.BlockSpec((1, tm, kd), lambda gi, mi: (gi, mi, 0)),
            pl.BlockSpec((1, kd, nc), lambda gi, mi: (gi, 0, 0)),
        ],
        out_specs=[
            pl.BlockSpec((1, tm, nc), lambda gi, mi: (gi, mi, 0)),
            pl.BlockSpec((1, 1, 8, nc), lambda gi, mi: (gi, mi, 0, 0)),
        ],
        out_shape=[
            jax.ShapeDtypeStruct((g, mp, nc), jnp.float32),
            jax.ShapeDtypeStruct((g, nm, 8, nc), jnp.float32),
        ],
        compiler_params=pltpu.CompilerParams(
            dimension_semantics=("parallel", "parallel")),
    )(xg, wg)


def _matmul_bias_tanh(xg, wg, b, *, tile_m=256):
    g, mp, kd = xg.shape
    nc = wg.shape[2]
    tm = _pick_tile(mp, tile_m)
    nm = mp // tm
    return pl.pallas_call(
        _matmul_bias_tanh_kernel,
        grid=(g, nm),
        in_specs=[
            pl.BlockSpec((1, tm, kd), lambda gi, mi: (gi, mi, 0)),
            pl.BlockSpec((1, kd, nc), lambda gi, mi: (gi, 0, 0)),
            pl.BlockSpec((1, nc), lambda gi, mi: (0, 0)),
        ],
        out_specs=pl.BlockSpec((1, tm, nc), lambda gi, mi: (gi, mi, 0)),
        out_shape=jax.ShapeDtypeStruct((g, mp, nc), jnp.float32),
        compiler_params=pltpu.CompilerParams(
            dimension_semantics=("parallel", "parallel")),
    )(xg, wg, b.reshape(1, nc).astype(jnp.float32))


def _bn_relu(y, scale, shift, *, tile_m=512):
    g, mp, nc = y.shape
    tm = _pick_tile(mp, tile_m)
    nm = mp // tm
    return pl.pallas_call(
        _bn_relu_kernel,
        grid=(g, nm),
        in_specs=[
            pl.BlockSpec((1, tm, nc), lambda gi, mi: (gi, mi, 0)),
            pl.BlockSpec((1, nc), lambda gi, mi: (0, 0)),
            pl.BlockSpec((1, nc), lambda gi, mi: (0, 0)),
        ],
        out_specs=pl.BlockSpec((1, tm, nc), lambda gi, mi: (gi, mi, 0)),
        out_shape=jax.ShapeDtypeStruct((g, mp, nc), jnp.bfloat16),
        compiler_params=pltpu.CompilerParams(
            dimension_semantics=("parallel", "parallel")),
    )(y, scale.reshape(1, nc).astype(jnp.float32),
      shift.reshape(1, nc).astype(jnp.float32))


# ---------------------------------------------------------------------------
# JAX glue: phase decomposition, weight prep, BN stat finalization
# ---------------------------------------------------------------------------
def _phase_patches(a):
    """NHWC activation -> (4, N*Hi*Wi, 4*Cin) patches of a K=4,s=2,p=1 deconv.

    Output phase (py, px) at (hy, wx) only needs xpad[hy+py+dh, wx+px+dw]
    for dh, dw in {0, 1} (xpad = input zero-padded by 1 on each side)."""
    n, hi, wi, cin = a.shape
    xp = jnp.pad(a, ((0, 0), (1, 1), (1, 1), (0, 0)))
    phases = []
    for py in range(2):
        for px in range(2):
            taps = [xp[:, py + dh:py + dh + hi, px + dw:px + dw + wi, :]
                    for dh in range(2) for dw in range(2)]
            phases.append(
                jnp.concatenate(taps, axis=-1).reshape(n * hi * wi, 4 * cin))
    return jnp.stack(phases, axis=0)


def _phase_weights(wt):
    """(Cin, Cout, 4, 4) ConvTranspose2d weight -> (4, 4*Cin, Cout).

    Phase (py, px), tap (dh, dw) uses kernel element (3-py-2dh, 3-px-2dw);
    row ordering matches the patch concatenation in _phase_patches."""
    mats = []
    for py in range(2):
        for px in range(2):
            taps = [wt[:, :, 3 - py - 2 * dh, 3 - px - 2 * dw]
                    for dh in range(2) for dw in range(2)]
            mats.append(jnp.concatenate(taps, axis=0))
    return jnp.stack(mats, axis=0)


def _unphase(a, n, hi, wi, c):
    """(4, N*Hi*Wi, C) phase-major -> (N, 2*Hi, 2*Wi, C) NHWC."""
    t = a.reshape(2, 2, n, hi, wi, c)
    t = jnp.transpose(t, (2, 3, 0, 4, 1, 5))
    return t.reshape(n, 2 * hi, 2 * wi, c)


def _bn_scale_shift(stats, count, gamma, beta, positions=1):
    """Fold batch-norm(train) stats into one per-channel scale & shift."""
    s = stats[:, :, 0, :].sum(axis=(0, 1))
    ss = stats[:, :, 1, :].sum(axis=(0, 1))
    c = gamma.shape[0]
    if positions > 1:                      # layer-1 columns are (pos, channel)
        s = s.reshape(positions, c).sum(0)
        ss = ss.reshape(positions, c).sum(0)
    mean = s / count
    var = jnp.maximum(ss / count - mean * mean, 0.0)
    scale = gamma * jax.lax.rsqrt(var + BN_EPS)
    shift = beta - mean * scale
    return scale, shift


# ---------------------------------------------------------------------------
# Layers
# ---------------------------------------------------------------------------
def _project_bn_relu(x2d, wt, gamma, beta):
    """Layer 1: ConvTranspose2d(Cn, C1, 4, 1, 0) on a 1x1 input + BN + ReLU."""
    n, cn = x2d.shape
    cout = wt.shape[1]
    # Columns ordered (kh, kw, o) so the output reshapes directly to NHWC.
    w1 = jnp.transpose(wt, (0, 2, 3, 1)).reshape(cn, 16 * cout)
    y, stats = _matmul_stats(x2d[None].astype(jnp.bfloat16),
                             w1[None].astype(jnp.bfloat16))
    scale, shift = _bn_scale_shift(stats, float(n * 16), gamma, beta,
                                   positions=16)
    scale_c = jnp.broadcast_to(scale, (16, cout)).reshape(16 * cout)
    shift_c = jnp.broadcast_to(shift, (16, cout)).reshape(16 * cout)
    a = _bn_relu(y, scale_c, shift_c)          # (1, N, 16*cout) bf16
    return a.reshape(n, 4, 4, cout)


def _deconv_bn_relu(act, wt, gamma, beta):
    """ConvTranspose2d(K=4,s=2,p=1) + BN + ReLU (conv bias dropped: it is
    exactly cancelled by the BN mean subtraction)."""
    n, hi, wi, _ = act.shape
    cout = wt.shape[1]
    xph = _phase_patches(act).astype(jnp.bfloat16)
    wph = _phase_weights(wt).astype(jnp.bfloat16)
    y, stats = _matmul_stats(xph, wph)
    count = 4.0 * n * hi * wi                  # = N * Ho * Wo
    scale, shift = _bn_scale_shift(stats, count, gamma, beta)
    a = _bn_relu(y, scale, shift)
    return _unphase(a, n, hi, wi, cout)


def _deconv_tanh(act, wt, bias):
    """Final ConvTranspose2d(K=4,s=2,p=1) + bias + tanh, Cout padded to 128
    for lane-dense stores, sliced back in JAX."""
    n, hi, wi, _ = act.shape
    cout = wt.shape[1]
    ncp = ((cout + 127) // 128) * 128
    xph = _phase_patches(act).astype(jnp.bfloat16)
    wph = jnp.pad(_phase_weights(wt),
                  ((0, 0), (0, 0), (0, ncp - cout))).astype(jnp.bfloat16)
    bp = jnp.pad(bias, (0, ncp - cout))
    y = _matmul_bias_tanh(xph, wph, bp)        # (4, N*Hi*Wi, ncp) f32
    return _unphase(y[:, :, :cout], n, hi, wi, cout)


# ---------------------------------------------------------------------------
# Parameters & forward
# ---------------------------------------------------------------------------
def init_generator_params(key, channels_noise, channels_img, features_g):
    layer_io = [
        (channels_noise, features_g * 16),
        (features_g * 16, features_g * 8),
        (features_g * 8, features_g * 4),
        (features_g * 4, features_g * 2),
        (features_g * 2, channels_img),
    ]
    params = []
    for cin, cout in layer_io:
        key, kw, kb = jax.random.split(key, 3)
        wt = 0.05 * jax.random.normal(kw, (cin, cout, 4, 4), jnp.float32)
        bias = 0.01 * jax.random.normal(kb, (cout,), jnp.float32)
        gamma = jnp.ones((cout,), jnp.float32)   # PyTorch BN affine defaults
        beta = jnp.zeros((cout,), jnp.float32)
        params.append((wt, bias, gamma, beta))
    return params


def generator_forward(x_nchw, params):
    # x_nchw: (N, channels_noise, 1, 1), same contract as the PyTorch forward.
    n, cn, h, w = x_nchw.shape
    assert h == 1 and w == 1
    act = _project_bn_relu(x_nchw.reshape(n, cn),
                           params[0][0], params[0][2], params[0][3])
    for li in range(1, 4):
        wt, _, gamma, beta = params[li]
        act = _deconv_bn_relu(act, wt, gamma, beta)
    wt, bias, _, _ = params[4]
    out = _deconv_tanh(act, wt, bias)            # (N, 64, 64, channels_img)
    return jnp.transpose(out, (0, 3, 1, 2))      # NHWC -> NCHW


# TODO(synk): BatchNorm running_mean/running_var buffer updates (a training-time
# side effect that does not affect the forward output) are not modeled.

if __name__ == "__main__":
    channels_noise, channels_img, features_g = 8, 3, 4
    batch = 2

    key = jax.random.PRNGKey(0)
    kx, kp = jax.random.split(key)
    x = jax.random.normal(kx, (batch, channels_noise, 1, 1), jnp.float32)
    params = init_generator_params(kp, channels_noise, channels_img, features_g)

    fwd = jax.jit(lambda inp: generator_forward(inp, params))
    y = fwd(x)
    jax.block_until_ready(y)

    assert y.shape == (batch, channels_img, 64, 64), y.shape
    assert bool(jnp.all(jnp.isfinite(y)))
    assert bool(jnp.all(jnp.abs(y) <= 1.0))   # tanh output range
    print("KERNEL_OK")
</pallas_src>

<mosaic_0001>
module attributes {stable_mosaic.version = 11 : i64} {
  func.func @_matmul_stats_kernel(%arg0: i32, %arg1: i32, %arg2: memref<1x2x8xbf16, #tpu.memory_space<vmem>>, %arg3: memref<1x8x1024xbf16, #tpu.memory_space<vmem>>, %arg4: memref<1x2x1024xf32, #tpu.memory_space<vmem>>, %arg5: memref<1x1x8x1024xf32, #tpu.memory_space<vmem>>) attributes {dimension_semantics = [#tpu.dimension_semantics<parallel>, #tpu.dimension_semantics<parallel>], iteration_bounds = array<i64: 1, 1>, scalar_prefetch = 0 : i64, scratch_operands = 0 : i64, tpu.core_type = #tpu.core_type<tc>, window_params = [{transform_indices = @transform_0, window_bounds = array<i64: 1, 2, 8>}, {transform_indices = @transform_1, window_bounds = array<i64: 1, 8, 1024>}, {transform_indices = @transform_2, window_bounds = array<i64: 1, 2, 1024>}, {transform_indices = @transform_3, window_bounds = array<i64: 1, 1, 8, 1024>}]} {
    %c0 = arith.constant 0 : index
    %c0_0 = arith.constant 0 : index
    %c0_1 = arith.constant 0 : index
    %0 = vector.load %arg2[%c0, %c0_0, %c0_1] : memref<1x2x8xbf16, #tpu.memory_space<vmem>>, vector<1x2x8xbf16>
    %1 = vector.shape_cast %0 : vector<1x2x8xbf16> to vector<2x8xbf16>
    %c0_2 = arith.constant 0 : index
    %c0_3 = arith.constant 0 : index
    %c0_4 = arith.constant 0 : index
    %2 = vector.load %arg3[%c0_2, %c0_3, %c0_4] : memref<1x8x1024xbf16, #tpu.memory_space<vmem>>, vector<1x8x1024xbf16>
    %3 = vector.shape_cast %2 : vector<1x8x1024xbf16> to vector<8x1024xbf16>
    %cst = arith.constant dense<0.000000e+00> : vector<2x1024xf32>
    %4 = tpu.matmul %1, %3, %cst {dimension_numbers = #tpu.dot_dimension_numbers<[1], [0], [0], [1], [0, 0, 1, 1], [], []>} : vector<2x8xbf16>, vector<8x1024xbf16>, vector<2x1024xf32> -> vector<2x1024xf32>
    %c0_5 = arith.constant 0 : index
    %c0_6 = arith.constant 0 : index
    %c0_7 = arith.constant 0 : index
    %5 = vector.load %arg4[%c0_5, %c0_6, %c0_7] : memref<1x2x1024xf32, #tpu.memory_space<vmem>>, vector<1x2x1024xf32>
    %6 = vector.shape_cast %5 : vector<1x2x1024xf32> to vector<2x1024xf32>
    %7 = vector.shape_cast %4 : vector<2x1024xf32> to vector<1x2x1024xf32>
    tpu.vector_store %arg4[%c0_5, %c0_6, %c0_7], %7 {strides = array<i32>} : memref<1x2x1024xf32, #tpu.memory_space<vmem>>, vector<1x2x1024xf32>,
    %cst_8 = arith.constant dense<0.000000e+00> : vector<1024xf32>
    %8 = vector.multi_reduction <add>, %4, %cst_8 [0] : vector<2x1024xf32> to vector<1024xf32>
    %9 = vector.shape_cast %8 : vector<1024xf32> to vector<1x1024xf32>
    %10 = arith.mulf %4, %4 : vector<2x1024xf32>
    %cst_9 = arith.constant dense<0.000000e+00> : vector<1024xf32>
    %11 = vector.multi_reduction <add>, %10, %cst_9 [0] : vector<2x1024xf32> to vector<1024xf32>
    %12 = vector.shape_cast %11 : vector<1024xf32> to vector<1x1024xf32>
    %cst_10 = arith.constant 0.000000e+00 : f32
    %13 = vector.broadcast %cst_10 : f32 to vector<6x1024xf32>
    %14 = tpu.concatenate %9, %12, %13 in 0 : vector<1x1024xf32>, vector<1x1024xf32>, vector<6x1024xf32> -> vector<8x1024xf32>
    %c0_11 = arith.constant 0 : index
    %c0_12 = arith.constant 0 : index
    %c0_13 = arith.constant 0 : index
    %c0_14 = arith.constant 0 : index
    %15 = vector.load %arg5[%c0_11, %c0_12, %c0_13, %c0_14] : memref<1x1x8x1024xf32, #tpu.memory_space<vmem>>, vector<1x1x8x1024xf32>
    %16 = vector.shape_cast %15 : vector<1x1x8x1024xf32> to vector<8x1024xf32>
    %17 = vector.shape_cast %14 : vector<8x1024xf32> to vector<1x1x8x1024xf32>
    tpu.vector_store %arg5[%c0_11, %c0_12, %c0_13, %c0_14], %17 {strides = array<i32>} : memref<1x1x8x1024xf32, #tpu.memory_space<vmem>>, vector<1x1x8x1024xf32>,
    return
  }
  func.func @transform_0(%arg0: i32, %arg1: i32) -> (i32, i32, i32) {
    %c0_i32 = arith.constant 0 : i32
    %c0_i32_0 = arith.constant 0 : i32
    return %arg0, %arg1, %c0_i32 : i32, i32, i32
  }
  func.func @transform_1(%arg0: i32, %arg1: i32) -> (i32, i32, i32) {
    %c0_i32 = arith.constant 0 : i32
    %c0_i32_0 = arith.constant 0 : i32
    %c0_i32_1 = arith.constant 0 : i32
    return %arg0, %c0_i32, %c0_i32_0 : i32, i32, i32
  }
  func.func @transform_2(%arg0: i32, %arg1: i32) -> (i32, i32, i32) {
    %c0_i32 = arith.constant 0 : i32
    %c0_i32_0 = arith.constant 0 : i32
    return %arg0, %arg1, %c0_i32 : i32, i32, i32
  }
  func.func @transform_3(%arg0: i32, %arg1: i32) -> (i32, i32, i32, i32) {
    %c0_i32 = arith.constant 0 : i32
    %c0_i32_0 = arith.constant 0 : i32
    %c0_i32_1 = arith.constant 0 : i32
    return %arg0, %arg1, %c0_i32, %c0_i32_0 : i32, i32, i32, i32
  }
}

module attributes {stable_mosaic.version = 11 : i64} {
  func.func @_bn_relu_kernel(%arg0: i32, %arg1: i32, %arg2: memref<1x2x1024xf32, #tpu.memory_space<vmem>>, %arg3: memref<1x1024xf32, #tpu.memory_space<vmem>>, %arg4: memref<1x1024xf32, #tpu.memory_space<vmem>>, %arg5: memref<1x2x1024xbf16, #tpu.memory_space<vmem>>) attributes {dimension_semantics = [#tpu.dimension_semantics<parallel>, #tpu.dimension_semantics<parallel>], iteration_bounds = array<i64: 1, 1>, scalar_prefetch = 0 : i64, scratch_operands = 0 : i64, tpu.core_type = #tpu.core_type<tc>, window_params = [{transform_indices = @transform_0, window_bounds = array<i64: 1, 2, 1024>}, {pipeline_mode = #tpu.pipeline_mode<synchronous>, transform_indices = @transform_1, window_bounds = array<i64: 1, 1024>}, {pipeline_mode = #tpu.pipeline_mode<synchronous>, transform_indices = @transform_2, window_bounds = array<i64: 1, 1024>}, {transform_indices = @transform_3, window_bounds = array<i64: 1, 2, 1024>}]} {
    %c0 = arith.constant 0 : index
    %c0_0 = arith.constant 0 : index
    %c0_1 = arith.constant 0 : index
    %0 = vector.load %arg2[%c0, %c0_0, %c0_1] : memref<1x2x1024xf32, #tpu.memory_space<vmem>>, vector<1x2x1024xf32>
    %1 = vector.shape_cast %0 : vector<1x2x1024xf32> to vector<2x1024xf32>
    %c0_2 = arith.constant 0 : index
    %c0_3 = arith.constant 0 : index
    %2 = vector.load %arg3[%c0_2, %c0_3] : memref<1x1024xf32, #tpu.memory_space<vmem>>, vector<1x1024xf32>
    %3 = vector.broadcast %2 : vector<1x1024xf32> to vector<2x1024xf32>
    %4 = arith.mulf %1, %3 : vector<2x1024xf32>
    %c0_4 = arith.constant 0 : index
    %c0_5 = arith.constant 0 : index
    %5 = vector.load %arg4[%c0_4, %c0_5] : memref<1x1024xf32, #tpu.memory_space<vmem>>, vector<1x1024xf32>
    %6 = vector.broadcast %5 : vector<1x1024xf32> to vector<2x1024xf32>
    %7 = arith.addf %4, %6 : vector<2x1024xf32>
    %cst = arith.constant 0.000000e+00 : f32
    %8 = vector.broadcast %cst : f32 to vector<2x1024xf32>
    %9 = arith.maximumf %7, %8 : vector<2x1024xf32>
    %10 = arith.truncf %9 : vector<2x1024xf32> to vector<2x1024xbf16>
    %c0_6 = arith.constant 0 : index
    %c0_7 = arith.constant 0 : index
    %c0_8 = arith.constant 0 : index
    %11 = vector.load %arg5[%c0_6, %c0_7, %c0_8] : memref<1x2x1024xbf16, #tpu.memory_space<vmem>>, vector<1x2x1024xbf16>
    %12 = vector.shape_cast %11 : vector<1x2x1024xbf16> to vector<2x1024xbf16>
    %13 = vector.shape_cast %10 : vector<2x1024xbf16> to vector<1x2x1024xbf16>
    tpu.vector_store %arg5[%c0_6, %c0_7, %c0_8], %13 {strides = array<i32>} : memref<1x2x1024xbf16, #tpu.memory_space<vmem>>, vector<1x2x1024xbf16>,
    return
  }
  func.func @transform_0(%arg0: i32, %arg1: i32) -> (i32, i32, i32) {
    %c0_i32 = arith.constant 0 : i32
    %c0_i32_0 = arith.constant 0 : i32
    return %arg0, %arg1, %c0_i32 : i32, i32, i32
  }
  func.func @transform_1(%arg0: i32, %arg1: i32) -> (i32, i32) {
    %c0_i32 = arith.constant 0 : i32
    %c0_i32_0 = arith.constant 0 : i32
    %c0_i32_1 = arith.constant 0 : i32
    return %c0_i32, %c0_i32_0 : i32, i32
  }
  func.func @transform_2(%arg0: i32, %arg1: i32) -> (i32, i32) {
    %c0_i32 = arith.constant 0 : i32
    %c0_i32_0 = arith.constant 0 : i32
    %c0_i32_1 = arith.constant 0 : i32
    return %c0_i32, %c0_i32_0 : i32, i32
  }
  func.func @transform_3(%arg0: i32, %arg1: i32) -> (i32, i32, i32) {
    %c0_i32 = arith.constant 0 : i32
    %c0_i32_0 = arith.constant 0 : i32
    return %arg0, %arg1, %c0_i32 : i32, i32, i32
  }
}

module attributes {stable_mosaic.version = 11 : i64} {
  func.func @_matmul_stats_kernel(%arg0: i32, %arg1: i32, %arg2: memref<1x32x256xbf16, #tpu.memory_space<vmem>>, %arg3: memref<1x256x32xbf16, #tpu.memory_space<vmem>>, %arg4: memref<1x32x32xf32, #tpu.memory_space<vmem>>, %arg5: memref<1x1x8x32xf32, #tpu.memory_space<vmem>>) attributes {dimension_semantics = [#tpu.dimension_semantics<parallel>, #tpu.dimension_semantics<parallel>], iteration_bounds = array<i64: 4, 1>, scalar_prefetch = 0 : i64, scratch_operands = 0 : i64, tpu.core_type = #tpu.core_type<tc>, window_params = [{transform_indices = @transform_0, window_bounds = array<i64: 1, 32, 256>}, {transform_indices = @transform_1, window_bounds = array<i64: 1, 256, 32>}, {transform_indices = @transform_2, window_bounds = array<i64: 1, 32, 32>}, {transform_indices = @transform_3, window_bounds = array<i64: 1, 1, 8, 32>}]} {
    %c0 = arith.constant 0 : index
    %c0_0 = arith.constant 0 : index
    %c0_1 = arith.constant 0 : index
    %0 = vector.load %arg2[%c0, %c0_0, %c0_1] : memref<1x32x256xbf16, #tpu.memory_space<vmem>>, vector<1x32x256xbf16>
    %1 = vector.shape_cast %0 : vector<1x32x256xbf16> to vector<32x256xbf16>
    %c0_2 = arith.constant 0 : index
    %c0_3 = arith.constant 0 : index
    %c0_4 = arith.constant 0 : index
    %2 = vector.load %arg3[%c0_2, %c0_3, %c0_4] : memref<1x256x32xbf16, #tpu.memory_space<vmem>>, vector<1x256x32xbf16>
    %3 = vector.shape_cast %2 : vector<1x256x32xbf16> to vector<256x32xbf16>
    %cst = arith.constant dense<0.000000e+00> : vector<32x32xf32>
    %4 = tpu.matmul %1, %3, %cst {dimension_numbers = #tpu.dot_dimension_numbers<[1], [0], [0], [1], [0, 0, 1, 1], [], []>} : vector<32x256xbf16>, vector<256x32xbf16>, vector<32x32xf32> -> vector<32x32xf32>
    %c0_5 = arith.constant 0 : index
    %c0_6 = arith.constant 0 : index
    %c0_7 = arith.constant 0 : index
    %5 = vector.load %arg4[%c0_5, %c0_6, %c0_7] : memref<1x32x32xf32, #tpu.memory_space<vmem>>, vector<1x32x32xf32>
    %6 = vector.shape_cast %5 : vector<1x32x32xf32> to vector<32x32xf32>
    %7 = vector.shape_cast %4 : vector<32x32xf32> to vector<1x32x32xf32>
    tpu.vector_store %arg4[%c0_5, %c0_6, %c0_7], %7 {strides = array<i32>} : memref<1x32x32xf32, #tpu.memory_space<vmem>>, vector<1x32x32xf32>,
    %cst_8 = arith.constant dense<0.000000e+00> : vector<32xf32>
    %8 = vector.multi_reduction <add>, %4, %cst_8 [0] : vector<32x32xf32> to vector<32xf32>
    %9 = vector.shape_cast %8 : vector<32xf32> to vector<1x32xf32>
    %10 = arith.mulf %4, %4 : vector<32x32xf32>
    %cst_9 = arith.constant dense<0.000000e+00> : vector<32xf32>
    %11 = vector.multi_reduction <add>, %10, %cst_9 [0] : vector<32x32xf32> to vector<32xf32>
    %12 = vector.shape_cast %11 : vector<32xf32> to vector<1x32xf32>
    %cst_10 = arith.constant 0.000000e+00 : f32
    %13 = vector.broadcast %cst_10 : f32 to vector<6x32xf32>
    %14 = tpu.concatenate %9, %12, %13 in 0 : vector<1x32xf32>, vector<1x32xf32>, vector<6x32xf32> -> vector<8x32xf32>
    %c0_11 = arith.constant 0 : index
    %c0_12 = arith.constant 0 : index
    %c0_13 = arith.constant 0 : index
    %c0_14 = arith.constant 0 : index
    %15 = vector.load %arg5[%c0_11, %c0_12, %c0_13, %c0_14] : memref<1x1x8x32xf32, #tpu.memory_space<vmem>>, vector<1x1x8x32xf32>
    %16 = vector.shape_cast %15 : vector<1x1x8x32xf32> to vector<8x32xf32>
    %17 = vector.shape_cast %14 : vector<8x32xf32> to vector<1x1x8x32xf32>
    tpu.vector_store %arg5[%c0_11, %c0_12, %c0_13, %c0_14], %17 {strides = array<i32>} : memref<1x1x8x32xf32, #tpu.memory_space<vmem>>, vector<1x1x8x32xf32>,
    return
  }
  func.func @transform_0(%arg0: i32, %arg1: i32) -> (i32, i32, i32) {
    %c0_i32 = arith.constant 0 : i32
    %c0_i32_0 = arith.constant 0 : i32
    return %arg0, %arg1, %c0_i32 : i32, i32, i32
  }
  func.func @transform_1(%arg0: i32, %arg1: i32) -> (i32, i32, i32) {
    %c0_i32 = arith.constant 0 : i32
    %c0_i32_0 = arith.constant 0 : i32
    %c0_i32_1 = arith.constant 0 : i32
    return %arg0, %c0_i32, %c0_i32_0 : i32, i32, i32
  }
  func.func @transform_2(%arg0: i32, %arg1: i32) -> (i32, i32, i32) {
    %c0_i32 = arith.constant 0 : i32
    %c0_i32_0 = arith.constant 0 : i32
    return %arg0, %arg1, %c0_i32 : i32, i32, i32
  }
  func.func @transform_3(%arg0: i32, %arg1: i32) -> (i32, i32, i32, i32) {
    %c0_i32 = arith.constant 0 : i32
    %c0_i32_0 = arith.constant 0 : i32
    %c0_i32_1 = arith.constant 0 : i32
    return %arg0, %arg1, %c0_i32, %c0_i32_0 : i32, i32, i32, i32
  }
}

module attributes {stable_mosaic.version = 11 : i64} {
  func.func @_bn_relu_kernel(%arg0: i32, %arg1: i32, %arg2: memref<1x32x32xf32, #tpu.memory_space<vmem>>, %arg3: memref<1x32xf32, #tpu.memory_space<vmem>>, %arg4: memref<1x32xf32, #tpu.memory_space<vmem>>, %arg5: memref<1x32x32xbf16, #tpu.memory_space<vmem>>) attributes {dimension_semantics = [#tpu.dimension_semantics<parallel>, #tpu.dimension_semantics<parallel>], iteration_bounds = array<i64: 4, 1>, scalar_prefetch = 0 : i64, scratch_operands = 0 : i64, tpu.core_type = #tpu.core_type<tc>, window_params = [{transform_indices = @transform_0, window_bounds = array<i64: 1, 32, 32>}, {pipeline_mode = #tpu.pipeline_mode<synchronous>, transform_indices = @transform_1, window_bounds = array<i64: 1, 32>}, {pipeline_mode = #tpu.pipeline_mode<synchronous>, transform_indices = @transform_2, window_bounds = array<i64: 1, 32>}, {transform_indices = @transform_3, window_bounds = array<i64: 1, 32, 32>}]} {
    %c0 = arith.constant 0 : index
    %c0_0 = arith.constant 0 : index
    %c0_1 = arith.constant 0 : index
    %0 = vector.load %arg2[%c0, %c0_0, %c0_1] : memref<1x32x32xf32, #tpu.memory_space<vmem>>, vector<1x32x32xf32>
    %1 = vector.shape_cast %0 : vector<1x32x32xf32> to vector<32x32xf32>
    %c0_2 = arith.constant 0 : index
    %c0_3 = arith.constant 0 : index
    %2 = vector.load %arg3[%c0_2, %c0_3] : memref<1x32xf32, #tpu.memory_space<vmem>>, vector<1x32xf32>
    %3 = vector.broadcast %2 : vector<1x32xf32> to vector<32x32xf32>
    %4 = arith.mulf %1, %3 : vector<32x32xf32>
    %c0_4 = arith.constant 0 : index
    %c0_5 = arith.constant 0 : index
    %5 = vector.load %arg4[%c0_4, %c0_5] : memref<1x32xf32, #tpu.memory_space<vmem>>, vector<1x32xf32>
    %6 = vector.broadcast %5 : vector<1x32xf32> to vector<32x32xf32>
    %7 = arith.addf %4, %6 : vector<32x32xf32>
    %cst = arith.constant 0.000000e+00 : f32
    %8 = vector.broadcast %cst : f32 to vector<32x32xf32>
    %9 = arith.maximumf %7, %8 : vector<32x32xf32>
    %10 = arith.truncf %9 : vector<32x32xf32> to vector<32x32xbf16>
    %c0_6 = arith.constant 0 : index
    %c0_7 = arith.constant 0 : index
    %c0_8 = arith.constant 0 : index
    %11 = vector.load %arg5[%c0_6, %c0_7, %c0_8] : memref<1x32x32xbf16, #tpu.memory_space<vmem>>, vector<1x32x32xbf16>
    %12 = vector.shape_cast %11 : vector<1x32x32xbf16> to vector<32x32xbf16>
    %13 = vector.shape_cast %10 : vector<32x32xbf16> to vector<1x32x32xbf16>
    tpu.vector_store %arg5[%c0_6, %c0_7, %c0_8], %13 {strides = array<i32>} : memref<1x32x32xbf16, #tpu.memory_space<vmem>>, vector<1x32x32xbf16>,
    return
  }
  func.func @transform_0(%arg0: i32, %arg1: i32) -> (i32, i32, i32) {
    %c0_i32 = arith.constant 0 : i32
    %c0_i32_0 = arith.constant 0 : i32
    return %arg0, %arg1, %c0_i32 : i32, i32, i32
  }
  func.func @transform_1(%arg0: i32, %arg1: i32) -> (i32, i32) {
    %c0_i32 = arith.constant 0 : i32
    %c0_i32_0 = arith.constant 0 : i32
    %c0_i32_1 = arith.constant 0 : i32
    return %c0_i32, %c0_i32_0 : i32, i32
  }
  func.func @transform_2(%arg0: i32, %arg1: i32) -> (i32, i32) {
    %c0_i32 = arith.constant 0 : i32
    %c0_i32_0 = arith.constant 0 : i32
    %c0_i32_1 = arith.constant 0 : i32
    return %c0_i32, %c0_i32_0 : i32, i32
  }
  func.func @transform_3(%arg0: i32, %arg1: i32) -> (i32, i32, i32) {
    %c0_i32 = arith.constant 0 : i32
    %c0_i32_0 = arith.constant 0 : i32
    return %arg0, %arg1, %c0_i32 : i32, i32, i32
  }
}

module attributes {stable_mosaic.version = 11 : i64} {
  func.func @_matmul_stats_kernel(%arg0: i32, %arg1: i32, %arg2: memref<1x128x128xbf16, #tpu.memory_space<vmem>>, %arg3: memref<1x128x16xbf16, #tpu.memory_space<vmem>>, %arg4: memref<1x128x16xf32, #tpu.memory_space<vmem>>, %arg5: memref<1x1x8x16xf32, #tpu.memory_space<vmem>>) attributes {dimension_semantics = [#tpu.dimension_semantics<parallel>, #tpu.dimension_semantics<parallel>], iteration_bounds = array<i64: 4, 1>, scalar_prefetch = 0 : i64, scratch_operands = 0 : i64, tpu.core_type = #tpu.core_type<tc>, window_params = [{transform_indices = @transform_0, window_bounds = array<i64: 1, 128, 128>}, {transform_indices = @transform_1, window_bounds = array<i64: 1, 128, 16>}, {transform_indices = @transform_2, window_bounds = array<i64: 1, 128, 16>}, {transform_indices = @transform_3, window_bounds = array<i64: 1, 1, 8, 16>}]} {
    %c0 = arith.constant 0 : index
    %c0_0 = arith.constant 0 : index
    %c0_1 = arith.constant 0 : index
    %0 = vector.load %arg2[%c0, %c0_0, %c0_1] : memref<1x128x128xbf16, #tpu.memory_space<vmem>>, vector<1x128x128xbf16>
    %1 = vector.shape_cast %0 : vector<1x128x128xbf16> to vector<128x128xbf16>
    %c0_2 = arith.constant 0 : index
    %c0_3 = arith.constant 0 : index
    %c0_4 = arith.constant 0 : index
    %2 = vector.load %arg3[%c0_2, %c0_3, %c0_4] : memref<1x128x16xbf16, #tpu.memory_space<vmem>>, vector<1x128x16xbf16>
    %3 = vector.shape_cast %2 : vector<1x128x16xbf16> to vector<128x16xbf16>
    %cst = arith.constant dense<0.000000e+00> : vector<128x16xf32>
    %4 = tpu.matmul %1, %3, %cst {dimension_numbers = #tpu.dot_dimension_numbers<[1], [0], [0], [1], [0, 0, 1, 1], [], []>} : vector<128x128xbf16>, vector<128x16xbf16>, vector<128x16xf32> -> vector<128x16xf32>
    %c0_5 = arith.constant 0 : index
    %c0_6 = arith.constant 0 : index
    %c0_7 = arith.constant 0 : index
    %5 = vector.load %arg4[%c0_5, %c0_6, %c0_7] : memref<1x128x16xf32, #tpu.memory_space<vmem>>, vector<1x128x16xf32>
    %6 = vector.shape_cast %5 : vector<1x128x16xf32> to vector<128x16xf32>
    %7 = vector.shape_cast %4 : vector<128x16xf32> to vector<1x128x16xf32>
    tpu.vector_store %arg4[%c0_5, %c0_6, %c0_7], %7 {strides = array<i32>} : memref<1x128x16xf32, #tpu.memory_space<vmem>>, vector<1x128x16xf32>,
    %cst_8 = arith.constant dense<0.000000e+00> : vector<16xf32>
    %8 = vector.multi_reduction <add>, %4, %cst_8 [0] : vector<128x16xf32> to vector<16xf32>
    %9 = vector.shape_cast %8 : vector<16xf32> to vector<1x16xf32>
    %10 = arith.mulf %4, %4 : vector<128x16xf32>
    %cst_9 = arith.constant dense<0.000000e+00> : vector<16xf32>
    %11 = vector.multi_reduction <add>, %10, %cst_9 [0] : vector<128x16xf32> to vector<16xf32>
    %12 = vector.shape_cast %11 : vector<16xf32> to vector<1x16xf32>
    %cst_10 = arith.constant 0.000000e+00 : f32
    %13 = vector.broadcast %cst_10 : f32 to vector<6x16xf32>
    %14 = tpu.concatenate %9, %12, %13 in 0 : vector<1x16xf32>, vector<1x16xf32>, vector<6x16xf32> -> vector<8x16xf32>
    %c0_11 = arith.constant 0 : index
    %c0_12 = arith.constant 0 : index
    %c0_13 = arith.constant 0 : index
    %c0_14 = arith.constant 0 : index
    %15 = vector.load %arg5[%c0_11, %c0_12, %c0_13, %c0_14] : memref<1x1x8x16xf32, #tpu.memory_space<vmem>>, vector<1x1x8x16xf32>
    %16 = vector.shape_cast %15 : vector<1x1x8x16xf32> to vector<8x16xf32>
    %17 = vector.shape_cast %14 : vector<8x16xf32> to vector<1x1x8x16xf32>
    tpu.vector_store %arg5[%c0_11, %c0_12, %c0_13, %c0_14], %17 {strides = array<i32>} : memref<1x1x8x16xf32, #tpu.memory_space<vmem>>, vector<1x1x8x16xf32>,
    return
  }
  func.func @transform_0(%arg0: i32, %arg1: i32) -> (i32, i32, i32) {
    %c0_i32 = arith.constant 0 : i32
    %c0_i32_0 = arith.constant 0 : i32
    return %arg0, %arg1, %c0_i32 : i32, i32, i32
  }
  func.func @transform_1(%arg0: i32, %arg1: i32) -> (i32, i32, i32) {
    %c0_i32 = arith.constant 0 : i32
    %c0_i32_0 = arith.constant 0 : i32
    %c0_i32_1 = arith.constant 0 : i32
    return %arg0, %c0_i32, %c0_i32_0 : i32, i32, i32
  }
  func.func @transform_2(%arg0: i32, %arg1: i32) -> (i32, i32, i32) {
    %c0_i32 = arith.constant 0 : i32
    %c0_i32_0 = arith.constant 0 : i32
    return %arg0, %arg1, %c0_i32 : i32, i32, i32
  }
  func.func @transform_3(%arg0: i32, %arg1: i32) -> (i32, i32, i32, i32) {
    %c0_i32 = arith.constant 0 : i32
    %c0_i32_0 = arith.constant 0 : i32
    %c0_i32_1 = arith.constant 0 : i32
    return %arg0, %arg1, %c0_i32, %c0_i32_0 : i32, i32, i32, i32
  }
}

module attributes {stable_mosaic.version = 11 : i64} {
  func.func @_bn_relu_kernel(%arg0: i32, %arg1: i32, %arg2: memref<1x128x16xf32, #tpu.memory_space<vmem>>, %arg3: memref<1x16xf32, #tpu.memory_space<vmem>>, %arg4: memref<1x16xf32, #tpu.memory_space<vmem>>, %arg5: memref<1x128x16xbf16, #tpu.memory_space<vmem>>) attributes {dimension_semantics = [#tpu.dimension_semantics<parallel>, #tpu.dimension_semantics<parallel>], iteration_bounds = array<i64: 4, 1>, scalar_prefetch = 0 : i64, scratch_operands = 0 : i64, tpu.core_type = #tpu.core_type<tc>, window_params = [{transform_indices = @transform_0, window_bounds = array<i64: 1, 128, 16>}, {pipeline_mode = #tpu.pipeline_mode<synchronous>, transform_indices = @transform_1, window_bounds = array<i64: 1, 16>}, {pipeline_mode = #tpu.pipeline_mode<synchronous>, transform_indices = @transform_2, window_bounds = array<i64: 1, 16>}, {transform_indices = @transform_3, window_bounds = array<i64: 1, 128, 16>}]} {
    %c0 = arith.constant 0 : index
    %c0_0 = arith.constant 0 : index
    %c0_1 = arith.constant 0 : index
    %0 = vector.load %arg2[%c0, %c0_0, %c0_1] : memref<1x128x16xf32, #tpu.memory_space<vmem>>, vector<1x128x16xf32>
    %1 = vector.shape_cast %0 : vector<1x128x16xf32> to vector<128x16xf32>
    %c0_2 = arith.constant 0 : index
    %c0_3 = arith.constant 0 : index
    %2 = vector.load %arg3[%c0_2, %c0_3] : memref<1x16xf32, #tpu.memory_space<vmem>>, vector<1x16xf32>
    %3 = vector.broadcast %2 : vector<1x16xf32> to vector<128x16xf32>
    %4 = arith.mulf %1, %3 : vector<128x16xf32>
    %c0_4 = arith.constant 0 : index
    %c0_5 = arith.constant 0 : index
    %5 = vector.load %arg4[%c0_4, %c0_5] : memref<1x16xf32, #tpu.memory_space<vmem>>, vector<1x16xf32>
    %6 = vector.broadcast %5 : vector<1x16xf32> to vector<128x16xf32>
    %7 = arith.addf %4, %6 : vector<128x16xf32>
    %cst = arith.constant 0.000000e+00 : f32
    %8 = vector.broadcast %cst : f32 to vector<128x16xf32>
    %9 = arith.maximumf %7, %8 : vector<128x16xf32>
    %10 = arith.truncf %9 : vector<128x16xf32> to vector<128x16xbf16>
    %c0_6 = arith.constant 0 : index
    %c0_7 = arith.constant 0 : index
    %c0_8 = arith.constant 0 : index
    %11 = vector.load %arg5[%c0_6, %c0_7, %c0_8] : memref<1x128x16xbf16, #tpu.memory_space<vmem>>, vector<1x128x16xbf16>
    %12 = vector.shape_cast %11 : vector<1x128x16xbf16> to vector<128x16xbf16>
    %13 = vector.shape_cast %10 : vector<128x16xbf16> to vector<1x128x16xbf16>
    tpu.vector_store %arg5[%c0_6, %c0_7, %c0_8], %13 {strides = array<i32>} : memref<1x128x16xbf16, #tpu.memory_space<vmem>>, vector<1x128x16xbf16>,
    return
  }
  func.func @transform_0(%arg0: i32, %arg1: i32) -> (i32, i32, i32) {
    %c0_i32 = arith.constant 0 : i32
    %c0_i32_0 = arith.constant 0 : i32
    return %arg0, %arg1, %c0_i32 : i32, i32, i32
  }
  func.func @transform_1(%arg0: i32, %arg1: i32) -> (i32, i32) {
    %c0_i32 = arith.constant 0 : i32
    %c0_i32_0 = arith.constant 0 : i32
    %c0_i32_1 = arith.constant 0 : i32
    return %c0_i32, %c0_i32_0 : i32, i32
  }
  func.func @transform_2(%arg0: i32, %arg1: i32) -> (i32, i32) {
    %c0_i32 = arith.constant 0 : i32
    %c0_i32_0 = arith.constant 0 : i32
    %c0_i32_1 = arith.constant 0 : i32
    return %c0_i32, %c0_i32_0 : i32, i32
  }
  func.func @transform_3(%arg0: i32, %arg1: i32) -> (i32, i32, i32) {
    %c0_i32 = arith.constant 0 : i32
    %c0_i32_0 = arith.constant 0 : i32
    return %arg0, %arg1, %c0_i32 : i32, i32, i32
  }
}

module attributes {stable_mosaic.version = 11 : i64} {
  func.func @_matmul_stats_kernel(%arg0: i32, %arg1: i32, %arg2: memref<1x256x64xbf16, #tpu.memory_space<vmem>>, %arg3: memref<1x64x8xbf16, #tpu.memory_space<vmem>>, %arg4: memref<1x256x8xf32, #tpu.memory_space<vmem>>, %arg5: memref<1x1x8x8xf32, #tpu.memory_space<vmem>>) attributes {dimension_semantics = [#tpu.dimension_semantics<parallel>, #tpu.dimension_semantics<parallel>], iteration_bounds = array<i64: 4, 2>, scalar_prefetch = 0 : i64, scratch_operands = 0 : i64, tpu.core_type = #tpu.core_type<tc>, window_params = [{transform_indices = @transform_0, window_bounds = array<i64: 1, 256, 64>}, {transform_indices = @transform_1, window_bounds = array<i64: 1, 64, 8>}, {transform_indices = @transform_2, window_bounds = array<i64: 1, 256, 8>}, {transform_indices = @transform_3, window_bounds = array<i64: 1, 1, 8, 8>}]} {
    %c0 = arith.constant 0 : index
    %c0_0 = arith.constant 0 : index
    %c0_1 = arith.constant 0 : index
    %0 = vector.load %arg2[%c0, %c0_0, %c0_1] : memref<1x256x64xbf16, #tpu.memory_space<vmem>>, vector<1x256x64xbf16>
    %1 = vector.shape_cast %0 : vector<1x256x64xbf16> to vector<256x64xbf16>
    %c0_2 = arith.constant 0 : index
    %c0_3 = arith.constant 0 : index
    %c0_4 = arith.constant 0 : index
    %2 = vector.load %arg3[%c0_2, %c0_3, %c0_4] : memref<1x64x8xbf16, #tpu.memory_space<vmem>>, vector<1x64x8xbf16>
    %3 = vector.shape_cast %2 : vector<1x64x8xbf16> to vector<64x8xbf16>
    %cst = arith.constant dense<0.000000e+00> : vector<256x8xf32>
    %4 = tpu.matmul %1, %3, %cst {dimension_numbers = #tpu.dot_dimension_numbers<[1], [0], [0], [1], [0, 0, 1, 1], [], []>} : vector<256x64xbf16>, vector<64x8xbf16>, vector<256x8xf32> -> vector<256x8xf32>
    %c0_5 = arith.constant 0 : index
    %c0_6 = arith.constant 0 : index
    %c0_7 = arith.constant 0 : index
    %5 = vector.load %arg4[%c0_5, %c0_6, %c0_7] : memref<1x256x8xf32, #tpu.memory_space<vmem>>, vector<1x256x8xf32>
    %6 = vector.shape_cast %5 : vector<1x256x8xf32> to vector<256x8xf32>
    %7 = vector.shape_cast %4 : vector<256x8xf32> to vector<1x256x8xf32>
    tpu.vector_store %arg4[%c0_5, %c0_6, %c0_7], %7 {strides = array<i32>} : memref<1x256x8xf32, #tpu.memory_space<vmem>>, vector<1x256x8xf32>,
    %cst_8 = arith.constant dense<0.000000e+00> : vector<8xf32>
    %8 = vector.multi_reduction <add>, %4, %cst_8 [0] : vector<256x8xf32> to vector<8xf32>
    %9 = vector.shape_cast %8 : vector<8xf32> to vector<1x8xf32>
    %10 = arith.mulf %4, %4 : vector<256x8xf32>
    %cst_9 = arith.constant dense<0.000000e+00> : vector<8xf32>
    %11 = vector.multi_reduction <add>, %10, %cst_9 [0] : vector<256x8xf32> to vector<8xf32>
    %12 = vector.shape_cast %11 : vector<8xf32> to vector<1x8xf32>
    %cst_10 = arith.constant 0.000000e+00 : f32
    %13 = vector.broadcast %cst_10 : f32 to vector<6x8xf32>
    %14 = tpu.concatenate %9, %12, %13 in 0 : vector<1x8xf32>, vector<1x8xf32>, vector<6x8xf32> -> vector<8x8xf32>
    %c0_11 = arith.constant 0 : index
    %c0_12 = arith.constant 0 : index
    %c0_13 = arith.constant 0 : index
    %c0_14 = arith.constant 0 : index
    %15 = vector.load %arg5[%c0_11, %c0_12, %c0_13, %c0_14] : memref<1x1x8x8xf32, #tpu.memory_space<vmem>>, vector<1x1x8x8xf32>
    %16 = vector.shape_cast %15 : vector<1x1x8x8xf32> to vector<8x8xf32>
    %17 = vector.shape_cast %14 : vector<8x8xf32> to vector<1x1x8x8xf32>
    tpu.vector_store %arg5[%c0_11, %c0_12, %c0_13, %c0_14], %17 {strides = array<i32>} : memref<1x1x8x8xf32, #tpu.memory_space<vmem>>, vector<1x1x8x8xf32>,
    return
  }
  func.func @transform_0(%arg0: i32, %arg1: i32) -> (i32, i32, i32) {
    %c0_i32 = arith.constant 0 : i32
    %c0_i32_0 = arith.constant 0 : i32
    return %arg0, %arg1, %c0_i32 : i32, i32, i32
  }
  func.func @transform_1(%arg0: i32, %arg1: i32) -> (i32, i32, i32) {
    %c0_i32 = arith.constant 0 : i32
    %c0_i32_0 = arith.constant 0 : i32
    %c0_i32_1 = arith.constant 0 : i32
    return %arg0, %c0_i32, %c0_i32_0 : i32, i32, i32
  }
  func.func @transform_2(%arg0: i32, %arg1: i32) -> (i32, i32, i32) {
    %c0_i32 = arith.constant 0 : i32
    %c0_i32_0 = arith.constant 0 : i32
    return %arg0, %arg1, %c0_i32 : i32, i32, i32
  }
  func.func @transform_3(%arg0: i32, %arg1: i32) -> (i32, i32, i32, i32) {
    %c0_i32 = arith.constant 0 : i32
    %c0_i32_0 = arith.constant 0 : i32
    %c0_i32_1 = arith.constant 0 : i32
    return %arg0, %arg1, %c0_i32, %c0_i32_0 : i32, i32, i32, i32
  }
}

module attributes {stable_mosaic.version = 11 : i64} {
  func.func @_bn_relu_kernel(%arg0: i32, %arg1: i32, %arg2: memref<1x512x8xf32, #tpu.memory_space<vmem>>, %arg3: memref<1x8xf32, #tpu.memory_space<vmem>>, %arg4: memref<1x8xf32, #tpu.memory_space<vmem>>, %arg5: memref<1x512x8xbf16, #tpu.memory_space<vmem>>) attributes {dimension_semantics = [#tpu.dimension_semantics<parallel>, #tpu.dimension_semantics<parallel>], iteration_bounds = array<i64: 4, 1>, scalar_prefetch = 0 : i64, scratch_operands = 0 : i64, tpu.core_type = #tpu.core_type<tc>, window_params = [{transform_indices = @transform_0, window_bounds = array<i64: 1, 512, 8>}, {pipeline_mode = #tpu.pipeline_mode<synchronous>, transform_indices = @transform_1, window_bounds = array<i64: 1, 8>}, {pipeline_mode = #tpu.pipeline_mode<synchronous>, transform_indices = @transform_2, window_bounds = array<i64: 1, 8>}, {transform_indices = @transform_3, window_bounds = array<i64: 1, 512, 8>}]} {
    %c0 = arith.constant 0 : index
    %c0_0 = arith.constant 0 : index
    %c0_1 = arith.constant 0 : index
    %0 = vector.load %arg2[%c0, %c0_0, %c0_1] : memref<1x512x8xf32, #tpu.memory_space<vmem>>, vector<1x512x8xf32>
    %1 = vector.shape_cast %0 : vector<1x512x8xf32> to vector<512x8xf32>
    %c0_2 = arith.constant 0 : index
    %c0_3 = arith.constant 0 : index
    %2 = vector.load %arg3[%c0_2, %c0_3] : memref<1x8xf32, #tpu.memory_space<vmem>>, vector<1x8xf32>
    %3 = vector.broadcast %2 : vector<1x8xf32> to vector<512x8xf32>
    %4 = arith.mulf %1, %3 : vector<512x8xf32>
    %c0_4 = arith.constant 0 : index
    %c0_5 = arith.constant 0 : index
    %5 = vector.load %arg4[%c0_4, %c0_5] : memref<1x8xf32, #tpu.memory_space<vmem>>, vector<1x8xf32>
    %6 = vector.broadcast %5 : vector<1x8xf32> to vector<512x8xf32>
    %7 = arith.addf %4, %6 : vector<512x8xf32>
    %cst = arith.constant 0.000000e+00 : f32
    %8 = vector.broadcast %cst : f32 to vector<512x8xf32>
    %9 = arith.maximumf %7, %8 : vector<512x8xf32>
    %10 = arith.truncf %9 : vector<512x8xf32> to vector<512x8xbf16>
    %c0_6 = arith.constant 0 : index
    %c0_7 = arith.constant 0 : index
    %c0_8 = arith.constant 0 : index
    %11 = vector.load %arg5[%c0_6, %c0_7, %c0_8] : memref<1x512x8xbf16, #tpu.memory_space<vmem>>, vector<1x512x8xbf16>
    %12 = vector.shape_cast %11 : vector<1x512x8xbf16> to vector<512x8xbf16>
    %13 = vector.shape_cast %10 : vector<512x8xbf16> to vector<1x512x8xbf16>
    tpu.vector_store %arg5[%c0_6, %c0_7, %c0_8], %13 {strides = array<i32>} : memref<1x512x8xbf16, #tpu.memory_space<vmem>>, vector<1x512x8xbf16>,
    return
  }
  func.func @transform_0(%arg0: i32, %arg1: i32) -> (i32, i32, i32) {
    %c0_i32 = arith.constant 0 : i32
    %c0_i32_0 = arith.constant 0 : i32
    return %arg0, %arg1, %c0_i32 : i32, i32, i32
  }
  func.func @transform_1(%arg0: i32, %arg1: i32) -> (i32, i32) {
    %c0_i32 = arith.constant 0 : i32
    %c0_i32_0 = arith.constant 0 : i32
    %c0_i32_1 = arith.constant 0 : i32
    return %c0_i32, %c0_i32_0 : i32, i32
  }
  func.func @transform_2(%arg0: i32, %arg1: i32) -> (i32, i32) {
    %c0_i32 = arith.constant 0 : i32
    %c0_i32_0 = arith.constant 0 : i32
    %c0_i32_1 = arith.constant 0 : i32
    return %c0_i32, %c0_i32_0 : i32, i32
  }
  func.func @transform_3(%arg0: i32, %arg1: i32) -> (i32, i32, i32) {
    %c0_i32 = arith.constant 0 : i32
    %c0_i32_0 = arith.constant 0 : i32
    return %arg0, %arg1, %c0_i32 : i32, i32, i32
  }
}

module attributes {stable_mosaic.version = 11 : i64} {
  func.func @_matmul_bias_tanh_kernel(%arg0: i32, %arg1: i32, %arg2: memref<1x256x32xbf16, #tpu.memory_space<vmem>>, %arg3: memref<1x32x128xbf16, #tpu.memory_space<vmem>>, %arg4: memref<1x128xf32, #tpu.memory_space<vmem>>, %arg5: memref<1x256x128xf32, #tpu.memory_space<vmem>>) attributes {dimension_semantics = [#tpu.dimension_semantics<parallel>, #tpu.dimension_semantics<parallel>], iteration_bounds = array<i64: 4, 8>, scalar_prefetch = 0 : i64, scratch_operands = 0 : i64, tpu.core_type = #tpu.core_type<tc>, window_params = [{transform_indices = @transform_0, window_bounds = array<i64: 1, 256, 32>}, {transform_indices = @transform_1, window_bounds = array<i64: 1, 32, 128>}, {pipeline_mode = #tpu.pipeline_mode<synchronous>, transform_indices = @transform_2, window_bounds = array<i64: 1, 128>}, {transform_indices = @transform_3, window_bounds = array<i64: 1, 256, 128>}]} {
    %c0 = arith.constant 0 : index
    %c0_0 = arith.constant 0 : index
    %c0_1 = arith.constant 0 : index
    %0 = vector.load %arg2[%c0, %c0_0, %c0_1] : memref<1x256x32xbf16, #tpu.memory_space<vmem>>, vector<1x256x32xbf16>
    %1 = vector.shape_cast %0 : vector<1x256x32xbf16> to vector<256x32xbf16>
    %c0_2 = arith.constant 0 : index
    %c0_3 = arith.constant 0 : index
    %c0_4 = arith.constant 0 : index
    %2 = vector.load %arg3[%c0_2, %c0_3, %c0_4] : memref<1x32x128xbf16, #tpu.memory_space<vmem>>, vector<1x32x128xbf16>
    %3 = vector.shape_cast %2 : vector<1x32x128xbf16> to vector<32x128xbf16>
    %cst = arith.constant dense<0.000000e+00> : vector<256x128xf32>
    %4 = tpu.matmul %1, %3, %cst {dimension_numbers = #tpu.dot_dimension_numbers<[1], [0], [0], [1], [0, 0, 1, 1], [], []>} : vector<256x32xbf16>, vector<32x128xbf16>, vector<256x128xf32> -> vector<256x128xf32>
    %c0_5 = arith.constant 0 : index
    %c0_6 = arith.constant 0 : index
    %5 = vector.load %arg4[%c0_5, %c0_6] : memref<1x128xf32, #tpu.memory_space<vmem>>, vector<1x128xf32>
    %6 = vector.broadcast %5 : vector<1x128xf32> to vector<256x128xf32>
    %7 = arith.addf %4, %6 : vector<256x128xf32>
    %8 = math.tanh %7 : vector<256x128xf32>
    %c0_7 = arith.constant 0 : index
    %c0_8 = arith.constant 0 : index
    %c0_9 = arith.constant 0 : index
    %9 = vector.load %arg5[%c0_7, %c0_8, %c0_9] : memref<1x256x128xf32, #tpu.memory_space<vmem>>, vector<1x256x128xf32>
    %10 = vector.shape_cast %9 : vector<1x256x128xf32> to vector<256x128xf32>
    %11 = vector.shape_cast %8 : vector<256x128xf32> to vector<1x256x128xf32>
    tpu.vector_store %arg5[%c0_7, %c0_8, %c0_9], %11 {strides = array<i32>} : memref<1x256x128xf32, #tpu.memory_space<vmem>>, vector<1x256x128xf32>,
    return
  }
  func.func @transform_0(%arg0: i32, %arg1: i32) -> (i32, i32, i32) {
    %c0_i32 = arith.constant 0 : i32
    %c0_i32_0 = arith.constant 0 : i32
    return %arg0, %arg1, %c0_i32 : i32, i32, i32
  }
  func.func @transform_1(%arg0: i32, %arg1: i32) -> (i32, i32, i32) {
    %c0_i32 = arith.constant 0 : i32
    %c0_i32_0 = arith.constant 0 : i32
    %c0_i32_1 = arith.constant 0 : i32
    return %arg0, %c0_i32, %c0_i32_0 : i32, i32, i32
  }
  func.func @transform_2(%arg0: i32, %arg1: i32) -> (i32, i32) {
    %c0_i32 = arith.constant 0 : i32
    %c0_i32_0 = arith.constant 0 : i32
    %c0_i32_1 = arith.constant 0 : i32
    return %c0_i32, %c0_i32_0 : i32, i32
  }
  func.func @transform_3(%arg0: i32, %arg1: i32) -> (i32, i32, i32) {
    %c0_i32 = arith.constant 0 : i32
    %c0_i32_0 = arith.constant 0 : i32
    return %arg0, %arg1, %c0_i32 : i32, i32, i32
  }
}

</mosaic_0001>

<bundles_post_ra>
// kernel: _lambda_.10
= control target key start
LH: loop header
LB: loop body
LE: loop exit
PB: predicated region body
PF: predicated region fallthrough
CT: control target
= control target key end

     0   :  { %vm32_vm0 = vcmask 1041408   ;;  %vm34_vm1 = vcmask 1045508   ;;  %vm36_vm2 = vcmask 1043456   ;;  %vm109_vm3 = vcmask 1040384   ;;  %s184_s1 = inlined_call_operand.vmem [shape: f32[1,1024], index: 1, kind: input, shape index: {}]   ;;  %s185_s2 = inlined_call_operand.vmem [shape: f32[1,1024], index: 2, kind: input, shape index: {}]   ;;  %s186_s0 = inlined_call_operand.vmem [shape: f32[1,2,1024], index: 0, kind: input, shape index: {}]   ;;  %s187_s3 = inlined_call_operand.vmem [shape: bf16[1,2,1024], index: 3, kind: output, shape index: {}]  }
   0x1   :  { %v16_v0 = vld [vmem:[%s184_s1] sm:$0xff]  ;;  %v15_v31 = vld [vmem:[%s186_s0 + $0x8] sm:$0xff]  ;;  %vm113_vm4 = vcmask 1042434   ;;  %vm118_vm5 = vcmask 1044484   ;;  %vm122_vm6 = vcmask 1046534  }
   0x2   :  { %v45_v1 = vld [vmem:[%s185_s2] sm:$0xff]  ;;  %v18_v2 = vperm.slane %v16_v0, 0  ;;  %v19_v3 = vperm.slane %v16_v0, 1  ;;  %v20_v4 = vperm.slane %v16_v0, 2  ;;  %v21_v5 = vperm.slane %v16_v0, 3 }
   0x3   :  { %v47_v6 = vperm.slane %v45_v1, 0  ;;  %v48_v7 = vperm.slane %v45_v1, 1  ;;  %v49_v8 = vperm.slane %v45_v1, 2  ;;  %v50_v9 = vperm.slane %v45_v1, 3  ;;  %v14_v14 = vld [vmem:[%s186_s0] sm:$0xff] }
   0x4   :  { %v26_v10 = vrot.slane %v19_v3, 6  ;;  %v27_v11 = vrot.slane %v20_v4, 4  ;;  %v28_v12 = vrot.slane %v21_v5, 2  ;;  %v22_v13 = vperm.slane %v16_v0, 4 }
   0x5   :  { %v55_v15 = vrot.slane %v48_v7, 6  ;;  %v56_v16 = vrot.slane %v49_v8, 4  ;;  %v57_v17 = vrot.slane %v50_v9, 2  ;;  %v23_v18 = vperm.slane %v16_v0, 5 }
   0x6   :  { %v33_v19 = vsel %vm32_vm0, %v18_v2, %v26_v10  ;;  %v35_v20 = vsel %vm34_vm1, %v27_v11, %v28_v12  ;;  %v24_v21 = vperm.slane %v16_v0, 6  ;;  %v25_v22 = vperm.slane %v16_v0, 7 }
   0x7   :  { %v37_v23 = vsel %vm36_vm2, %v33_v19, %v35_v20  ;;  %v61_v24 = vsel %vm32_vm0, %v47_v6, %v55_v15  ;;  %v62_v25 = vsel %vm34_vm1, %v56_v16, %v57_v17  ;;  %v29_v26 = vrot.slane %v23_v18, 6 }
   0x8   :  { %v43_v27 = vmul.f32 %v37_v23, %v14_v14  ;;  %v63_v28 = vsel %vm36_vm2, %v61_v24, %v62_v25  ;;  %v30_v29 = vrot.slane %v24_v21, 4  ;;  %v31_v30 = vrot.slane %v25_v22, 2 }
   0x9   :  { %v38_v32 = vsel %vm32_vm0, %v22_v13, %v29_v26  ;;  %v51_v33 = vperm.slane %v45_v1, 4  ;;  %v52_v34 = vperm.slane %v45_v1, 5  ;;  %v53_v35 = vperm.slane %v45_v1, 6 }
   0xa   :  { %v69_v36 = vadd.f32 %v63_v28, %v43_v27  ;;  %v39_v37 = vsel %vm34_vm1, %v30_v29, %v31_v30  ;;  %v54_v38 = vperm.slane %v45_v1, 7 }
   0xb   :  { %v40_v39 = vsel %vm36_vm2, %v38_v32, %v39_v37  ;;  %v58_v40 = vrot.slane %v52_v34, 6  ;;  %v59_v41 = vrot.slane %v53_v35, 4 }
   0xc   :  { %v71_v42 = vmax.f32 %v69_v36, 0.0  ;;  %v44_v43 = vmul.f32 %v40_v39, %v15_v31  ;;  %v60_v44 = vrot.slane %v54_v38, 2 }
   0xd   :  { %v64_v45 = vsel %vm32_vm0, %v51_v33, %v58_v40 }
   0xe   :  { %75 = vst [vmem:[#allocation1] ss:$4 sm:$0xff] %v71_v42  ;;  %v65_v46 = vsel %vm34_vm1, %v59_v41, %v60_v44 }
   0xf   :  { %v66_v47 = vsel %vm36_vm2, %v64_v45, %v65_v46 }
  0x10   :  { %v70_v48 = vadd.f32 %v66_v47, %v44_v43 }
  0x12   :  { %v72_v49 = vmax.f32 %v70_v48, 0.0 }
  0x14   :  { %77 = vst [vmem:[#allocation1 + $0x20] ss:$4 sm:$0xff] %v72_v49 }
  0x15   :  { %v78_v50 = vld.sshfl [vmem:[#allocation1] sm:$0xff pattern:$0x73625140]  ;;  %v79_v51 = vld.sshfl [vmem:[#allocation1 + $0x8] sm:$0xff pattern:$0x73625140] }
  0x16   :  { %v80_v52 = vld.sshfl [vmem:[#allocation1 + $0x10] sm:$0xff pattern:$0x73625140]  ;;  %v81_v53 = vld.sshfl [vmem:[#allocation1 + $0x18] sm:$0xff pattern:$0x73625140]  ;;  %v94_v54 = vpack.c.bf16 %v79_v51, %v78_v50 }
  0x17   :  { %v95_v55 = vpack.c.bf16 %v81_v53, %v80_v52 }
  0x18   :  { %v102_v56 = vrot.slane %v94_v54, 3 }
  0x19   :  { %v103_v57 = vrot.slane %v95_v55, 6  ;;  %v104_v58 = vrot.slane %v95_v55, 1 }
  0x1a   :  { %v112_v1 = vsel %vm109_vm3, %v94_v54, %v102_v56 }
  0x1b   :  { %v82_v59 = vld.sshfl [vmem:[#allocation1 + $0x20] sm:$0xff pattern:$0x73625140]  ;;  %v83_v60 = vld.sshfl [vmem:[#allocation1 + $0x28] sm:$0xff pattern:$0x73625140]  ;;  %v116_v2 = vsel %vm113_vm4, %v103_v57, %v104_v58 }
  0x1c   :  { %v84_v61 = vld.sshfl [vmem:[#allocation1 + $0x30] sm:$0xff pattern:$0x73625140]  ;;  %v85_v62 = vld.sshfl [vmem:[#allocation1 + $0x38] sm:$0xff pattern:$0x73625140]  ;;  %v96_v63 = vpack.c.bf16 %v83_v60, %v82_v59  ;;  %v117_v7 = vsel %vm32_vm0, %v112_v1, %v116_v2 }
  0x1d   :  { %v97_v0 = vpack.c.bf16 %v85_v62, %v84_v61 }
  0x1e   :  { %v105_v3 = vrot.slane %v96_v63, 4  ;;  %v106_v4 = vrot.slane %v96_v63, 7 }
  0x1f   :  { %v107_v5 = vrot.slane %v97_v0, 2  ;;  %v108_v6 = vrot.slane %v97_v0, 5 }
  0x20   :  { %v121_v8 = vsel %vm118_vm5, %v105_v3, %v106_v4 }
  0x21   :  { %v125_v9 = vsel %vm122_vm6, %v107_v5, %v108_v6 }
  0x22   :  { %v126_v10 = vsel %vm34_vm1, %v121_v8, %v125_v9 }
  0x23   :  { %v127_v11 = vsel %vm36_vm2, %v117_v7, %v126_v10 }
  0x24   :  { %129 = vst [vmem:[%s187_s3] sm:$0xff] %v127_v11 }

// kernel: _lambda_.9
= control target key start
LH: loop header
LB: loop body
LE: loop exit
PB: predicated region body
PF: predicated region fallthrough
CT: control target
= control target key end

     0   :  { %9 = vsyncpa [#allocation3], 0  ;;  %s401_s15 = smov [#allocation2]   ;;  %s512_s0 = inlined_call_operand.vmem [shape: bf16[1,2,8], index: 0, kind: input, shape index: {}]   ;;  %s513_s1 = inlined_call_operand.hbm [shape: bf16[1,8,1024], index: 1, kind: input, shape index: {}]   ;;  %s514_s2 = inlined_call_operand.vmem [shape: f32[1,2,1024], index: 2, kind: output, shape index: {0}]   ;;  %s515_s3 = inlined_call_operand.vmem [shape: f32[1,1,8,1024], index: 3, kind: output, shape index: {1}]  }
   0x1   :  { %s17_s14 = sshll.u32 %s513_s1, 4  ;;  %s19_s16 = sshll.u32 %s401_s15, 4  ;;  %s18_s14 = int_to_ptr.hbm [resolvable:$true] %s17_s14  ;;  %s20_s16 = int_to_ptr.vmem [resolvable:$true] %s19_s16 }
   0x2   :  { %22 = dma.hbm_to_vmem [thread:$0]  %s18_s14, 512, %s20_s16, [#allocation3]  }
   0x3   :  { %399 = dma.done.wait [#allocation3], 512  }
   0x4   :  { %400 = vsyncadd [#allocation3], 4294966784  ;;  %v29_v0 = vld [vmem:[#allocation2] sm:$0xff]  ;;  %vm57_vm0 = vcmask 1043456   ;;  %v30_v1 = vld [vmem:[#allocation2 + $0x8] sm:$0xff]  ;;  %vm53_vm1 = vcmask 64512  }
   0x5   :  { %v37_v2 = vunpack.c.l.b16 %v29_v0  ;;  %v38_v3 = vunpack.c.h.b16 %v29_v0  ;;  %v39_v4 = vunpack.c.l.b16 %v30_v1  ;;  %v40_v5 = vunpack.c.h.b16 %v30_v1  ;;  %v32_v6 = vld [vmem:[#allocation2 + $0x18] sm:$0xff]  ;;  %v31_v7 = vld [vmem:[#allocation2 + $0x10] sm:$0xff]  ;;  %v28_v24 = vld [vmem:[%s512_s0] sm:$0x1] }
   0x6   :  { %v43_v8 = vunpack.c.l.b16 %v32_v6  ;;  %v44_v9 = vunpack.c.h.b16 %v32_v6  ;;  %v41_v10 = vunpack.c.l.b16 %v31_v7  ;;  %v42_v11 = vunpack.c.h.b16 %v31_v7 }
   0x7   :  { %v45_v12 = vpack.c.b16 %v37_v2, %v37_v2  ;;  %v46_v13 = vpack.c.b16 %v38_v3, %v38_v3  ;;  %v47_v14 = vpack.c.b16 %v39_v4, %v39_v4  ;;  %v48_v15 = vpack.c.b16 %v40_v5, %v40_v5 }
   0x8   :  { %v51_v16 = vpack.c.b16 %v43_v8, %v43_v8  ;;  %v52_v17 = vpack.c.b16 %v44_v9, %v44_v9  ;;  %v49_v18 = vpack.c.b16 %v41_v10, %v41_v10  ;;  %v50_v19 = vpack.c.b16 %v42_v11, %v42_v11 }
   0x9   :  { %v59_v20 = vsel %vm57_vm0, %v45_v12, 0  ;;  %v62_v21 = vsel %vm57_vm0, %v46_v13, 0  ;;  %v65_v22 = vsel %vm57_vm0, %v47_v14, 0  ;;  %v68_v23 = vsel %vm57_vm0, %v48_v15, 0 }
   0xa   :  { %89 = vmatpush.bf16.msra.mxu0 %v59_v20  ;;  %102 = vmatpush.bf16.msra.mxu1 %v62_v21  ;;  %v77_v25 = vsel %vm57_vm0, %v51_v16, 0  ;;  %v80_v26 = vsel %vm57_vm0, %v52_v17, 0  ;;  %v71_v27 = vsel %vm57_vm0, %v49_v18, 0  ;;  %v74_v28 = vsel %vm57_vm0, %v50_v19, 0 }
   0xb   :  { %115 = vmatpush.bf16.msra.mxu2 %v65_v22  ;;  %128 = vmatpush.bf16.msra.mxu3 %v68_v23  ;;  %vm200_vm2 = vcmask 1041408   ;;  %vm202_vm3 = vcmask 1045508   ;;  %vm332_vm4 = vcmask 1040384  }
   0xd   :  { %366 = vmatmul.msk.bf16.vlgmr.msra.gmra.mxu0 %vm53_vm1, %v28_v24  ;;  %367 = vmatmul.msk.bf16.vlgmr.msra.gmra.mxu1 %vm53_vm1, %v28_v24 }
   0xe   :  { %368 = vmatmul.msk.bf16.vlgmr.msra.gmra.mxu2 %vm53_vm1, %v28_v24  ;;  %369 = vmatmul.msk.bf16.vlgmr.msra.gmra.mxu3 %vm53_vm1, %v28_v24 }
   0xf   :  { %167 = vmatpush.bf16.msrb.mxu2 %v77_v25  ;;  %180 = vmatpush.bf16.msrb.mxu3 %v80_v26 }
  0x10   :  { %141 = vmatpush.bf16.msrb.mxu0 %v71_v27  ;;  %154 = vmatpush.bf16.msrb.mxu1 %v74_v28 }
  0x1d   :  { %370 = vmatmul.msk.bf16.vlgmr.msrb.gmra.mxu0 %vm53_vm1, %v28_v24  ;;  %371 = vmatmul.msk.bf16.vlgmr.msrb.gmra.mxu1 %vm53_vm1, %v28_v24 }
  0x1e   :  { %372 = vmatmul.msk.bf16.vlgmr.msrb.gmra.mxu2 %vm53_vm1, %v28_v24  ;;  %373 = vmatmul.msk.bf16.vlgmr.msrb.gmra.mxu3 %vm53_vm1, %v28_v24 }
  0x8a   :  { %v91_v29 = vpop.f32.mrf.mxu0  ;;  %v104_v30 = vpop.f32.mrf.mxu1 }
  0x8b   :  { %v212_v31 = vsel %vm200_vm2, %v91_v29, 0.0  ;;  %v268_v32 = vmul.f32 %v91_v29, %v91_v29  ;;  %v219_v33 = vsel %vm200_vm2, %v104_v30, 0.0  ;;  %v269_v36 = vmul.f32 %v104_v30, %v104_v30 }
  0x8c   :  { %v213_v34 = vrot.slane %v212_v31, 4  ;;  %v220_v35 = vrot.slane %v219_v33, 4  ;;  %v194_v46 = vrot.slane %v104_v30, 6 }
  0x8d   :  { %v276_v37 = vsel %vm200_vm2, %v268_v32, 0.0  ;;  %v283_v41 = vsel %vm200_vm2, %v269_v36, 0.0 }
  0x8e   :  { %v214_v38 = vadd.f32 %v213_v34, %v212_v31  ;;  %v277_v39 = vrot.slane %v276_v37, 4  ;;  %v221_v40 = vadd.f32 %v220_v35, %v219_v33  ;;  %v284_v42 = vrot.slane %v283_v41, 4 }
  0x8f   :  { %v201_v5 = vsel %vm200_vm2, %v91_v29, %v194_v46 }
  0x90   :  { %v215_v43 = vrot.slane %v214_v38, 2  ;;  %v278_v44 = vadd.f32 %v277_v39, %v276_v37  ;;  %v222_v45 = vrot.slane %v221_v40, 2  ;;  %v285_v47 = vadd.f32 %v284_v42, %v283_v41 }
  0x91   :  { %v117_v48 = vpop.f32.mrf.mxu2  ;;  %v130_v49 = vpop.f32.mrf.mxu3 }
  0x92   :  { %v216_v50 = vadd.f32 %v215_v43, %v214_v38  ;;  %v279_v51 = vrot.slane %v278_v44, 2  ;;  %v223_v52 = vadd.f32 %v222_v45, %v221_v40  ;;  %v195_v53 = vrot.slane %v117_v48, 4  ;;  %v93_v54 = vpop.f32.mrf.mxu0  ;;  %v106_v55 = vpop.f32.mrf.mxu1 }
  0x93   :  { %v286_v56 = vrot.slane %v285_v47, 2  ;;  %v226_v57 = vsel %vm200_vm2, %v117_v48, 0.0  ;;  %v270_v58 = vmul.f32 %v117_v48, %v117_v48  ;;  %v196_v59 = vrot.slane %v130_v49, 2 }
  0x94   :  { %v217_v60 = vrot.slane %v216_v50, 1  ;;  %v280_v61 = vadd.f32 %v279_v51, %v278_v44  ;;  %v224_v62 = vrot.slane %v223_v52, 1  ;;  %v227_v63 = vrot.slane %v226_v57, 4 }
  0x95   :  { %v287_v0 = vadd.f32 %v286_v56, %v285_v47  ;;  %v290_v1 = vsel %vm200_vm2, %v270_v58, 0.0  ;;  %v203_v2 = vsel %vm202_vm3, %v195_v53, %v196_v59  ;;  %v233_v3 = vsel %vm200_vm2, %v130_v49, 0.0 }
  0x96   :  { %v281_v4 = vrot.slane %v280_v61, 1  ;;  %v228_v6 = vadd.f32 %v227_v63, %v226_v57  ;;  %v291_v8 = vrot.slane %v290_v1, 4  ;;  %v204_v9 = vsel %vm57_vm0, %v201_v5, %v203_v2 }
  0x97   :  { %v288_v7 = vrot.slane %v287_v0, 1  ;;  %v234_v10 = vrot.slane %v233_v3, 4  ;;  %v218_v11 = vadd.f32 %v217_v60, %v216_v50  ;;  %210 = vst [vmem:[%s514_s2] sm:$0xff] %v204_v9  ;;  %v271_v14 = vmul.f32 %v130_v49, %v130_v49 }
  0x98   :  { %v282_v12 = vadd.f32 %v281_v4, %v280_v61  ;;  %v229_v13 = vrot.slane %v228_v6, 2  ;;  %v225_v15 = vadd.f32 %v224_v62, %v223_v52  ;;  %v292_v17 = vadd.f32 %v291_v8, %v290_v1 }
  0x99   :  { %v289_v16 = vadd.f32 %v288_v7, %v287_v0  ;;  %v235_v18 = vadd.f32 %v234_v10, %v233_v3  ;;  %v119_v19 = vpop.f32.mrf.mxu2  ;;  %v132_v20 = vpop.f32.mrf.mxu3  ;;  %v297_v23 = vsel %vm200_vm2, %v271_v14, 0.0 }
  0x9a   :  { %v333_v21 = vsel %vm332_vm4, %v218_v11, %v282_v12  ;;  %v230_v22 = vadd.f32 %v229_v13, %v228_v6  ;;  %v143_v24 = vpop.f32.mrf.mxu0  ;;  %v156_v25 = vpop.f32.mrf.mxu1  ;;  %v293_v28 = vrot.slane %v292_v17, 2  ;;  %v298_v32 = vrot.slane %v297_v23, 4 }
  0x9b   :  { %v341_v26 = vsel %vm200_vm2, %v333_v21, 0.0  ;;  %v334_v27 = vsel %vm332_vm4, %v225_v15, %v289_v16  ;;  %v236_v29 = vrot.slane %v235_v18, 2  ;;  %v240_v33 = vsel %vm200_vm2, %v143_v24, 0.0 }
  0x9c   :  { %349 = vst [vmem:[%s515_s3] sm:$0xff] %v341_v26  ;;  %v342_v30 = vsel %vm200_vm2, %v334_v27, 0.0  ;;  %v231_v31 = vrot.slane %v230_v22, 1  ;;  %v294_v34 = vadd.f32 %v293_v28, %v292_v17  ;;  %v241_v36 = vrot.slane %v240_v33, 4 }
  0x9d   :  { %350 = vst [vmem:[%s515_s3 + $0x8] sm:$0xff] %v342_v30  ;;  %v237_v35 = vadd.f32 %v236_v29, %v235_v18  ;;  %v272_v37 = vmul.f32 %v143_v24, %v143_v24  ;;  %v299_v39 = vadd.f32 %v298_v32, %v297_v23  ;;  %v247_v40 = vsel %vm200_vm2, %v156_v25, 0.0 }
  0x9e   :  { %v232_v38 = vadd.f32 %v231_v31, %v230_v22  ;;  %v295_v41 = vrot.slane %v294_v34, 1  ;;  %v242_v43 = vadd.f32 %v241_v36, %v240_v33  ;;  %v197_v47 = vrot.slane %v156_v25, 6 }
  0x9f   :  { %v238_v42 = vrot.slane %v237_v35, 1  ;;  %v304_v44 = vsel %vm200_vm2, %v272_v37, 0.0  ;;  %v300_v45 = vrot.slane %v299_v39, 2  ;;  %v248_v48 = vrot.slane %v247_v40, 4 }
  0xa0   :  { %v305_v46 = vrot.slane %v304_v44, 4  ;;  %v296_v49 = vadd.f32 %v295_v41, %v294_v34  ;;  %v243_v51 = vrot.slane %v242_v43, 2  ;;  %v273_v52 = vmul.f32 %v156_v25, %v156_v25 }
  0xa1   :  { %v239_v50 = vadd.f32 %v238_v42, %v237_v35  ;;  %v169_v53 = vpop.f32.mrf.mxu2  ;;  %v182_v54 = vpop.f32.mrf.mxu3  ;;  %v301_v55 = vadd.f32 %v300_v45, %v299_v39  ;;  %v249_v57 = vadd.f32 %v248_v48, %v247_v40  ;;  %v205_v13 = vsel %vm200_vm2, %v143_v24, %v197_v47 }
  0xa2   :  { %v306_v56 = vadd.f32 %v305_v46, %v304_v44  ;;  %v198_v58 = vrot.slane %v169_v53, 4  ;;  %v145_v59 = vpop.f32.mrf.mxu0  ;;  %v158_v60 = vpop.f32.mrf.mxu1  ;;  %v335_v61 = vsel %vm332_vm4, %v232_v38, %v296_v49  ;;  %v244_v62 = vadd.f32 %v243_v51, %v242_v43 }
  0xa3   :  { %v311_v63 = vsel %vm200_vm2, %v273_v52, 0.0  ;;  %v254_v0 = vsel %vm200_vm2, %v169_v53, 0.0  ;;  %v343_v1 = vsel %vm200_vm2, %v335_v61, 0.0  ;;  %v302_v2 = vrot.slane %v301_v55, 1 }
  0xa4   :  { %v307_v3 = vrot.slane %v306_v56, 2  ;;  %v250_v4 = vrot.slane %v249_v57, 2  ;;  %351 = vst [vmem:[%s515_s3 + $0x10] sm:$0xff] %v343_v1  ;;  %v245_v5 = vrot.slane %v244_v62, 1  ;;  %v312_v6 = vrot.slane %v311_v63, 4 }
  0xa5   :  { %v255_v7 = vrot.slane %v254_v0, 4  ;;  %v274_v8 = vmul.f32 %v169_v53, %v169_v53  ;;  %v303_v9 = vadd.f32 %v302_v2, %v301_v55  ;;  %v199_v12 = vrot.slane %v182_v54, 2 }
  0xa6   :  { %v308_v10 = vadd.f32 %v307_v3, %v306_v56  ;;  %v251_v11 = vadd.f32 %v250_v4, %v249_v57  ;;  %v313_v14 = vadd.f32 %v312_v6, %v311_v63  ;;  %v246_v18 = vadd.f32 %v245_v5, %v244_v62 }
  0xa7   :  { %v256_v15 = vadd.f32 %v255_v7, %v254_v0  ;;  %v318_v16 = vsel %vm200_vm2, %v274_v8, 0.0  ;;  %v336_v17 = vsel %vm332_vm4, %v239_v50, %v303_v9  ;;  %v206_v25 = vsel %vm202_vm3, %v198_v58, %v199_v12 }
  0xa8   :  { %v309_v19 = vrot.slane %v308_v10, 1  ;;  %v319_v20 = vrot.slane %v318_v16, 4  ;;  %v344_v21 = vsel %vm200_vm2, %v336_v17, 0.0  ;;  %v314_v22 = vrot.slane %v313_v14, 2 }
  0xa9   :  { %v257_v23 = vrot.slane %v256_v15, 2  ;;  %v171_v26 = vpop.f32.mrf.mxu2  ;;  %v184_v27 = vpop.f32.mrf.mxu3  ;;  %352 = vst [vmem:[%s515_s3 + $0x18] sm:$0xff] %v344_v21  ;;  %v252_v28 = vrot.slane %v251_v11, 1  ;;  %v207_v30 = vsel %vm57_vm0, %v205_v13, %v206_v25  ;;  %v261_v33 = vsel %vm200_vm2, %v182_v54, 0.0 }
  0xaa   :  { %v310_v24 = vadd.f32 %v309_v19, %v308_v10  ;;  %v320_v29 = vadd.f32 %v319_v20, %v318_v16  ;;  %v315_v31 = vadd.f32 %v314_v22, %v313_v14  ;;  %211 = vst [vmem:[%s514_s2 + $0x8] sm:$0xff] %v207_v30  ;;  %v275_v34 = vmul.f32 %v182_v54, %v182_v54 }
  0xab   :  { %v258_v32 = vadd.f32 %v257_v23, %v256_v15  ;;  %v262_v37 = vrot.slane %v261_v33, 4  ;;  %v253_v45 = vadd.f32 %v252_v28, %v251_v11 }
  0xac   :  { %v337_v35 = vsel %vm332_vm4, %v246_v18, %v310_v24  ;;  %v321_v36 = vrot.slane %v320_v29, 2  ;;  %v316_v39 = vrot.slane %v315_v31, 1  ;;  %v325_v41 = vsel %vm200_vm2, %v275_v34, 0.0 }
  0xad   :  { %v345_v38 = vsel %vm200_vm2, %v337_v35, 0.0  ;;  %v259_v40 = vrot.slane %v258_v32, 1  ;;  %v263_v43 = vadd.f32 %v262_v37, %v261_v33  ;;  %v326_v44 = vrot.slane %v325_v41, 4 }
  0xae   :  { %353 = vst [vmem:[%s515_s3 + $0x20] sm:$0xff] %v345_v38  ;;  %v322_v42 = vadd.f32 %v321_v36, %v320_v29  ;;  %v317_v46 = vadd.f32 %v316_v39, %v315_v31 }
  0xaf   :  { %v264_v48 = vrot.slane %v263_v43, 2  ;;  %v327_v49 = vadd.f32 %v326_v44, %v325_v41  ;;  %v260_v51 = vadd.f32 %v259_v40, %v258_v32 }
  0xb0   :  { %v323_v47 = vrot.slane %v322_v42, 1  ;;  %v338_v50 = vsel %vm332_vm4, %v253_v45, %v317_v46 }
  0xb1   :  { %v346_v52 = vsel %vm200_vm2, %v338_v50, 0.0  ;;  %v265_v54 = vadd.f32 %v264_v48, %v263_v43  ;;  %v328_v55 = vrot.slane %v327_v49, 2 }
  0xb2   :  { %v324_v53 = vadd.f32 %v323_v47, %v322_v42  ;;  %354 = vst [vmem:[%s515_s3 + $0x28] sm:$0xff] %v346_v52 }
  0xb3   :  { %v266_v57 = vrot.slane %v265_v54, 1  ;;  %v329_v58 = vadd.f32 %v328_v55, %v327_v49 }
  0xb4   :  { %v339_v56 = vsel %vm332_vm4, %v260_v51, %v324_v53 }
  0xb5   :  { %v347_v59 = vsel %vm200_vm2, %v339_v56, 0.0  ;;  %v330_v60 = vrot.slane %v329_v58, 1  ;;  %v267_v61 = vadd.f32 %v266_v57, %v265_v54 }
  0xb6   :  { %355 = vst [vmem:[%s515_s3 + $0x30] sm:$0xff] %v347_v59 }
  0xb7   :  { %v331_v62 = vadd.f32 %v330_v60, %v329_v58 }
  0xb9   :  { %v340_v63 = vsel %vm332_vm4, %v267_v61, %v331_v62 }
  0xba   :  { %v348_v0 = vsel %vm200_vm2, %v340_v63, 0.0 }
  0xbb   :  { %356 = vst [vmem:[%s515_s3 + $0x38] sm:$0xff] %v348_v0 }
  0xbc   :  { %365 = vsyncpa [#allocation3], 1 }

// kernel: _lambda_.11
= control target key start
LH: loop header
LB: loop body
LE: loop exit
PB: predicated region body
PF: predicated region fallthrough
CT: control target
= control target key end

     0   :  { %9 = vsyncpa [#allocation3], 0  ;;  %s1087_s0 = inlined_call_operand.vmem [shape: bf16[4,32,256], index: 0, kind: input, shape index: {}]   ;;  %s1088_s1 = inlined_call_operand.hbm [shape: bf16[4,256,32], index: 1, kind: input, shape index: {}]   ;;  %s1089_s2 = inlined_call_operand.vmem [shape: f32[4,32,32], index: 2, kind: output, shape index: {0}]   ;;  %s1090_s3 = inlined_call_operand.vmem [shape: f32[4,1,8,32], index: 3, kind: output, shape index: {1}]  }
   0x1   :  { %11 = vsyncpa [#allocation3 + $0x1], 0  ;;  %s954_s12 = smov 0   ;;  %s956_s13 = smov 0  }
   0x2   :  { %s958_s14 = smov 0   ;;  %s960_s15 = smov 0  }
   0x3   :  { %s962_s16 = smov 0   ;;  %s964_s17 = smov 0  }
   0x4 LB: > { %s658_s18 = sadd.s32 4294967295, %s930_s17   ;;  %s29_s19 = sadd.s32 1, %s926_s16  ;;  %s930_s17 = sphi %s964_s17, %s17_s17   ;;  %s926_s16 = sphi %s962_s16, %s1097_s16   ;;  %s922_s15 = sphi %s960_s15, %s1096_s15   ;;  %s918_s14 = sphi %s958_s14, %s1095_s14   ;;  %s914_s13 = sphi %s956_s13, %s1094_s13   ;;  %s910_s12 = sphi %s954_s12, %s1093_s12  }
   0x5   : > { %p31_p0 = scmp.ge.s32.totalorder %s29_s19, 4  ;;  %s64_s20 = sadd.s32 1, %s918_s14 }
   0x6   : > { %p71_p1 = scmp.ne.s32.totalorder %s918_s14, %s914_s13  ;;  %p72_p2 = scmp.eq.s32.totalorder %s930_s17, 0 }
   0x7   : > { %s1099_s19 = smov (%p31_p0, %s29_s19), 0  ;;  %p77_p4 = scmp.ne.s32.totalorder %s914_s13, %s910_s12 }
   0x8   : > { %p990_p3 = por %p72_p2, %p71_p1  ;;  %s61_s22 = ssub.s32 %s926_s16, %s1099_s19 }
   0x9   : > { %p78_p5 = scmp.eq.s32.totalorder %s658_s18, 0  ;;  %p62_p6 = scmp.eq.s32.totalorder %s61_s22, 0 }
   0xa   : > { %p799_p8 = scmp.lt.s32.totalorder %s930_s17, 4  ;;  %s171_s25 = sand.u32 1, %s918_s14  }
   0xb   : > { %p997_p7 = por %p78_p5, %p77_p4  ;;  %s754_s26 = sshll.u32 %s926_s16, 7 }
   0xc   : > { %s1003_s24 = scalar_select %p62_p6, %s918_s14, %s64_s20  }
   0xd   : > { %s662_s27 = sshll.u32 %s171_s25, 7  ;;  %s180_s30 = scalar_lea.hbm %s1088_s1, %s754_s26 }
   0xe   : > { %s181_s4 = sshll.u32 %s180_s30, 4  ;;  %s175_s5 = scalar_lea.vmem [#allocation2], %s662_s27  ;;  %s182_s4 = int_to_ptr.hbm [resolvable:$true] %s181_s4 }
   0xf   : > { %s183_s6 = sshll.u32 %s175_s5, 4  ;;  %p796_p9 = pnand %p799_p8, %p990_p3  ;;  %s184_s6 = int_to_ptr.vmem [resolvable:$true] %s183_s6 }
  0x10   : > { %p665_p10 = scmp.ge.s32.totalorder %s930_s17, 1  ;;  %p191_p11 = scmp.lt.s32.totalorder %s930_s17, 5 }
  0x11   : > { %s172_s7 = scalar_lea.sflag [#allocation3], %s171_s25  ;;  %s932_s8 = smov 64  }
  0x12   : > { %s933_s9 = smov 4   ;;  %p192_p12 = pnand %p665_p10, %p191_p11 }
  0x13   : > { %798 = dma.hbm_to_vmem [thread:$0]  (!%p796_p9), %s182_s4, 2048, %s184_s6, %s172_s7, %s932_s8, %s932_s8, %s933_s9  }
  0x14   : > { %195 = sbr.rel (%p192_p12) target bundleno = 221 (0xdd), region = 28  ;;  %s197_s10 = sand.u32 (!%p192_p12), 1, %s914_s13  }
  0x15   : > { %s666_s11 = sshll.u32 (!%p192_p12), %s197_s10, 7  ;;  %s198_s12 = scalar_lea.sflag (!%p192_p12), [#allocation3], %s197_s10 }
  0x16   : > { %s1015_s18 = scalar_lea.vmem (!%p192_p12), [#allocation2], %s666_s11 }
  0x19   : > { %905 = dma.done.wait (%p997_p7), %s198_s12, 2048  }
  0x1a   : > { %907 = vsyncadd (%p997_p7), %s198_s12, 4294965248  ;;  %v768_v0 = vld [vmem:[%s1015_s18 + $0x38] sm:$0xff]  ;;  %v767_v2 = vld [vmem:[%s1015_s18 + $0x30] sm:$0xff]  ;;  %p247_p13 = scmp.lt.s32.totalorder %s922_s15, 3  ;;  %vm464_vm0 = vcmask 261120   ;;  %vm499_vm1 = vcmask 1040384  }
  0x1b   : > { %v776_v1 = vld [vmem:[%s1015_s18 + $0x78] sm:$0xff]  ;;  %426 = vmatpush.bf16.msra.mxu0 %v768_v0  ;;  %777 = vmatpush.bf16.msra.mxu2 %v768_v0  ;;  %v775_v3 = vld [vmem:[%s1015_s18 + $0x70] sm:$0xff]  ;;  %v766_v4 = vld [vmem:[%s1015_s18 + $0x28] sm:$0xff]  ;;  %vm501_vm2 = vcmask 1041408  }
  0x1c   : > { %445 = vmatpush.bf16.msra.mxu1 %v776_v1  ;;  %785 = vmatpush.bf16.msra.mxu3 %v776_v1  ;;  %v774_v5 = vld [vmem:[%s1015_s18 + $0x68] sm:$0xff]  ;;  %v765_v6 = vld [vmem:[%s1015_s18 + $0x20] sm:$0xff]  ;;  %v764_v8 = vld [vmem:[%s1015_s18 + $0x18] sm:$0xff]  ;;  %s1101_s15 = smov (!%p247_p13, %s922_s15), 3 }
  0x1d   : > { %v773_v7 = vld [vmem:[%s1015_s18 + $0x60] sm:$0xff]  ;;  %v772_v9 = vld [vmem:[%s1015_s18 + $0x58] sm:$0xff]  ;;  %v763_v10 = vld [vmem:[%s1015_s18 + $0x10] sm:$0xff]  ;;  %s755_s20 = sshll.u32 %s1101_s15, 5  ;;  %s671_s28 = sshll.u32 %s1101_s15, 3 }
  0x1e   : > { %v771_v11 = vld [vmem:[%s1015_s18 + $0x50] sm:$0xff]  ;;  %v762_v12 = vld [vmem:[%s1015_s18 + $0x8] sm:$0xff]  ;;  %s255_s23 = scalar_lea.vmem %s1087_s0, %s755_s20  ;;  %v761_v14 = vld [vmem:[%s1015_s18] sm:$0xff]  ;;  %s265_s27 = scalar_lea.vmem %s1089_s2, %s755_s20 }
  0x1f   : > { %427 = vmatpush.bf16.msra.mxu0 %v767_v2  ;;  %778 = vmatpush.bf16.msra.mxu2 %v767_v2  ;;  %v770_v13 = vld [vmem:[%s1015_s18 + $0x48] sm:$0xff]  ;;  %v769_v15 = vld [vmem:[%s1015_s18 + $0x40] sm:$0xff]  ;;  %v682_v18 = vld [vmem:[%s255_s23 + $0x10] sm:$0xf]  ;;  %s273_s4 = scalar_lea.vmem %s1090_s3, %s671_s28 }
  0x20   : > { %446 = vmatpush.bf16.msra.mxu1 %v775_v3  ;;  %786 = vmatpush.bf16.msra.mxu3 %v775_v3  ;;  %v674_v16 = vld [vmem:[%s255_s23] sm:$0xf]  ;;  %v758_v17 = vld [vmem:[%s255_s23 + $0x4] sm:$0xf0]  ;;  %v760_v19 = vld [vmem:[%s255_s23 + $0x14] sm:$0xf0] }
  0x21   : > { %v757_v20 = vld [vmem:[%s255_s23 + $0x4] sm:$0xf]  ;;  %v676_v21 = vld [vmem:[%s255_s23 + $0x8] sm:$0xf0]  ;;  %v759_v22 = vld [vmem:[%s255_s23 + $0x14] sm:$0xf]  ;;  %v675_v24 = vor.u32 %v758_v17, %v674_v16  ;;  %v683_v25 = vor.u32 %v760_v19, %v682_v18 }
  0x22   : > { %v684_v23 = vld [vmem:[%s255_s23 + $0x18] sm:$0xf0]  ;;  %v679_v26 = vor.u32 %v757_v20, %v676_v21 }
  0x23   : > { %428 = vmatpush.bf16.msra.mxu0 %v766_v4  ;;  %779 = vmatpush.bf16.msra.mxu2 %v766_v4  ;;  %v687_v27 = vor.u32 %v759_v22, %v684_v23 }
  0x24   : > { %447 = vmatpush.bf16.msra.mxu1 %v774_v5  ;;  %787 = vmatpush.bf16.msra.mxu3 %v774_v5 }
  0x27   : > { %429 = vmatpush.bf16.msra.mxu0 %v765_v6  ;;  %780 = vmatpush.bf16.msra.mxu2 %v765_v6 }
  0x28   : > { %448 = vmatpush.bf16.msra.mxu1 %v773_v7  ;;  %788 = vmatpush.bf16.msra.mxu3 %v773_v7 }
  0x2b   : > { %430 = vmatpush.bf16.msra.mxu0 %v764_v8  ;;  %781 = vmatpush.bf16.msra.mxu2 %v764_v8 }
  0x2c   : > { %449 = vmatpush.bf16.msra.mxu1 %v772_v9  ;;  %789 = vmatpush.bf16.msra.mxu3 %v772_v9 }
  0x2f   : > { %431 = vmatpush.bf16.msra.mxu0 %v763_v10  ;;  %782 = vmatpush.bf16.msra.mxu2 %v763_v10 }
  0x30   : > { %450 = vmatpush.bf16.msra.mxu1 %v771_v11  ;;  %790 = vmatpush.bf16.msra.mxu3 %v771_v11 }
  0x33   : > { %432 = vmatpush.bf16.msra.mxu0 %v762_v12  ;;  %783 = vmatpush.bf16.msra.mxu2 %v762_v12 }
  0x34   : > { %451 = vmatpush.bf16.msra.mxu1 %v770_v13  ;;  %791 = vmatpush.bf16.msra.mxu3 %v770_v13 }
  0x37   : > { %433 = vmatpush.bf16.msra.mxu0 %v761_v14  ;;  %784 = vmatpush.bf16.msra.mxu2 %v761_v14 }
  0x38   : > { %452 = vmatpush.bf16.msra.mxu1 %v769_v15  ;;  %792 = vmatpush.bf16.msra.mxu3 %v769_v15 }
  0x3a   : > { %434 = vmatmul.bf16.vlgmr.msra.gmra.mxu0 %v675_v24  ;;  %439 = vmatmul.bf16.vlgmr.msra.gmra.mxu2 %v683_v25 }
  0x3b   : > { %453 = vmatmul.bf16.vlgmr.msra.gmra.mxu1 %v679_v26  ;;  %458 = vmatmul.bf16.vlgmr.msra.gmra.mxu3 %v687_v27 }
  0xb7   : > { %v435_v28 = vpop.f32.mrf.mxu0 }
  0xb8   : > { %v454_v29 = vpop.f32.mrf.mxu1 }
  0xb9   : > { %v455_v30 = vadd.f32 %v454_v29, %v435_v28 }
  0xbb   : > { %465 = vst.msk [vmem:[%s265_s27] sm:$0xff] %vm464_vm0, %v455_v30  ;;  %v482_v36 = vmul.f32 %v455_v30, %v455_v30  ;;  %v469_v38 = vsel %vm464_vm0, %v455_v30, 0.0 }
  0xbd   : > { %v440_v31 = vpop.f32.mrf.mxu2  ;;  %v486_v42 = vsel %vm464_vm0, %v482_v36, 0.0 }
  0xbe   : > { %v459_v32 = vpop.f32.mrf.mxu3 }
  0xbf   : > { %v460_v33 = vadd.f32 %v459_v32, %v440_v31  ;;  %v437_v34 = vpop.f32.mrf.mxu0 }
  0xc0   : > { %v456_v35 = vpop.f32.mrf.mxu1 }
  0xc1   : > { %467 = vst.msk [vmem:[%s265_s27 + $0x10] sm:$0xff] %vm464_vm0, %v460_v33  ;;  %v457_v37 = vadd.f32 %v456_v35, %v437_v34  ;;  %v484_v43 = vmul.f32 %v460_v33, %v460_v33  ;;  %v472_v48 = vsel %vm464_vm0, %v460_v33, 0.0 }
  0xc3   : > { %466 = vst.msk [vmem:[%s265_s27 + $0x8] sm:$0xff] %vm464_vm0, %v457_v37  ;;  %v470_v39 = vsel %vm464_vm0, %v457_v37, 0.0  ;;  %v483_v40 = vmul.f32 %v457_v37, %v457_v37  ;;  %v489_v51 = vsel %vm464_vm0, %v484_v43, 0.0 }
  0xc4   : > { %v471_v41 = vadd.f32 %v470_v39, %v469_v38 }
  0xc5   : > { %v487_v44 = vsel %vm464_vm0, %v483_v40, 0.0  ;;  %v442_v45 = vpop.f32.mrf.mxu2 }
  0xc6   : > { %v488_v46 = vadd.f32 %v487_v44, %v486_v42  ;;  %v461_v47 = vpop.f32.mrf.mxu3  ;;  %v473_v50 = vadd.f32 %v472_v48, %v471_v41 }
  0xc7   : > { %v462_v49 = vadd.f32 %v461_v47, %v442_v45 }
  0xc8   : > { %v490_v55 = vadd.f32 %v489_v51, %v488_v46 }
  0xc9   : > { %468 = vst.msk [vmem:[%s265_s27 + $0x18] sm:$0xff] %vm464_vm0, %v462_v49  ;;  %v474_v52 = vsel %vm464_vm0, %v462_v49, 0.0  ;;  %v485_v53 = vmul.f32 %v462_v49, %v462_v49 }
  0xca   : > { %v475_v54 = vadd.f32 %v474_v52, %v473_v50 }
  0xcb   : > { %v491_v56 = vsel %vm464_vm0, %v485_v53, 0.0 }
  0xcc   : > { %v476_v57 = vrot.slane %v475_v54, 4  ;;  %v492_v58 = vadd.f32 %v491_v56, %v490_v55 }
  0xce   : > { %v477_v59 = vadd.f32 %v476_v57, %v475_v54  ;;  %v493_v60 = vrot.slane %v492_v58, 4 }
  0xd0   : > { %v478_v61 = vrot.slane %v477_v59, 2  ;;  %v494_v62 = vadd.f32 %v493_v60, %v492_v58 }
  0xd2   : > { %v479_v63 = vadd.f32 %v478_v61, %v477_v59  ;;  %v495_v0 = vrot.slane %v494_v62, 2 }
  0xd4   : > { %v480_v1 = vrot.slane %v479_v63, 1  ;;  %v496_v2 = vadd.f32 %v495_v0, %v494_v62 }
  0xd6   : > { %v497_v3 = vrot.slane %v496_v2, 1  ;;  %v481_v4 = vadd.f32 %v480_v1, %v479_v63 }
  0xd8   : > { %v498_v5 = vadd.f32 %v497_v3, %v496_v2 }
  0xda   : > { %v500_v6 = vsel %vm499_vm1, %v481_v4, %v498_v5 }
  0xdb   : > { %v502_v7 = vsel %vm501_vm2, %v500_v6, 0.0 }
  0xdc   : > { %503 = vst.msk [vmem:[%s273_s4] sm:$0xff] %vm464_vm0, %v502_v7 }
  0xdd PF: > { %s17_s17 = sadd.s32 1, %s930_s17   ;;  %s1093_s12 = smov %s914_s13 }
  0xde   : > { %p14_p0 = scmp.ge.s32.totalorder %s17_s17, 6   ;;  %s1094_s13 = smov %s918_s14 }
  0xdf   : > { %s1095_s14 = smov %s1003_s24  ;;  %s1096_s15 = smov %s926_s16 }
  0xe0   : > { %s1097_s16 = smov %s1099_s19  ;;  %16 = sbr.rel (!%p14_p0) target bundleno = 4 (0x4), region = 83 }
  0xe5   :  { %554 = vsyncpa [#allocation3], 1 }
  0xe6   :  { %556 = vsyncpa [#allocation3 + $0x1], 1 }

// kernel: _lambda_.12
= control target key start
LH: loop header
LB: loop body
LE: loop exit
PB: predicated region body
PF: predicated region fallthrough
CT: control target
= control target key end

     0   :  { %s413_s12 = smov 0   ;;  %s415_s13 = smov 0   ;;  %s452_s0 = inlined_call_operand.vmem [shape: f32[4,32,32], index: 0, kind: input, shape index: {}]   ;;  %s453_s1 = inlined_call_operand.vmem [shape: f32[1,32], index: 1, kind: input, shape index: {}]   ;;  %s454_s2 = inlined_call_operand.vmem [shape: f32[1,32], index: 2, kind: input, shape index: {}]   ;;  %s455_s3 = inlined_call_operand.vmem [shape: bf16[4,32,32], index: 3, kind: output, shape index: {}]  }
   0x1   :  { %s417_s14 = smov 0  }
   0x2 LB: > { %s25_s15 = sadd.s32 1, %s387_s13  ;;  %p334_p0 = scmp.ge.s32.totalorder %s391_s14, 1  ;;  %s391_s14 = sphi %s417_s14, %s13_s14   ;;  %s387_s13 = sphi %s415_s13, %s457_s13   ;;  %s383_s12 = sphi %s413_s12, %s456_s12  }
   0x3   : > { %p27_p1 = scmp.ge.s32.totalorder %s25_s15, 4  ;;  %p158_p2 = scmp.lt.s32.totalorder %s391_s14, 5 }
   0x5   : > { %s459_s15 = smov (%p27_p1, %s25_s15), 0  ;;  %p159_p3 = pnand %p334_p0, %p158_p2 }
   0x6   : > { %p191_p4 = scmp.lt.s32.totalorder (!%p159_p3), %s383_s12, 3 }
   0x7   : > { %162 = sbr.rel (%p159_p3) target bundleno = 28 (0x1c), region = 32 }
   0xc   : > { %s461_s12 = smov (!%p191_p4, %s383_s12), 3  ;;  %v367_v0 = vld [vmem:[%s453_s1] ss:$0 sm:$0xff]  ;;  %vm238_vm0 = vcmask 257024  }
   0xd   : > { %s341_s18 = sshll.u32 %s461_s12, 5  ;;  %v368_v1 = vld [vmem:[%s454_s2] ss:$0 sm:$0xff]  ;;  %s342_s24 = sshll.u32 %s461_s12, 4 }
   0xe   : > { %s198_s21 = scalar_lea.vmem %s452_s0, %s341_s18  ;;  %s208_s27 = scalar_lea.vmem %s455_s3, %s342_s24 }
   0xf   : > { %v210_v2 = vld [vmem:[%s198_s21] sm:$0xff]  ;;  %v211_v3 = vld [vmem:[%s198_s21 + $0x8] sm:$0xff]  ;;  %v212_v4 = vld [vmem:[%s198_s21 + $0x10] sm:$0xff] }
  0x10   : > { %v218_v5 = vmul.f32 %v367_v0, %v210_v2  ;;  %v219_v6 = vmul.f32 %v367_v0, %v211_v3  ;;  %v220_v7 = vmul.f32 %v367_v0, %v212_v4  ;;  %v213_v8 = vld [vmem:[%s198_s21 + $0x18] sm:$0xff] }
  0x11   : > { %v221_v9 = vmul.f32 %v367_v0, %v213_v8 }
  0x12   : > { %v226_v10 = vadd.f32 %v368_v1, %v218_v5  ;;  %v227_v11 = vadd.f32 %v368_v1, %v219_v6  ;;  %v228_v12 = vadd.f32 %v368_v1, %v220_v7 }
  0x13   : > { %v229_v13 = vadd.f32 %v368_v1, %v221_v9 }
  0x14   : > { %v230_v14 = vmax.f32 %v226_v10, 0.0  ;;  %v231_v15 = vmax.f32 %v227_v11, 0.0  ;;  %v232_v16 = vmax.f32 %v228_v12, 0.0 }
  0x15   : > { %v233_v17 = vmax.f32 %v229_v13, 0.0 }
  0x16   : > { %v234_v18 = vpack.c.bf16 %v230_v14, %v230_v14  ;;  %v235_v19 = vpack.c.bf16 %v231_v15, %v231_v15  ;;  %v236_v20 = vpack.c.bf16 %v232_v16, %v232_v16 }
  0x17   : > { %v237_v21 = vpack.c.bf16 %v233_v17, %v233_v17 }
  0x18   : > { %239 = vst.msk [vmem:[%s208_s27] sm:$0xf] %vm238_vm0, %v234_v18 }
  0x19   : > { %240 = vst.msk [vmem:[%s208_s27 + $0x4] sm:$0xf] %vm238_vm0, %v235_v19 }
  0x1a   : > { %241 = vst.msk [vmem:[%s208_s27 + $0x8] sm:$0xf] %vm238_vm0, %v236_v20 }
  0x1b   : > { %242 = vst.msk [vmem:[%s208_s27 + $0xc] sm:$0xf] %vm238_vm0, %v237_v21 }
  0x1c PF: > { %s13_s14 = sadd.s32 1, %s391_s14   ;;  %s456_s12 = smov %s387_s13 }
  0x1d   : > { %p10_p5 = scmp.ge.s32.totalorder %s13_s14, 6   ;;  %s457_s13 = smov %s459_s15 }
  0x1f   :  { %12 = sbr.rel (!%p10_p5) target bundleno = 2 (0x2), region = 62 }

// kernel: _lambda_.13
= control target key start
LH: loop header
LB: loop body
LE: loop exit
PB: predicated region body
PF: predicated region fallthrough
CT: control target
= control target key end

     0   :  { %9 = vsyncpa [#allocation3], 0  ;;  %s1201_s0 = inlined_call_operand.vmem [shape: bf16[4,128,128], index: 0, kind: input, shape index: {}]   ;;  %s1202_s1 = inlined_call_operand.hbm [shape: bf16[4,128,16], index: 1, kind: input, shape index: {}]   ;;  %s1203_s2 = inlined_call_operand.vmem [shape: f32[4,128,16], index: 2, kind: output, shape index: {0}]   ;;  %s1204_s3 = inlined_call_operand.vmem [shape: f32[4,1,8,16], index: 3, kind: output, shape index: {1}]  }
   0x1   :  { %11 = vsyncpa [#allocation3 + $0x1], 0  ;;  %s995_s12 = smov 0   ;;  %s997_s13 = smov 0  }
   0x2   :  { %s999_s14 = smov 0   ;;  %s1001_s15 = smov 0  }
   0x3   :  { %s1003_s16 = smov 0   ;;  %s1005_s17 = smov 0  }
   0x4 LB: > { %s711_s18 = sadd.s32 4294967295, %s971_s17   ;;  %s29_s19 = sadd.s32 1, %s967_s16  ;;  %s971_s17 = sphi %s1005_s17, %s17_s17   ;;  %s967_s16 = sphi %s1003_s16, %s1211_s16   ;;  %s963_s15 = sphi %s1001_s15, %s1210_s15   ;;  %s959_s14 = sphi %s999_s14, %s1209_s14   ;;  %s955_s13 = sphi %s997_s13, %s1208_s13   ;;  %s951_s12 = sphi %s995_s12, %s1207_s12  }
   0x5   : > { %p31_p0 = scmp.ge.s32.totalorder %s29_s19, 4  ;;  %s64_s20 = sadd.s32 1, %s959_s14 }
   0x6   : > { %p71_p1 = scmp.ne.s32.totalorder %s959_s14, %s955_s13  ;;  %p72_p2 = scmp.eq.s32.totalorder %s971_s17, 0 }
   0x7   : > { %s1213_s19 = smov (%p31_p0, %s29_s19), 0  ;;  %p77_p4 = scmp.ne.s32.totalorder %s955_s13, %s951_s12 }
   0x8   : > { %p1031_p3 = por %p72_p2, %p71_p1  ;;  %s61_s22 = ssub.s32 %s967_s16, %s1213_s19 }
   0x9   : > { %p78_p5 = scmp.eq.s32.totalorder %s711_s18, 0  ;;  %p62_p6 = scmp.eq.s32.totalorder %s61_s22, 0 }
   0xa   : > { %p840_p8 = scmp.lt.s32.totalorder %s971_s17, 4  ;;  %s170_s25 = sand.u32 1, %s959_s14  }
   0xb   : > { %p1038_p7 = por %p78_p5, %p77_p4  ;;  %s791_s26 = sshll.u32 %s967_s16, 6 }
   0xc   : > { %s1044_s24 = scalar_select %p62_p6, %s959_s14, %s64_s20  }
   0xd   : > { %s715_s27 = sshll.u32 %s170_s25, 6  ;;  %s179_s30 = scalar_lea.hbm %s1202_s1, %s791_s26 }
   0xe   : > { %s180_s4 = sshll.u32 %s179_s30, 4  ;;  %s174_s5 = scalar_lea.vmem [#allocation2], %s715_s27  ;;  %s181_s4 = int_to_ptr.hbm [resolvable:$true] %s180_s4 }
   0xf   : > { %s182_s6 = sshll.u32 %s174_s5, 4  ;;  %p837_p9 = pnand %p840_p8, %p1031_p3  ;;  %s183_s6 = int_to_ptr.vmem [resolvable:$true] %s182_s6 }
  0x10   : > { %p718_p10 = scmp.ge.s32.totalorder %s971_s17, 1  ;;  %p190_p11 = scmp.lt.s32.totalorder %s971_s17, 5 }
  0x11   : > { %s171_s7 = scalar_lea.sflag [#allocation3], %s170_s25  ;;  %s973_s8 = smov 64  }
  0x12   : > { %s974_s9 = smov 4   ;;  %p191_p12 = pnand %p718_p10, %p190_p11 }
  0x13   : > { %839 = dma.hbm_to_vmem [thread:$0]  (!%p837_p9), %s181_s4, 1024, %s183_s6, %s171_s7, %s973_s8, %s973_s8, %s974_s9  }
  0x14   : > { %194 = sbr.rel (%p191_p12) target bundleno = 252 (0xfc), region = 28  ;;  %s196_s10 = sand.u32 (!%p191_p12), 1, %s955_s13  }
  0x15   : > { %s719_s11 = sshll.u32 (!%p191_p12), %s196_s10, 6  ;;  %s197_s12 = scalar_lea.sflag (!%p191_p12), [#allocation3], %s196_s10 }
  0x16   : > { %s1056_s18 = scalar_lea.vmem (!%p191_p12), [#allocation2], %s719_s11 }
  0x19   : > { %946 = dma.done.wait (%p1038_p7), %s197_s12, 1024  }
  0x1a   : > { %948 = vsyncadd (%p1038_p7), %s197_s12, 4294966272  ;;  %v809_v0 = vld [vmem:[%s1056_s18 + $0x38] sm:$0xff]  ;;  %v808_v1 = vld [vmem:[%s1056_s18 + $0x30] sm:$0xff]  ;;  %p245_p13 = scmp.lt.s32.totalorder %s963_s15, 3  ;;  %vm448_vm0 = vcmask 130048   ;;  %vm555_vm1 = vcmask 1040384  }
  0x1b   : > { %399 = vmatpush.bf16.msra.mxu0 %v809_v0  ;;  %810 = vmatpush.bf16.msra.mxu1 %v809_v0  ;;  %v807_v2 = vld [vmem:[%s1056_s18 + $0x28] sm:$0xff]  ;;  %v806_v3 = vld [vmem:[%s1056_s18 + $0x20] sm:$0xff]  ;;  %v805_v4 = vld [vmem:[%s1056_s18 + $0x18] sm:$0xff]  ;;  %vm557_vm2 = vcmask 1041408  }
  0x1c   : > { %811 = vmatpush.bf16.msra.mxu2 %v809_v0  ;;  %812 = vmatpush.bf16.msra.mxu3 %v809_v0  ;;  %v804_v5 = vld [vmem:[%s1056_s18 + $0x10] sm:$0xff]  ;;  %s1215_s15 = smov (!%p245_p13, %s963_s15), 3  ;;  %v803_v6 = vld [vmem:[%s1056_s18 + $0x8] sm:$0xff]  ;;  %v802_v7 = vld [vmem:[%s1056_s18] sm:$0xff] }
  0x1d   : > { %s792_s20 = sshll.u32 %s1215_s15, 6  ;;  %s793_s25 = sshll.u32 %s1215_s15, 7 }
  0x1e   : > { %s252_s23 = scalar_lea.vmem %s1201_s0, %s792_s20  ;;  %s1082_s28 = scalar_lea.vmem %s1203_s2, %s793_s25 }
  0x1f   : > { %400 = vmatpush.bf16.msra.mxu0 %v808_v1  ;;  %813 = vmatpush.bf16.msra.mxu1 %v808_v1  ;;  %v794_v8 = vld [vmem:[%s252_s23] sm:$0xff]  ;;  %v796_v9 = vld [vmem:[%s252_s23 + $0x10] sm:$0xff]  ;;  %v795_v12 = vld [vmem:[%s252_s23 + $0x8] sm:$0xff]  ;;  %s724_s29 = sshll.u32 %s1215_s15, 3 }
  0x20   : > { %814 = vmatpush.bf16.msra.mxu2 %v808_v1  ;;  %815 = vmatpush.bf16.msra.mxu3 %v808_v1  ;;  %v798_v10 = vld [vmem:[%s252_s23 + $0x20] sm:$0xff]  ;;  %v800_v11 = vld [vmem:[%s252_s23 + $0x30] sm:$0xff]  ;;  %v797_v13 = vld [vmem:[%s252_s23 + $0x18] sm:$0xff]  ;;  %s270_s5 = scalar_lea.vmem %s1204_s3, %s724_s29 }
  0x21   : > { %v799_v14 = vld [vmem:[%s252_s23 + $0x28] sm:$0xff]  ;;  %v801_v15 = vld [vmem:[%s252_s23 + $0x38] sm:$0xff] }
  0x23   : > { %401 = vmatpush.bf16.msra.mxu0 %v807_v2  ;;  %816 = vmatpush.bf16.msra.mxu1 %v807_v2 }
  0x24   : > { %817 = vmatpush.bf16.msra.mxu2 %v807_v2  ;;  %818 = vmatpush.bf16.msra.mxu3 %v807_v2 }
  0x27   : > { %402 = vmatpush.bf16.msra.mxu0 %v806_v3  ;;  %819 = vmatpush.bf16.msra.mxu1 %v806_v3 }
  0x28   : > { %820 = vmatpush.bf16.msra.mxu2 %v806_v3  ;;  %821 = vmatpush.bf16.msra.mxu3 %v806_v3 }
  0x2b   : > { %403 = vmatpush.bf16.msra.mxu0 %v805_v4  ;;  %822 = vmatpush.bf16.msra.mxu1 %v805_v4 }
  0x2c   : > { %823 = vmatpush.bf16.msra.mxu2 %v805_v4  ;;  %824 = vmatpush.bf16.msra.mxu3 %v805_v4 }
  0x2f   : > { %404 = vmatpush.bf16.msra.mxu0 %v804_v5  ;;  %825 = vmatpush.bf16.msra.mxu1 %v804_v5 }
  0x30   : > { %826 = vmatpush.bf16.msra.mxu2 %v804_v5  ;;  %827 = vmatpush.bf16.msra.mxu3 %v804_v5 }
  0x33   : > { %405 = vmatpush.bf16.msra.mxu0 %v803_v6  ;;  %828 = vmatpush.bf16.msra.mxu1 %v803_v6 }
  0x34   : > { %829 = vmatpush.bf16.msra.mxu2 %v803_v6  ;;  %830 = vmatpush.bf16.msra.mxu3 %v803_v6 }
  0x37   : > { %406 = vmatpush.bf16.msra.mxu0 %v802_v7  ;;  %831 = vmatpush.bf16.msra.mxu1 %v802_v7 }
  0x38   : > { %832 = vmatpush.bf16.msra.mxu2 %v802_v7  ;;  %833 = vmatpush.bf16.msra.mxu3 %v802_v7 }
  0x3a   : > { %407 = vmatmul.bf16.vlgmr.msra.gmra.mxu0 %v794_v8  ;;  %417 = vmatmul.bf16.vlgmr.msra.gmra.mxu1 %v796_v9 }
  0x3b   : > { %427 = vmatmul.bf16.vlgmr.msra.gmra.mxu2 %v798_v10  ;;  %437 = vmatmul.bf16.vlgmr.msra.gmra.mxu3 %v800_v11 }
  0x4a   : > { %412 = vmatmul.bf16.gmra.mxu0 %v795_v12  ;;  %422 = vmatmul.bf16.gmra.mxu1 %v797_v13 }
  0x4b   : > { %432 = vmatmul.bf16.gmra.mxu2 %v799_v14  ;;  %442 = vmatmul.bf16.gmra.mxu3 %v801_v15 }
  0xb7   : > { %v408_v16 = vpop.f32.mrf.mxu0  ;;  %v418_v17 = vpop.f32.mrf.mxu1 }
  0xb8   : > { %449 = vst.msk [vmem:[%s1082_s28] sm:$0xff] %vm448_vm0, %v408_v16  ;;  %v502_v27 = vmul.f32 %v408_v16, %v408_v16  ;;  %v465_v30 = vsel %vm448_vm0, %v408_v16, 0.0  ;;  %v506_v42 = vmul.f32 %v418_v17, %v418_v17  ;;  %v472_v47 = vsel %vm448_vm0, %v418_v17, 0.0 }
  0xb9   : > { %453 = vst.msk [vmem:[%s1082_s28 + $0x20] sm:$0xff] %vm448_vm0, %v418_v17 }
  0xba   : > { %v518_v34 = vsel %vm448_vm0, %v502_v27, 0.0  ;;  %v525_v52 = vsel %vm448_vm0, %v506_v42, 0.0 }
  0xbe   : > { %v1088_v18 = vpop.f32.mrf.mxu2  ;;  %v1090_v19 = vpop.f32.mrf.mxu3 }
  0xbf   : > { %v410_v20 = vpop.f32.mrf.mxu0  ;;  %v420_v21 = vpop.f32.mrf.mxu1  ;;  %457 = vst.msk [vmem:[%s1082_s28 + $0x40] sm:$0xff] %vm448_vm0, %v1088_v18  ;;  %v510_v0 = vmul.f32 %v1088_v18, %v1088_v18  ;;  %v480_v5 = vsel %vm448_vm0, %v1088_v18, 0.0 }
  0xc0   : > { %450 = vst.msk [vmem:[%s1082_s28 + $0x8] sm:$0xff] %vm448_vm0, %v410_v20  ;;  %v503_v26 = vmul.f32 %v410_v20, %v410_v20  ;;  %v466_v28 = vsel %vm448_vm0, %v410_v20, 0.0  ;;  %v507_v48 = vmul.f32 %v420_v21, %v420_v21  ;;  %v474_v53 = vsel %vm448_vm0, %v420_v21, 0.0 }
  0xc1   : > { %454 = vst.msk [vmem:[%s1082_s28 + $0x28] sm:$0xff] %vm448_vm0, %v420_v21  ;;  %v467_v33 = vadd.f32 %v466_v28, %v465_v30  ;;  %v533_v10 = vsel %vm448_vm0, %v510_v0, 0.0  ;;  %v514_v21 = vmul.f32 %v1090_v19, %v1090_v19 }
  0xc2   : > { %461 = vst.msk [vmem:[%s1082_s28 + $0x60] sm:$0xff] %vm448_vm0, %v1090_v19  ;;  %v519_v31 = vsel %vm448_vm0, %v503_v26, 0.0  ;;  %v527_v57 = vsel %vm448_vm0, %v507_v48, 0.0 }
  0xc3   : > { %v520_v38 = vadd.f32 %v519_v31, %v518_v34 }
  0xc6   : > { %v1102_v22 = vpop.f32.mrf.mxu2  ;;  %v1104_v23 = vpop.f32.mrf.mxu3 }
  0xc7   : > { %v413_v24 = vpop.f32.mrf.mxu0  ;;  %v423_v25 = vpop.f32.mrf.mxu1  ;;  %458 = vst.msk [vmem:[%s1082_s28 + $0x48] sm:$0xff] %vm448_vm0, %v1102_v22  ;;  %v511_v6 = vmul.f32 %v1102_v22, %v1102_v22  ;;  %v482_v11 = vsel %vm448_vm0, %v1102_v22, 0.0  ;;  %v488_v22 = vsel %vm448_vm0, %v1090_v19, 0.0  ;;  %v515_v28 = vmul.f32 %v1104_v23, %v1104_v23 }
  0xc8   : > { %451 = vst.msk [vmem:[%s1082_s28 + $0x10] sm:$0xff] %vm448_vm0, %v413_v24  ;;  %v504_v29 = vmul.f32 %v413_v24, %v413_v24  ;;  %v468_v32 = vsel %vm448_vm0, %v413_v24, 0.0  ;;  %v508_v54 = vmul.f32 %v423_v25, %v423_v25  ;;  %v476_v58 = vsel %vm448_vm0, %v423_v25, 0.0 }
  0xc9   : > { %455 = vst.msk [vmem:[%s1082_s28 + $0x30] sm:$0xff] %vm448_vm0, %v423_v25  ;;  %v469_v39 = vadd.f32 %v468_v32, %v467_v33  ;;  %v535_v15 = vsel %vm448_vm0, %v511_v6, 0.0  ;;  %v541_v32 = vsel %vm448_vm0, %v514_v21, 0.0  ;;  %v490_v33 = vsel %vm448_vm0, %v1104_v23, 0.0 }
  0xca   : > { %462 = vst.msk [vmem:[%s1082_s28 + $0x68] sm:$0xff] %vm448_vm0, %v1104_v23  ;;  %v521_v35 = vsel %vm448_vm0, %v504_v29, 0.0  ;;  %v529_v1 = vsel %vm448_vm0, %v508_v54, 0.0 }
  0xcb   : > { %v522_v45 = vadd.f32 %v521_v35, %v520_v38  ;;  %v543_v38 = vsel %vm448_vm0, %v515_v28, 0.0 }
  0xce   : > { %v433_v36 = vpop.f32.mrf.mxu2  ;;  %v1122_v37 = vpop.f32.mrf.mxu3 }
  0xcf   : > { %v415_v40 = vpop.f32.mrf.mxu0  ;;  %v425_v41 = vpop.f32.mrf.mxu1  ;;  %459 = vst.msk [vmem:[%s1082_s28 + $0x50] sm:$0xff] %vm448_vm0, %v433_v36  ;;  %v512_v12 = vmul.f32 %v433_v36, %v433_v36  ;;  %v484_v16 = vsel %vm448_vm0, %v433_v36, 0.0  ;;  %v516_v34 = vmul.f32 %v1122_v37, %v1122_v37  ;;  %v492_v19 = vsel %vm448_vm0, %v1122_v37, 0.0 }
  0xd0   : > { %452 = vst.msk [vmem:[%s1082_s28 + $0x18] sm:$0xff] %vm448_vm0, %v415_v40  ;;  %v470_v43 = vsel %vm448_vm0, %v415_v40, 0.0  ;;  %v505_v44 = vmul.f32 %v415_v40, %v415_v40  ;;  %v509_v59 = vmul.f32 %v425_v41, %v425_v41  ;;  %v478_v2 = vsel %vm448_vm0, %v425_v41, 0.0 }
  0xd1   : > { %v471_v46 = vadd.f32 %v470_v43, %v469_v39  ;;  %456 = vst.msk [vmem:[%s1082_s28 + $0x38] sm:$0xff] %vm448_vm0, %v425_v41  ;;  %v537_v24 = vsel %vm448_vm0, %v512_v12, 0.0  ;;  %v545_v42 = vsel %vm448_vm0, %v516_v34, 0.0 }
  0xd2   : > { %v523_v49 = vsel %vm448_vm0, %v505_v44, 0.0  ;;  %463 = vst.msk [vmem:[%s1082_s28 + $0x70] sm:$0xff] %vm448_vm0, %v1122_v37  ;;  %v531_v7 = vsel %vm448_vm0, %v509_v59, 0.0 }
  0xd3   : > { %v473_v50 = vadd.f32 %v472_v47, %v471_v46  ;;  %v524_v51 = vadd.f32 %v523_v49, %v522_v45 }
  0xd5   : > { %v526_v55 = vadd.f32 %v525_v52, %v524_v51  ;;  %v475_v56 = vadd.f32 %v474_v53, %v473_v50 }
  0xd6   : > { %v435_v60 = vpop.f32.mrf.mxu2  ;;  %v445_v61 = vpop.f32.mrf.mxu3 }
  0xd7   : > { %v477_v62 = vadd.f32 %v476_v58, %v475_v56  ;;  %v528_v63 = vadd.f32 %v527_v57, %v526_v55  ;;  %460 = vst.msk [vmem:[%s1082_s28 + $0x58] sm:$0xff] %vm448_vm0, %v435_v60  ;;  %v513_v17 = vmul.f32 %v435_v60, %v435_v60  ;;  %v486_v25 = vsel %vm448_vm0, %v435_v60, 0.0 }
  0xd8   : > { %464 = vst.msk [vmem:[%s1082_s28 + $0x78] sm:$0xff] %vm448_vm0, %v445_v61  ;;  %v517_v39 = vmul.f32 %v445_v61, %v445_v61  ;;  %v494_v43 = vsel %vm448_vm0, %v445_v61, 0.0 }
  0xd9   : > { %v479_v3 = vadd.f32 %v478_v2, %v477_v62  ;;  %v530_v4 = vadd.f32 %v529_v1, %v528_v63  ;;  %v539_v29 = vsel %vm448_vm0, %v513_v17, 0.0 }
  0xda   : > { %v547_v45 = vsel %vm448_vm0, %v517_v39, 0.0 }
  0xdb   : > { %v481_v8 = vadd.f32 %v480_v5, %v479_v3  ;;  %v532_v9 = vadd.f32 %v531_v7, %v530_v4 }
  0xdd   : > { %v534_v13 = vadd.f32 %v533_v10, %v532_v9  ;;  %v483_v14 = vadd.f32 %v482_v11, %v481_v8 }
  0xdf   : > { %v485_v18 = vadd.f32 %v484_v16, %v483_v14  ;;  %v536_v20 = vadd.f32 %v535_v15, %v534_v13 }
  0xe1   : > { %v538_v26 = vadd.f32 %v537_v24, %v536_v20  ;;  %v487_v27 = vadd.f32 %v486_v25, %v485_v18 }
  0xe3   : > { %v489_v30 = vadd.f32 %v488_v22, %v487_v27  ;;  %v540_v31 = vadd.f32 %v539_v29, %v538_v26 }
  0xe5   : > { %v542_v35 = vadd.f32 %v541_v32, %v540_v31  ;;  %v491_v36 = vadd.f32 %v490_v33, %v489_v30 }
  0xe7   : > { %v493_v40 = vadd.f32 %v492_v19, %v491_v36  ;;  %v544_v41 = vadd.f32 %v543_v38, %v542_v35 }
  0xe9   : > { %v546_v44 = vadd.f32 %v545_v42, %v544_v41  ;;  %v495_v23 = vadd.f32 %v494_v43, %v493_v40 }
  0xeb   : > { %v496_v46 = vrot.slane %v495_v23, 4  ;;  %v548_v47 = vadd.f32 %v547_v45, %v546_v44 }
  0xed   : > { %v497_v48 = vadd.f32 %v496_v46, %v495_v23  ;;  %v549_v49 = vrot.slane %v548_v47, 4 }
  0xef   : > { %v498_v50 = vrot.slane %v497_v48, 2  ;;  %v550_v51 = vadd.f32 %v549_v49, %v548_v47 }
  0xf1   : > { %v499_v52 = vadd.f32 %v498_v50, %v497_v48  ;;  %v551_v37 = vrot.slane %v550_v51, 2 }
  0xf3   : > { %v500_v53 = vrot.slane %v499_v52, 1  ;;  %v552_v54 = vadd.f32 %v551_v37, %v550_v51 }
  0xf5   : > { %v553_v55 = vrot.slane %v552_v54, 1  ;;  %v501_v56 = vadd.f32 %v500_v53, %v499_v52 }
  0xf7   : > { %v554_v57 = vadd.f32 %v553_v55, %v552_v54 }
  0xf9   : > { %v556_v58 = vsel %vm555_vm1, %v501_v56, %v554_v57 }
  0xfa   : > { %v558_v59 = vsel %vm557_vm2, %v556_v58, 0.0 }
  0xfb   : > { %559 = vst.msk [vmem:[%s270_s5] sm:$0xff] %vm448_vm0, %v558_v59 }
  0xfc PF: > { %s17_s17 = sadd.s32 1, %s971_s17   ;;  %s1207_s12 = smov %s955_s13 }
  0xfd   : > { %p14_p0 = scmp.ge.s32.totalorder %s17_s17, 6   ;;  %s1208_s13 = smov %s959_s14 }
  0xfe   : > { %s1209_s14 = smov %s1044_s24  ;;  %s1210_s15 = smov %s967_s16 }
  0xff   : > { %s1211_s16 = smov %s1213_s19  ;;  %16 = sbr.rel (!%p14_p0) target bundleno = 4 (0x4), region = 83 }
 0x104   :  { %610 = vsyncpa [#allocation3], 1 }
 0x105   :  { %612 = vsyncpa [#allocation3 + $0x1], 1 }

// kernel: _lambda_.14
= control target key start
LH: loop header
LB: loop body
LE: loop exit
PB: predicated region body
PF: predicated region fallthrough
CT: control target
= control target key end

     0   :  { %s485_s12 = smov 0   ;;  %s487_s13 = smov 0   ;;  %s616_s0 = inlined_call_operand.vmem [shape: f32[4,128,16], index: 0, kind: input, shape index: {}]   ;;  %s617_s1 = inlined_call_operand.vmem [shape: f32[1,16], index: 1, kind: input, shape index: {}]   ;;  %s618_s2 = inlined_call_operand.vmem [shape: f32[1,16], index: 2, kind: input, shape index: {}]   ;;  %s619_s3 = inlined_call_operand.vmem [shape: bf16[4,128,16], index: 3, kind: output, shape index: {}]  }
   0x1   :  { %s489_s14 = smov 0  }
   0x2 LB: > { %s25_s15 = sadd.s32 1, %s459_s13  ;;  %p406_p0 = scmp.ge.s32.totalorder %s463_s14, 1  ;;  %s463_s14 = sphi %s489_s14, %s13_s14   ;;  %s459_s13 = sphi %s487_s13, %s621_s13   ;;  %s455_s12 = sphi %s485_s12, %s620_s12  }
   0x3   : > { %p27_p1 = scmp.ge.s32.totalorder %s25_s15, 4  ;;  %p158_p2 = scmp.lt.s32.totalorder %s463_s14, 5 }
   0x5   : > { %s623_s15 = smov (%p27_p1, %s25_s15), 0  ;;  %p159_p3 = pnand %p406_p0, %p158_p2 }
   0x6   : > { %p191_p4 = scmp.lt.s32.totalorder (!%p159_p3), %s455_s12, 3 }
   0x7   : > { %162 = sbr.rel (%p159_p3) target bundleno = 40 (0x28), region = 32 }
   0xc   : > { %s625_s12 = smov (!%p191_p4, %s455_s12), 3  ;;  %v508_v0 = vld [vmem:[%s617_s1] ss:$0 sm:$0xff]  ;;  %vm298_vm0 = vcmask 125952  }
   0xd   : > { %s413_s18 = sshll.u32 %s625_s12, 7  ;;  %v519_v1 = vld [vmem:[%s618_s2] ss:$0 sm:$0xff]  ;;  %s414_s24 = sshll.u32 %s625_s12, 6 }
   0xe   : > { %s514_s21 = scalar_lea.vmem %s616_s0, %s413_s18  ;;  %s548_s27 = scalar_lea.vmem %s619_s3, %s414_s24 }
   0xf   : > { %v210_v2 = vld [vmem:[%s514_s21] sm:$0xff]  ;;  %v211_v3 = vld [vmem:[%s514_s21 + $0x8] sm:$0xff]  ;;  %v212_v4 = vld [vmem:[%s514_s21 + $0x10] sm:$0xff] }
  0x10   : > { %v230_v5 = vmul.f32 %v508_v0, %v210_v2  ;;  %v231_v6 = vmul.f32 %v508_v0, %v211_v3  ;;  %v232_v7 = vmul.f32 %v508_v0, %v212_v4  ;;  %v213_v8 = vld [vmem:[%s514_s21 + $0x18] sm:$0xff]  ;;  %v214_v9 = vld [vmem:[%s514_s21 + $0x20] sm:$0xff]  ;;  %v215_v10 = vld [vmem:[%s514_s21 + $0x28] sm:$0xff] }
  0x11   : > { %v233_v11 = vmul.f32 %v508_v0, %v213_v8  ;;  %v234_v12 = vmul.f32 %v508_v0, %v214_v9  ;;  %v235_v13 = vmul.f32 %v508_v0, %v215_v10  ;;  %v216_v14 = vld [vmem:[%s514_s21 + $0x30] sm:$0xff]  ;;  %v217_v15 = vld [vmem:[%s514_s21 + $0x38] sm:$0xff]  ;;  %v218_v32 = vld [vmem:[%s514_s21 + $0x40] sm:$0xff] }
  0x12   : > { %v250_v16 = vadd.f32 %v519_v1, %v230_v5  ;;  %v251_v17 = vadd.f32 %v519_v1, %v231_v6  ;;  %v252_v18 = vadd.f32 %v519_v1, %v232_v7  ;;  %v236_v19 = vmul.f32 %v508_v0, %v216_v14  ;;  %v219_v33 = vld [vmem:[%s514_s21 + $0x48] sm:$0xff]  ;;  %v220_v34 = vld [vmem:[%s514_s21 + $0x50] sm:$0xff]  ;;  %v221_v39 = vld [vmem:[%s514_s21 + $0x58] sm:$0xff] }
  0x13   : > { %v253_v20 = vadd.f32 %v519_v1, %v233_v11  ;;  %v254_v21 = vadd.f32 %v519_v1, %v234_v12  ;;  %v255_v22 = vadd.f32 %v519_v1, %v235_v13  ;;  %v237_v23 = vmul.f32 %v508_v0, %v217_v15  ;;  %v222_v40 = vld [vmem:[%s514_s21 + $0x60] sm:$0xff]  ;;  %v223_v41 = vld [vmem:[%s514_s21 + $0x68] sm:$0xff]  ;;  %v224_v46 = vld [vmem:[%s514_s21 + $0x70] sm:$0xff] }
  0x14   : > { %v266_v24 = vmax.f32 %v250_v16, 0.0  ;;  %v267_v25 = vmax.f32 %v251_v17, 0.0  ;;  %v268_v26 = vmax.f32 %v252_v18, 0.0  ;;  %v256_v27 = vadd.f32 %v519_v1, %v236_v19  ;;  %v225_v51 = vld [vmem:[%s514_s21 + $0x78] sm:$0xff] }
  0x15   : > { %v269_v28 = vmax.f32 %v253_v20, 0.0  ;;  %v270_v29 = vmax.f32 %v254_v21, 0.0  ;;  %v271_v30 = vmax.f32 %v255_v22, 0.0  ;;  %v257_v31 = vadd.f32 %v519_v1, %v237_v23 }
  0x16   : > { %v282_v35 = vpack.c.bf16 %v266_v24, %v266_v24  ;;  %v283_v36 = vpack.c.bf16 %v267_v25, %v267_v25  ;;  %v284_v37 = vpack.c.bf16 %v268_v26, %v268_v26  ;;  %v272_v38 = vmax.f32 %v256_v27, 0.0 }
  0x17   : > { %v285_v42 = vpack.c.bf16 %v269_v28, %v269_v28  ;;  %v286_v43 = vpack.c.bf16 %v270_v29, %v270_v29  ;;  %v287_v44 = vpack.c.bf16 %v271_v30, %v271_v30  ;;  %v273_v45 = vmax.f32 %v257_v31, 0.0 }
  0x18   : > { %299 = vst.msk [vmem:[%s548_s27] sm:$0xf] %vm298_vm0, %v282_v35  ;;  %v288_v47 = vpack.c.bf16 %v272_v38, %v272_v38  ;;  %v238_v48 = vmul.f32 %v508_v0, %v218_v32  ;;  %v239_v49 = vmul.f32 %v508_v0, %v219_v33  ;;  %v240_v50 = vmul.f32 %v508_v0, %v220_v34 }
  0x19   : > { %300 = vst.msk [vmem:[%s548_s27 + $0x4] sm:$0xf] %vm298_vm0, %v283_v36  ;;  %v289_v52 = vpack.c.bf16 %v273_v45, %v273_v45  ;;  %v241_v53 = vmul.f32 %v508_v0, %v221_v39  ;;  %v242_v54 = vmul.f32 %v508_v0, %v222_v40  ;;  %v243_v55 = vmul.f32 %v508_v0, %v223_v41 }
  0x1a   : > { %301 = vst.msk [vmem:[%s548_s27 + $0x8] sm:$0xf] %vm298_vm0, %v284_v37  ;;  %v258_v56 = vadd.f32 %v519_v1, %v238_v48  ;;  %v259_v57 = vadd.f32 %v519_v1, %v239_v49  ;;  %v260_v58 = vadd.f32 %v519_v1, %v240_v50  ;;  %v244_v59 = vmul.f32 %v508_v0, %v224_v46 }
  0x1b   : > { %302 = vst.msk [vmem:[%s548_s27 + $0xc] sm:$0xf] %vm298_vm0, %v285_v42  ;;  %v261_v60 = vadd.f32 %v519_v1, %v241_v53  ;;  %v262_v61 = vadd.f32 %v519_v1, %v242_v54  ;;  %v263_v62 = vadd.f32 %v519_v1, %v243_v55  ;;  %v245_v63 = vmul.f32 %v508_v0, %v225_v51 }
  0x1c   : > { %303 = vst.msk [vmem:[%s548_s27 + $0x10] sm:$0xf] %vm298_vm0, %v286_v43  ;;  %v274_v2 = vmax.f32 %v258_v56, 0.0  ;;  %v275_v3 = vmax.f32 %v259_v57, 0.0  ;;  %v276_v4 = vmax.f32 %v260_v58, 0.0  ;;  %v264_v5 = vadd.f32 %v519_v1, %v244_v59 }
  0x1d   : > { %304 = vst.msk [vmem:[%s548_s27 + $0x14] sm:$0xf] %vm298_vm0, %v287_v44  ;;  %v277_v6 = vmax.f32 %v261_v60, 0.0  ;;  %v278_v7 = vmax.f32 %v262_v61, 0.0  ;;  %v279_v8 = vmax.f32 %v263_v62, 0.0  ;;  %v265_v9 = vadd.f32 %v519_v1, %v245_v63 }
  0x1e   : > { %305 = vst.msk [vmem:[%s548_s27 + $0x18] sm:$0xf] %vm298_vm0, %v288_v47  ;;  %v290_v0 = vpack.c.bf16 %v274_v2, %v274_v2  ;;  %v291_v10 = vpack.c.bf16 %v275_v3, %v275_v3  ;;  %v292_v11 = vpack.c.bf16 %v276_v4, %v276_v4  ;;  %v280_v12 = vmax.f32 %v264_v5, 0.0 }
  0x1f   : > { %306 = vst.msk [vmem:[%s548_s27 + $0x1c] sm:$0xf] %vm298_vm0, %v289_v52  ;;  %v293_v13 = vpack.c.bf16 %v277_v6, %v277_v6  ;;  %v281_v14 = vmax.f32 %v265_v9, 0.0  ;;  %v294_v15 = vpack.c.bf16 %v278_v7, %v278_v7  ;;  %v295_v1 = vpack.c.bf16 %v279_v8, %v279_v8 }
  0x20   : > { %307 = vst.msk [vmem:[%s548_s27 + $0x20] sm:$0xf] %vm298_vm0, %v290_v0  ;;  %v296_v16 = vpack.c.bf16 %v280_v12, %v280_v12 }
  0x21   : > { %308 = vst.msk [vmem:[%s548_s27 + $0x24] sm:$0xf] %vm298_vm0, %v291_v10  ;;  %v297_v17 = vpack.c.bf16 %v281_v14, %v281_v14 }
  0x22   : > { %309 = vst.msk [vmem:[%s548_s27 + $0x28] sm:$0xf] %vm298_vm0, %v292_v11 }
  0x23   : > { %310 = vst.msk [vmem:[%s548_s27 + $0x2c] sm:$0xf] %vm298_vm0, %v293_v13 }
  0x24   : > { %311 = vst.msk [vmem:[%s548_s27 + $0x30] sm:$0xf] %vm298_vm0, %v294_v15 }
  0x25   : > { %312 = vst.msk [vmem:[%s548_s27 + $0x34] sm:$0xf] %vm298_vm0, %v295_v1 }
  0x26   : > { %313 = vst.msk [vmem:[%s548_s27 + $0x38] sm:$0xf] %vm298_vm0, %v296_v16 }
  0x27   : > { %314 = vst.msk [vmem:[%s548_s27 + $0x3c] sm:$0xf] %vm298_vm0, %v297_v17 }
  0x28 PF: > { %s13_s14 = sadd.s32 1, %s463_s14   ;;  %s620_s12 = smov %s459_s13 }
  0x29   : > { %p10_p5 = scmp.ge.s32.totalorder %s13_s14, 6   ;;  %s621_s13 = smov %s623_s15 }
  0x2b   :  { %12 = sbr.rel (!%p10_p5) target bundleno = 2 (0x2), region = 62 }

// kernel: _lambda_.15
= control target key start
LH: loop header
LB: loop body
LE: loop exit
PB: predicated region body
PF: predicated region fallthrough
CT: control target
= control target key end

     0   :  { %s1137_s12 = smov 0   ;;  %s1139_s13 = smov 0   ;;  %s1511_s0 = inlined_call_operand.vmem [shape: bf16[4,512,64], index: 0, kind: input, shape index: {}]   ;;  %s1512_s1 = inlined_call_operand.vmem [shape: bf16[4,64,8], index: 1, kind: input, shape index: {}]   ;;  %s1513_s2 = inlined_call_operand.vmem [shape: f32[4,512,8], index: 2, kind: output, shape index: {0}]   ;;  %s1514_s3 = inlined_call_operand.vmem [shape: f32[4,2,8,8], index: 3, kind: output, shape index: {1}]  }
   0x1   :  { %s1141_s14 = smov 0   ;;  %s1143_s15 = smov 0  }
   0x2   :  { %s1145_s16 = smov 0  }
   0x3 LB: > { %s23_s17 = sadd.s32 1, %s1107_s14  ;;  %s26_s18 = sadd.s32 1, %s1111_s15  ;;  %s1115_s16 = sphi %s1145_s16, %s14_s16   ;;  %s1111_s15 = sphi %s1143_s15, %s1518_s15   ;;  %s1107_s14 = sphi %s1141_s14, %s1517_s14   ;;  %s1103_s13 = sphi %s1139_s13, %s1516_s13   ;;  %s1099_s12 = sphi %s1137_s12, %s1515_s12  }
   0x4   : > { %p24_p0 = scmp.ge.s32.totalorder %s23_s17, 2  ;;  %p895_p1 = scmp.ge.s32.totalorder %s1115_s16, 1 }
   0x5   : > { %p173_p2 = scmp.lt.s32.totalorder %s1115_s16, 9 }
   0x6   : > { %s1520_s17 = smov (%p24_p0, %s23_s17), 0  ;;  %s1522_s18 = smov (!%p24_p0, %s26_s18), %s1111_s15 }
   0x7   : > { %p174_p3 = pnand %p895_p1, %p173_p2  ;;  %p28_p4 = scmp.ge.s32.totalorder %s1522_s18, 4 }
   0x8   : > { %s896_s19 = sshll.u32 (!%p174_p3), %s1099_s12, 5  ;;  %p219_p5 = scmp.lt.s32.totalorder (!%p174_p3), %s1103_s13, 3 }
   0x9   : > { %s1524_s18 = smov (%p28_p4, %s1522_s18), 0  ;;  %177 = sbr.rel (%p174_p3) target bundleno = 283 (0x11b), region = 28 }
   0xa   : > { %p221_p6 = scmp.lt.s32.totalorder (!%p174_p3), %s896_s19, 63  ;;  %p245_p7 = scmp.lt.s32.totalorder (!%p174_p3), %s1099_s12, 1 }
   0xe   : > { %s1526_s13 = smov (!%p219_p5, %s1103_s13), 3  ;;  %s1528_s19 = smov (!%p221_p6, %s896_s19), 63  ;;  %vm396_vm0 = vcmask 523264   ;;  %vm534_vm1 = vcmask 64512   ;;  %vm737_vm2 = vcmask 1040384   ;;  %vm739_vm3 = vcmask 1041408  }
   0xf   : > { %s1004_s20 = sshll.u32 %s1526_s13, 5  ;;  %s897_s24 = sshll.u32 %s1526_s13, 6 }
  0x10   : > { %s232_s23 = scalar_lea.vmem %s1512_s1, %s1004_s20  ;;  %s1177_s25 = sadd.s32 %s897_s24, %s1528_s19 }
  0x11   : > { %v1024_v0 = vld [vmem:[%s232_s23 + $0x18] sm:$0xff]  ;;  %v1023_v1 = vld [vmem:[%s232_s23 + $0x10] sm:$0xff]  ;;  %v1022_v2 = vld [vmem:[%s232_s23 + $0x8] sm:$0xff]  ;;  %s898_s26 = sshll.u32 %s1177_s25, 2  ;;  %s903_s30 = sshll.u32 %s1177_s25, 3 }
  0x12   : > { %449 = vmatpush.bf16.msra.mxu0 %v1024_v0  ;;  %1025 = vmatpush.bf16.msra.mxu1 %v1024_v0  ;;  %s1183_s29 = scalar_lea.vmem %s1511_s0, %s898_s26  ;;  %v1021_v3 = vld [vmem:[%s232_s23] sm:$0xff]  ;;  %s1221_s6 = scalar_lea.vmem %s1513_s2, %s903_s30 }
  0x13   : > { %1026 = vmatpush.bf16.msra.mxu2 %v1024_v0  ;;  %1027 = vmatpush.bf16.msra.mxu3 %v1024_v0  ;;  %v1005_v4 = vld [vmem:[%s1183_s29] sm:$0xff]  ;;  %v1006_v8 = vld [vmem:[%s1183_s29 + $0x8] sm:$0xff]  ;;  %v1007_v12 = vld [vmem:[%s1183_s29 + $0x10] sm:$0xff]  ;;  %s1530_s12 = smov (!%p245_p7, %s1099_s12), 1  ;;  %s904_s7 = sshll.u32 %s1526_s13, 1 }
  0x14   : > { %v1009_v5 = vld [vmem:[%s1183_s29 + $0x20] sm:$0xff]  ;;  %v1010_v9 = vld [vmem:[%s1183_s29 + $0x28] sm:$0xff]  ;;  %v1011_v13 = vld [vmem:[%s1183_s29 + $0x30] sm:$0xff]  ;;  %s248_s8 = sadd.s32 %s904_s7, %s1530_s12 }
  0x15   : > { %v1013_v6 = vld [vmem:[%s1183_s29 + $0x40] sm:$0xff]  ;;  %v1014_v10 = vld [vmem:[%s1183_s29 + $0x48] sm:$0xff]  ;;  %v1015_v14 = vld [vmem:[%s1183_s29 + $0x50] sm:$0xff]  ;;  %s905_s9 = sshll.u32 %s248_s8, 3 }
  0x16   : > { %450 = vmatpush.bf16.msra.mxu0 %v1023_v1  ;;  %1028 = vmatpush.bf16.msra.mxu1 %v1023_v1  ;;  %v1017_v7 = vld [vmem:[%s1183_s29 + $0x60] sm:$0xff]  ;;  %v1018_v11 = vld [vmem:[%s1183_s29 + $0x68] sm:$0xff]  ;;  %v1019_v15 = vld [vmem:[%s1183_s29 + $0x70] sm:$0xff]  ;;  %s250_s19 = scalar_lea.vmem %s1514_s3, %s905_s9 }
  0x17   : > { %1029 = vmatpush.bf16.msra.mxu2 %v1023_v1  ;;  %1030 = vmatpush.bf16.msra.mxu3 %v1023_v1  ;;  %v1008_v16 = vld [vmem:[%s1183_s29 + $0x18] sm:$0xff] }
  0x18   : > { %v1012_v17 = vld [vmem:[%s1183_s29 + $0x38] sm:$0xff] }
  0x19   : > { %v1016_v18 = vld [vmem:[%s1183_s29 + $0x58] sm:$0xff] }
  0x1a   : > { %451 = vmatpush.bf16.msra.mxu0 %v1022_v2  ;;  %1031 = vmatpush.bf16.msra.mxu1 %v1022_v2  ;;  %v1020_v19 = vld [vmem:[%s1183_s29 + $0x78] sm:$0xff] }
  0x1b   : > { %1032 = vmatpush.bf16.msra.mxu2 %v1022_v2  ;;  %1033 = vmatpush.bf16.msra.mxu3 %v1022_v2 }
  0x1e   : > { %452 = vmatpush.bf16.msra.mxu0 %v1021_v3  ;;  %1034 = vmatpush.bf16.msra.mxu1 %v1021_v3 }
  0x1f   : > { %1035 = vmatpush.bf16.msra.mxu2 %v1021_v3  ;;  %1036 = vmatpush.bf16.msra.mxu3 %v1021_v3 }
  0x21   : > { %986 = vmatmul.msk.bf16.vlgmr.msra.gmra.mxu0 %vm396_vm0, %v1005_v4  ;;  %990 = vmatmul.msk.bf16.vlgmr.msra.gmra.mxu1 %vm396_vm0, %v1009_v5 }
  0x22   : > { %994 = vmatmul.msk.bf16.vlgmr.msra.gmra.mxu2 %vm396_vm0, %v1013_v6  ;;  %998 = vmatmul.msk.bf16.vlgmr.msra.gmra.mxu3 %vm396_vm0, %v1017_v7 }
  0x31   : > { %987 = vmatmul.msk.bf16.gmra.mxu0 %vm396_vm0, %v1006_v8  ;;  %991 = vmatmul.msk.bf16.gmra.mxu1 %vm396_vm0, %v1010_v9 }
  0x32   : > { %995 = vmatmul.msk.bf16.gmra.mxu2 %vm396_vm0, %v1014_v10  ;;  %999 = vmatmul.msk.bf16.gmra.mxu3 %vm396_vm0, %v1018_v11 }
  0x41   : > { %988 = vmatmul.msk.bf16.gmra.mxu0 %vm396_vm0, %v1007_v12  ;;  %992 = vmatmul.msk.bf16.gmra.mxu1 %vm396_vm0, %v1011_v13 }
  0x42   : > { %996 = vmatmul.msk.bf16.gmra.mxu2 %vm396_vm0, %v1015_v14  ;;  %1000 = vmatmul.msk.bf16.gmra.mxu3 %vm396_vm0, %v1019_v15 }
  0x51   : > { %989 = vmatmul.msk.bf16.gmra.mxu0 %vm396_vm0, %v1008_v16  ;;  %993 = vmatmul.msk.bf16.gmra.mxu1 %vm396_vm0, %v1012_v17 }
  0x52   : > { %997 = vmatmul.msk.bf16.gmra.mxu2 %vm396_vm0, %v1016_v18  ;;  %1001 = vmatmul.msk.bf16.gmra.mxu3 %vm396_vm0, %v1020_v19 }
  0x9e   : > { %v454_v20 = vpop.f32.mrf.mxu0  ;;  %v1223_v21 = vpop.f32.mrf.mxu1 }
  0x9f   : > { %535 = vst.msk [vmem:[%s1221_s6] sm:$0xff] %vm534_vm1, %v454_v20  ;;  %v636_v43 = vmul.f32 %v454_v20, %v454_v20  ;;  %v567_v46 = vsel %vm534_vm1, %v454_v20, 0.0  ;;  %v644_v17 = vmul.f32 %v1223_v21, %v1223_v21 }
  0xa0   : > { %543 = vst.msk [vmem:[%s1221_s6 + $0x40] sm:$0xff] %vm534_vm1, %v1223_v21 }
  0xa1   : > { %v668_v51 = vsel %vm534_vm1, %v636_v43, 0.0 }
  0xa5   : > { %v1230_v22 = vpop.f32.mrf.mxu2  ;;  %v1239_v25 = vpop.f32.mrf.mxu3 }
  0xa6   : > { %v456_v23 = vpop.f32.mrf.mxu0  ;;  %v1232_v24 = vpop.f32.mrf.mxu1  ;;  %551 = vst.msk [vmem:[%s1221_s6 + $0x80] sm:$0xff] %vm534_vm1, %v1230_v22 }
  0xa7   : > { %536 = vst.msk [vmem:[%s1221_s6 + $0x8] sm:$0xff] %vm534_vm1, %v456_v23  ;;  %v637_v41 = vmul.f32 %v456_v23, %v456_v23  ;;  %v568_v44 = vsel %vm534_vm1, %v456_v23, 0.0 }
  0xa8   : > { %544 = vst.msk [vmem:[%s1221_s6 + $0x48] sm:$0xff] %vm534_vm1, %v1232_v24  ;;  %v569_v50 = vadd.f32 %v568_v44, %v567_v46  ;;  %v683_v44 = vsel %vm534_vm1, %v644_v17, 0.0 }
  0xa9   : > { %559 = vst.msk [vmem:[%s1221_s6 + $0xc0] sm:$0xff] %vm534_vm1, %v1239_v25  ;;  %v669_v47 = vsel %vm534_vm1, %v637_v41, 0.0 }
  0xaa   : > { %v670_v56 = vadd.f32 %v669_v47, %v668_v51 }
  0xad   : > { %v1247_v26 = vpop.f32.mrf.mxu2  ;;  %v1256_v29 = vpop.f32.mrf.mxu3 }
  0xae   : > { %v459_v27 = vpop.f32.mrf.mxu0  ;;  %v1249_v28 = vpop.f32.mrf.mxu1  ;;  %552 = vst.msk [vmem:[%s1221_s6 + $0x88] sm:$0xff] %vm534_vm1, %v1247_v26  ;;  %v653_v17 = vmul.f32 %v1247_v26, %v1247_v26 }
  0xaf   : > { %537 = vst.msk [vmem:[%s1221_s6 + $0x10] sm:$0xff] %vm534_vm1, %v459_v27  ;;  %v638_v45 = vmul.f32 %v459_v27, %v459_v27  ;;  %v570_v48 = vsel %vm534_vm1, %v459_v27, 0.0  ;;  %v646_v46 = vmul.f32 %v1249_v28, %v1249_v28 }
  0xb0   : > { %545 = vst.msk [vmem:[%s1221_s6 + $0x50] sm:$0xff] %vm534_vm1, %v1249_v28  ;;  %v571_v57 = vadd.f32 %v570_v48, %v569_v50 }
  0xb1   : > { %560 = vst.msk [vmem:[%s1221_s6 + $0xc8] sm:$0xff] %vm534_vm1, %v1256_v29  ;;  %v671_v52 = vsel %vm534_vm1, %v638_v45, 0.0  ;;  %v584_v45 = vsel %vm534_vm1, %v1232_v24, 0.0 }
  0xb2   : > { %v672_v0 = vadd.f32 %v671_v52, %v670_v56 }
  0xb5   : > { %v1264_v30 = vpop.f32.mrf.mxu2  ;;  %v1273_v33 = vpop.f32.mrf.mxu3 }
  0xb6   : > { %v461_v31 = vpop.f32.mrf.mxu0  ;;  %v1266_v32 = vpop.f32.mrf.mxu1  ;;  %553 = vst.msk [vmem:[%s1221_s6 + $0x90] sm:$0xff] %vm534_vm1, %v1264_v30 }
  0xb7   : > { %538 = vst.msk [vmem:[%s1221_s6 + $0x18] sm:$0xff] %vm534_vm1, %v461_v31  ;;  %v639_v49 = vmul.f32 %v461_v31, %v461_v31  ;;  %v572_v53 = vsel %vm534_vm1, %v461_v31, 0.0  ;;  %v582_v31 = vsel %vm534_vm1, %v1223_v21, 0.0  ;;  %v647_v50 = vmul.f32 %v1266_v32, %v1266_v32 }
  0xb8   : > { %546 = vst.msk [vmem:[%s1221_s6 + $0x58] sm:$0xff] %vm534_vm1, %v1266_v32  ;;  %v573_v1 = vadd.f32 %v572_v53, %v571_v57 }
  0xb9   : > { %561 = vst.msk [vmem:[%s1221_s6 + $0xd0] sm:$0xff] %vm534_vm1, %v1273_v33  ;;  %v673_v60 = vsel %vm534_vm1, %v639_v49, 0.0  ;;  %v586_v49 = vsel %vm534_vm1, %v1249_v28, 0.0 }
  0xba   : > { %v674_v5 = vadd.f32 %v673_v60, %v672_v0  ;;  %v689_v60 = vsel %vm534_vm1, %v647_v50, 0.0 }
  0xbd   : > { %v1281_v34 = vpop.f32.mrf.mxu2  ;;  %v1290_v37 = vpop.f32.mrf.mxu3 }
  0xbe   : > { %v464_v35 = vpop.f32.mrf.mxu0  ;;  %v1283_v36 = vpop.f32.mrf.mxu1  ;;  %554 = vst.msk [vmem:[%s1221_s6 + $0x98] sm:$0xff] %vm534_vm1, %v1281_v34 }
  0xbf   : > { %539 = vst.msk [vmem:[%s1221_s6 + $0x20] sm:$0xff] %vm534_vm1, %v464_v35  ;;  %v640_v54 = vmul.f32 %v464_v35, %v464_v35  ;;  %v574_v61 = vsel %vm534_vm1, %v464_v35, 0.0  ;;  %v645_v35 = vmul.f32 %v1232_v24, %v1232_v24  ;;  %v687_v24 = vsel %vm534_vm1, %v646_v46, 0.0 }
  0xc0   : > { %547 = vst.msk [vmem:[%s1221_s6 + $0x60] sm:$0xff] %vm534_vm1, %v1283_v36  ;;  %v575_v6 = vadd.f32 %v574_v61, %v573_v1  ;;  %v648_v56 = vmul.f32 %v1283_v36, %v1283_v36  ;;  %v590_v61 = vsel %vm534_vm1, %v1283_v36, 0.0 }
  0xc1   : > { %562 = vst.msk [vmem:[%s1221_s6 + $0xd8] sm:$0xff] %vm534_vm1, %v1290_v37  ;;  %v675_v2 = vsel %vm534_vm1, %v640_v54, 0.0  ;;  %v685_v48 = vsel %vm534_vm1, %v645_v35, 0.0  ;;  %v588_v54 = vsel %vm534_vm1, %v1266_v32, 0.0 }
  0xc2   : > { %v676_v9 = vadd.f32 %v675_v2, %v674_v5  ;;  %v691_v1 = vsel %vm534_vm1, %v648_v56, 0.0 }
  0xc5   : > { %v1298_v38 = vpop.f32.mrf.mxu2  ;;  %v1307_v42 = vpop.f32.mrf.mxu3 }
  0xc6   : > { %v466_v39 = vpop.f32.mrf.mxu0  ;;  %v1300_v40 = vpop.f32.mrf.mxu1  ;;  %555 = vst.msk [vmem:[%s1221_s6 + $0xa0] sm:$0xff] %vm534_vm1, %v1298_v38  ;;  %v656_v46 = vmul.f32 %v1298_v38, %v1298_v38 }
  0xc7   : > { %540 = vst.msk [vmem:[%s1221_s6 + $0x28] sm:$0xff] %vm534_vm1, %v466_v39  ;;  %v641_v62 = vmul.f32 %v466_v39, %v466_v39  ;;  %v576_v3 = vsel %vm534_vm1, %v466_v39, 0.0  ;;  %v592_v2 = vsel %vm534_vm1, %v1300_v40, 0.0 }
  0xc8   : > { %548 = vst.msk [vmem:[%s1221_s6 + $0x68] sm:$0xff] %vm534_vm1, %v1300_v40  ;;  %v577_v10 = vadd.f32 %v576_v3, %v575_v6 }
  0xc9   : > { %563 = vst.msk [vmem:[%s1221_s6 + $0xe0] sm:$0xff] %vm534_vm1, %v1307_v42  ;;  %v677_v7 = vsel %vm534_vm1, %v641_v62, 0.0  ;;  %v649_v62 = vmul.f32 %v1300_v40, %v1300_v40 }
  0xca   : > { %v678_v13 = vadd.f32 %v677_v7, %v676_v9 }
  0xcb   : > { %v693_v6 = vsel %vm534_vm1, %v649_v62, 0.0  ;;  %v660_v62 = vmul.f32 %v1239_v25, %v1239_v25 }
  0xcd   : > { %v1322_v55 = vpop.f32.mrf.mxu2  ;;  %v1333_v63 = vpop.f32.mrf.mxu3 }
  0xce   : > { %v469_v58 = vpop.f32.mrf.mxu0  ;;  %v1324_v59 = vpop.f32.mrf.mxu1  ;;  %556 = vst.msk [vmem:[%s1221_s6 + $0xa8] sm:$0xff] %vm534_vm1, %v1322_v55 }
  0xcf   : > { %541 = vst.msk [vmem:[%s1221_s6 + $0x30] sm:$0xff] %vm534_vm1, %v469_v58  ;;  %v642_v4 = vmul.f32 %v469_v58, %v469_v58  ;;  %v578_v8 = vsel %vm534_vm1, %v469_v58, 0.0  ;;  %v650_v3 = vmul.f32 %v1324_v59, %v1324_v59  ;;  %v594_v36 = vsel %vm534_vm1, %v1324_v59, 0.0 }
  0xd0   : > { %549 = vst.msk [vmem:[%s1221_s6 + $0x70] sm:$0xff] %vm534_vm1, %v1324_v59  ;;  %v579_v14 = vadd.f32 %v578_v8, %v577_v10  ;;  %v652_v10 = vmul.f32 %v1230_v22, %v1230_v22 }
  0xd1   : > { %564 = vst.msk [vmem:[%s1221_s6 + $0xe8] sm:$0xff] %vm534_vm1, %v1333_v63  ;;  %v679_v11 = vsel %vm534_vm1, %v642_v4, 0.0 }
  0xd2   : > { %v680_v23 = vadd.f32 %v679_v11, %v678_v13  ;;  %v695_v11 = vsel %vm534_vm1, %v650_v3, 0.0 }
  0xd5   : > { %v1346_v12 = vpop.f32.mrf.mxu2  ;;  %v1356_v20 = vpop.f32.mrf.mxu3 }
  0xd6   : > { %v471_v15 = vpop.f32.mrf.mxu0  ;;  %v491_v16 = vpop.f32.mrf.mxu1  ;;  %557 = vst.msk [vmem:[%s1221_s6 + $0xb0] sm:$0xff] %vm534_vm1, %v1346_v12 }
  0xd7   : > { %542 = vst.msk [vmem:[%s1221_s6 + $0x38] sm:$0xff] %vm534_vm1, %v471_v15  ;;  %v580_v18 = vsel %vm534_vm1, %v471_v15, 0.0  ;;  %v643_v19 = vmul.f32 %v471_v15, %v471_v15  ;;  %v651_v7 = vmul.f32 %v491_v16, %v491_v16  ;;  %v596_v40 = vsel %vm534_vm1, %v491_v16, 0.0 }
  0xd8   : > { %v581_v27 = vadd.f32 %v580_v18, %v579_v14  ;;  %550 = vst.msk [vmem:[%s1221_s6 + $0x78] sm:$0xff] %vm534_vm1, %v491_v16  ;;  %v598_v15 = vsel %vm534_vm1, %v1230_v22, 0.0  ;;  %v654_v16 = vmul.f32 %v1264_v30, %v1264_v30  ;;  %v602_v22 = vsel %vm534_vm1, %v1264_v30, 0.0 }
  0xd9   : > { %v681_v39 = vsel %vm534_vm1, %v643_v19, 0.0  ;;  %565 = vst.msk [vmem:[%s1221_s6 + $0xf0] sm:$0xff] %vm534_vm1, %v1356_v20  ;;  %v697_v59 = vsel %vm534_vm1, %v651_v7, 0.0  ;;  %v606_v30 = vsel %vm534_vm1, %v1298_v38, 0.0  ;;  %v610_v38 = vsel %vm534_vm1, %v1346_v12, 0.0 }
  0xda   : > { %v583_v41 = vadd.f32 %v582_v31, %v581_v27  ;;  %v682_v43 = vadd.f32 %v681_v39, %v680_v23  ;;  %v699_v23 = vsel %vm534_vm1, %v652_v10, 0.0  ;;  %v600_v27 = vsel %vm534_vm1, %v1247_v26, 0.0 }
  0xdb   : > { %v701_v39 = vsel %vm534_vm1, %v653_v17, 0.0  ;;  %v604_v26 = vsel %vm534_vm1, %v1281_v34, 0.0  ;;  %v663_v10 = vmul.f32 %v1290_v37, %v1290_v37 }
  0xdc   : > { %v585_v21 = vadd.f32 %v584_v45, %v583_v41  ;;  %v684_v47 = vadd.f32 %v683_v44, %v682_v43  ;;  %v655_v41 = vmul.f32 %v1281_v34, %v1281_v34  ;;  %v703_v45 = vsel %vm534_vm1, %v654_v16, 0.0 }
  0xdd   : > { %v1378_v51 = vpop.f32.mrf.mxu2  ;;  %v1388_v57 = vpop.f32.mrf.mxu3  ;;  %v608_v34 = vsel %vm534_vm1, %v1322_v55, 0.0  ;;  %v666_v16 = vmul.f32 %v1356_v20, %v1356_v20 }
  0xde   : > { %v587_v52 = vadd.f32 %v586_v49, %v585_v21  ;;  %v686_v53 = vadd.f32 %v685_v48, %v684_v47  ;;  %558 = vst.msk [vmem:[%s1221_s6 + $0xb8] sm:$0xff] %vm534_vm1, %v1378_v51  ;;  %v705_v48 = vsel %vm534_vm1, %v655_v41, 0.0  ;;  %v657_v49 = vmul.f32 %v1322_v55, %v1322_v55 }
  0xdf   : > { %566 = vst.msk [vmem:[%s1221_s6 + $0xf8] sm:$0xff] %vm534_vm1, %v1388_v57 }
  0xe0   : > { %v688_v28 = vadd.f32 %v687_v24, %v686_v53  ;;  %v589_v58 = vadd.f32 %v588_v54, %v587_v52  ;;  %v707_v53 = vsel %vm534_vm1, %v656_v46, 0.0  ;;  %v658_v24 = vmul.f32 %v1346_v12, %v1346_v12 }
  0xe1   : > { %v661_v12 = vmul.f32 %v1256_v29, %v1256_v29 }
  0xe2   : > { %v591_v0 = vadd.f32 %v590_v61, %v589_v58  ;;  %v690_v32 = vadd.f32 %v689_v60, %v688_v28  ;;  %v709_v28 = vsel %vm534_vm1, %v657_v49, 0.0  ;;  %v659_v58 = vmul.f32 %v1378_v51, %v1378_v51 }
  0xe3   : > { %v711_v55 = vsel %vm534_vm1, %v658_v24, 0.0 }
  0xe4   : > { %v593_v4 = vadd.f32 %v592_v2, %v591_v0  ;;  %v692_v5 = vadd.f32 %v691_v1, %v690_v32  ;;  %v612_v0 = vsel %vm534_vm1, %v1378_v51, 0.0  ;;  %v614_v2 = vsel %vm534_vm1, %v1239_v25, 0.0 }
  0xe5   : > { %v713_v3 = vsel %vm534_vm1, %v659_v58, 0.0  ;;  %v662_v51 = vmul.f32 %v1273_v33, %v1273_v33  ;;  %v618_v25 = vsel %vm534_vm1, %v1273_v33, 0.0  ;;  %v622_v33 = vsel %vm534_vm1, %v1307_v42, 0.0 }
  0xe6   : > { %v595_v8 = vadd.f32 %v594_v36, %v593_v4  ;;  %v694_v9 = vadd.f32 %v693_v6, %v692_v5  ;;  %v715_v6 = vsel %vm534_vm1, %v660_v62, 0.0  ;;  %v616_v36 = vsel %vm534_vm1, %v1256_v29, 0.0 }
  0xe7   : > { %v620_v29 = vsel %vm534_vm1, %v1290_v37, 0.0  ;;  %v624_v37 = vsel %vm534_vm1, %v1333_v63, 0.0 }
  0xe8   : > { %v696_v13 = vadd.f32 %v695_v11, %v694_v9  ;;  %v597_v14 = vadd.f32 %v596_v40, %v595_v8  ;;  %v717_v9 = vsel %vm534_vm1, %v661_v12, 0.0 }
  0xea   : > { %v599_v18 = vadd.f32 %v598_v15, %v597_v14  ;;  %v698_v19 = vadd.f32 %v697_v59, %v696_v13  ;;  %v719_v13 = vsel %vm534_vm1, %v662_v51, 0.0  ;;  %v664_v14 = vmul.f32 %v1307_v42, %v1307_v42 }
  0xeb   : > { %v721_v59 = vsel %vm534_vm1, %v663_v10, 0.0  ;;  %v626_v42 = vsel %vm534_vm1, %v1356_v20, 0.0 }
  0xec   : > { %v601_v31 = vadd.f32 %v600_v27, %v599_v18  ;;  %v700_v35 = vadd.f32 %v699_v23, %v698_v19  ;;  %v665_v18 = vmul.f32 %v1333_v63, %v1333_v63  ;;  %v723_v27 = vsel %vm534_vm1, %v664_v14, 0.0 }
  0xed   : > { %v628_v63 = vsel %vm534_vm1, %v1388_v57, 0.0 }
  0xee   : > { %v603_v43 = vadd.f32 %v602_v22, %v601_v31  ;;  %v702_v44 = vadd.f32 %v701_v39, %v700_v35  ;;  %v725_v39 = vsel %vm534_vm1, %v665_v18, 0.0  ;;  %v667_v22 = vmul.f32 %v1388_v57, %v1388_v57 }
  0xf0   : > { %v704_v21 = vadd.f32 %v703_v45, %v702_v44  ;;  %v605_v47 = vadd.f32 %v604_v26, %v603_v43  ;;  %v727_v44 = vsel %vm534_vm1, %v666_v16, 0.0  ;;  %v729_v46 = vsel %vm534_vm1, %v667_v22, 0.0 }
  0xf2   : > { %v607_v50 = vadd.f32 %v606_v30, %v605_v47  ;;  %v706_v52 = vadd.f32 %v705_v48, %v704_v21 }
  0xf4   : > { %v609_v54 = vadd.f32 %v608_v34, %v607_v50  ;;  %v708_v56 = vadd.f32 %v707_v53, %v706_v52 }
  0xf6   : > { %v710_v60 = vadd.f32 %v709_v28, %v708_v56  ;;  %v611_v61 = vadd.f32 %v610_v38, %v609_v54 }
  0xf8   : > { %v712_v32 = vadd.f32 %v711_v55, %v710_v60  ;;  %v613_v1 = vadd.f32 %v612_v0, %v611_v61 }
  0xfa   : > { %v615_v4 = vadd.f32 %v614_v2, %v613_v1  ;;  %v714_v5 = vadd.f32 %v713_v3, %v712_v32 }
  0xfc   : > { %v617_v7 = vadd.f32 %v616_v36, %v615_v4  ;;  %v716_v8 = vadd.f32 %v715_v6, %v714_v5 }
  0xfe   : > { %v619_v11 = vadd.f32 %v618_v25, %v617_v7  ;;  %v718_v40 = vadd.f32 %v717_v9, %v716_v8 }
 0x100   : > { %v720_v15 = vadd.f32 %v719_v13, %v718_v40  ;;  %v621_v17 = vadd.f32 %v620_v29, %v619_v11 }
 0x102   : > { %v623_v19 = vadd.f32 %v622_v33, %v621_v17  ;;  %v722_v23 = vadd.f32 %v721_v59, %v720_v15 }
 0x104   : > { %v625_v31 = vadd.f32 %v624_v37, %v623_v19  ;;  %v724_v35 = vadd.f32 %v723_v27, %v722_v23 }
 0x106   : > { %v726_v41 = vadd.f32 %v725_v39, %v724_v35  ;;  %v627_v43 = vadd.f32 %v626_v42, %v625_v31 }
 0x108   : > { %v728_v45 = vadd.f32 %v727_v44, %v726_v41  ;;  %v629_v26 = vadd.f32 %v628_v63, %v627_v43 }
 0x10a   : > { %v630_v21 = vrot.slane %v629_v26, 4  ;;  %v730_v47 = vadd.f32 %v729_v46, %v728_v45 }
 0x10c   : > { %v631_v48 = vadd.f32 %v630_v21, %v629_v26  ;;  %v731_v30 = vrot.slane %v730_v47, 4 }
 0x10e   : > { %v632_v20 = vrot.slane %v631_v48, 2  ;;  %v732_v49 = vadd.f32 %v731_v30, %v730_v47 }
 0x110   : > { %v633_v50 = vadd.f32 %v632_v20, %v631_v48  ;;  %v733_v52 = vrot.slane %v732_v49, 2 }
 0x112   : > { %v634_v53 = vrot.slane %v633_v50, 1  ;;  %v734_v34 = vadd.f32 %v733_v52, %v732_v49 }
 0x114   : > { %v735_v57 = vrot.slane %v734_v34, 1  ;;  %v635_v24 = vadd.f32 %v634_v53, %v633_v50 }
 0x116   : > { %v736_v54 = vadd.f32 %v735_v57, %v734_v34 }
 0x118   : > { %v738_v56 = vsel %vm737_vm2, %v635_v24, %v736_v54 }
 0x119   : > { %v740_v28 = vsel %vm739_vm3, %v738_v56, 0.0 }
 0x11a   : > { %741 = vst.msk [vmem:[%s250_s19] sm:$0xff] %vm534_vm1, %v740_v28 }
 0x11b PF: > { %s14_s16 = sadd.s32 1, %s1115_s16   ;;  %s1515_s12 = smov %s1107_s14 }
 0x11c   : > { %p11_p8 = scmp.ge.s32.totalorder %s14_s16, 10   ;;  %s1516_s13 = smov %s1111_s15 }
 0x11d   : > { %s1517_s14 = smov %s1520_s17  ;;  %s1518_s15 = smov %s1524_s18 }
 0x11e   :  { %13 = sbr.rel (!%p11_p8) target bundleno = 3 (0x3), region = 73 }

// kernel: _lambda_.16
= control target key start
LH: loop header
LB: loop body
LE: loop exit
PB: predicated region body
PF: predicated region fallthrough
CT: control target
= control target key end

     0   :  { %s773_s12 = smov 0   ;;  %s775_s13 = smov 0   ;;  %s1144_s0 = inlined_call_operand.vmem [shape: f32[4,512,8], index: 0, kind: input, shape index: {}]   ;;  %s1145_s1 = inlined_call_operand.vmem [shape: f32[1,8], index: 1, kind: input, shape index: {}]   ;;  %s1146_s2 = inlined_call_operand.vmem [shape: f32[1,8], index: 2, kind: input, shape index: {}]   ;;  %s1147_s3 = inlined_call_operand.vmem [shape: bf16[4,512,8], index: 3, kind: output, shape index: {}]  }
   0x1   :  { %s777_s14 = smov 0  }
   0x2 LB: > { %s25_s15 = sadd.s32 1, %s747_s13  ;;  %p694_p0 = scmp.ge.s32.totalorder %s751_s14, 1  ;;  %s751_s14 = sphi %s777_s14, %s13_s14   ;;  %s747_s13 = sphi %s775_s13, %s1149_s13   ;;  %s743_s12 = sphi %s773_s12, %s1148_s12  }
   0x3   : > { %p27_p1 = scmp.ge.s32.totalorder %s25_s15, 4  ;;  %p158_p2 = scmp.lt.s32.totalorder %s751_s14, 5 }
   0x5   : > { %s1151_s15 = smov (%p27_p1, %s25_s15), 0  ;;  %p159_p3 = pnand %p694_p0, %p158_p2 }
   0x6   : > { %p191_p4 = scmp.lt.s32.totalorder (!%p159_p3), %s743_s12, 3 }
   0x7   : > { %162 = sbr.rel (%p159_p3) target bundleno = 88 (0x58), region = 32 }
   0xc   : > { %s1153_s12 = smov (!%p191_p4, %s743_s12), 3  ;;  %v796_v0 = vld [vmem:[%s1145_s1] ss:$0 sm:$0xff]  ;;  %vm538_vm0 = vcmask 60416  }
   0xd   : > { %s701_s18 = sshll.u32 %s1153_s12, 9  ;;  %v807_v1 = vld [vmem:[%s1146_s2] ss:$0 sm:$0xff]  ;;  %s702_s24 = sshll.u32 %s1153_s12, 8 }
   0xe   : > { %s802_s21 = scalar_lea.vmem %s1144_s0, %s701_s18  ;;  %s836_s27 = scalar_lea.vmem %s1147_s3, %s702_s24 }
   0xf   : > { %v210_v2 = vld [vmem:[%s802_s21] sm:$0xff]  ;;  %v211_v3 = vld [vmem:[%s802_s21 + $0x8] sm:$0xff]  ;;  %v212_v4 = vld [vmem:[%s802_s21 + $0x10] sm:$0xff] }
  0x10   : > { %v278_v5 = vmul.f32 %v796_v0, %v210_v2  ;;  %v279_v6 = vmul.f32 %v796_v0, %v211_v3  ;;  %v280_v7 = vmul.f32 %v796_v0, %v212_v4  ;;  %v213_v8 = vld [vmem:[%s802_s21 + $0x18] sm:$0xff]  ;;  %v214_v9 = vld [vmem:[%s802_s21 + $0x20] sm:$0xff]  ;;  %v215_v10 = vld [vmem:[%s802_s21 + $0x28] sm:$0xff] }
  0x11   : > { %v281_v11 = vmul.f32 %v796_v0, %v213_v8  ;;  %v282_v12 = vmul.f32 %v796_v0, %v214_v9  ;;  %v283_v13 = vmul.f32 %v796_v0, %v215_v10  ;;  %v216_v14 = vld [vmem:[%s802_s21 + $0x30] sm:$0xff]  ;;  %v217_v15 = vld [vmem:[%s802_s21 + $0x38] sm:$0xff]  ;;  %v218_v32 = vld [vmem:[%s802_s21 + $0x40] sm:$0xff] }
  0x12   : > { %v346_v16 = vadd.f32 %v807_v1, %v278_v5  ;;  %v347_v17 = vadd.f32 %v807_v1, %v279_v6  ;;  %v348_v18 = vadd.f32 %v807_v1, %v280_v7  ;;  %v284_v19 = vmul.f32 %v796_v0, %v216_v14  ;;  %v219_v33 = vld [vmem:[%s802_s21 + $0x48] sm:$0xff]  ;;  %v220_v34 = vld [vmem:[%s802_s21 + $0x50] sm:$0xff]  ;;  %v221_v39 = vld [vmem:[%s802_s21 + $0x58] sm:$0xff] }
  0x13   : > { %v349_v20 = vadd.f32 %v807_v1, %v281_v11  ;;  %v350_v21 = vadd.f32 %v807_v1, %v282_v12  ;;  %v351_v22 = vadd.f32 %v807_v1, %v283_v13  ;;  %v285_v23 = vmul.f32 %v796_v0, %v217_v15  ;;  %v222_v40 = vld [vmem:[%s802_s21 + $0x60] sm:$0xff]  ;;  %v223_v41 = vld [vmem:[%s802_s21 + $0x68] sm:$0xff]  ;;  %v224_v46 = vld [vmem:[%s802_s21 + $0x70] sm:$0xff] }
  0x14   : > { %v410_v24 = vmax.f32 %v346_v16, 0.0  ;;  %v411_v25 = vmax.f32 %v347_v17, 0.0  ;;  %v412_v26 = vmax.f32 %v348_v18, 0.0  ;;  %v352_v27 = vadd.f32 %v807_v1, %v284_v19  ;;  %v225_v51 = vld [vmem:[%s802_s21 + $0x78] sm:$0xff]  ;;  %v226_v2 = vld [vmem:[%s802_s21 + $0x80] sm:$0xff]  ;;  %v227_v7 = vld [vmem:[%s802_s21 + $0x88] sm:$0xff] }
  0x15   : > { %v413_v28 = vmax.f32 %v349_v20, 0.0  ;;  %v414_v29 = vmax.f32 %v350_v21, 0.0  ;;  %v415_v30 = vmax.f32 %v351_v22, 0.0  ;;  %v353_v31 = vadd.f32 %v807_v1, %v285_v23  ;;  %v228_v12 = vld [vmem:[%s802_s21 + $0x90] sm:$0xff]  ;;  %v229_v17 = vld [vmem:[%s802_s21 + $0x98] sm:$0xff]  ;;  %v230_v18 = vld [vmem:[%s802_s21 + $0xa0] sm:$0xff] }
  0x16   : > { %v474_v35 = vpack.c.bf16 %v410_v24, %v410_v24  ;;  %v475_v36 = vpack.c.bf16 %v411_v25, %v411_v25  ;;  %v476_v37 = vpack.c.bf16 %v412_v26, %v412_v26  ;;  %v416_v38 = vmax.f32 %v352_v27, 0.0  ;;  %v231_v19 = vld [vmem:[%s802_s21 + $0xa8] sm:$0xff]  ;;  %v232_v24 = vld [vmem:[%s802_s21 + $0xb0] sm:$0xff] }
  0x17   : > { %v477_v42 = vpack.c.bf16 %v413_v28, %v413_v28  ;;  %v478_v43 = vpack.c.bf16 %v414_v29, %v414_v29  ;;  %v479_v44 = vpack.c.bf16 %v415_v30, %v415_v30  ;;  %v417_v45 = vmax.f32 %v353_v31, 0.0  ;;  %v233_v29 = vld [vmem:[%s802_s21 + $0xb8] sm:$0xff] }
  0x18   : > { %539 = vst.msk [vmem:[%s836_s27] sm:$0xf] %vm538_vm0, %v474_v35  ;;  %v480_v47 = vpack.c.bf16 %v416_v38, %v416_v38  ;;  %v286_v48 = vmul.f32 %v796_v0, %v218_v32  ;;  %v287_v49 = vmul.f32 %v796_v0, %v219_v33  ;;  %v288_v50 = vmul.f32 %v796_v0, %v220_v34 }
  0x19   : > { %540 = vst.msk [vmem:[%s836_s27 + $0x4] sm:$0xf] %vm538_vm0, %v475_v36  ;;  %v481_v52 = vpack.c.bf16 %v417_v45, %v417_v45  ;;  %v289_v53 = vmul.f32 %v796_v0, %v221_v39  ;;  %v290_v54 = vmul.f32 %v796_v0, %v222_v40  ;;  %v291_v55 = vmul.f32 %v796_v0, %v223_v41 }
  0x1a   : > { %541 = vst.msk [vmem:[%s836_s27 + $0x8] sm:$0xf] %vm538_vm0, %v476_v37  ;;  %v354_v56 = vadd.f32 %v807_v1, %v286_v48  ;;  %v355_v57 = vadd.f32 %v807_v1, %v287_v49  ;;  %v356_v58 = vadd.f32 %v807_v1, %v288_v50  ;;  %v292_v59 = vmul.f32 %v796_v0, %v224_v46 }
  0x1b   : > { %542 = vst.msk [vmem:[%s836_s27 + $0xc] sm:$0xf] %vm538_vm0, %v477_v42  ;;  %v357_v60 = vadd.f32 %v807_v1, %v289_v53  ;;  %v358_v61 = vadd.f32 %v807_v1, %v290_v54  ;;  %v359_v62 = vadd.f32 %v807_v1, %v291_v55  ;;  %v293_v63 = vmul.f32 %v796_v0, %v225_v51  ;;  %v234_v42 = vld [vmem:[%s802_s21 + $0xc0] sm:$0xff] }
  0x1c   : > { %543 = vst.msk [vmem:[%s836_s27 + $0x10] sm:$0xf] %vm538_vm0, %v478_v43  ;;  %v418_v3 = vmax.f32 %v354_v56, 0.0  ;;  %v419_v4 = vmax.f32 %v355_v57, 0.0  ;;  %v420_v5 = vmax.f32 %v356_v58, 0.0  ;;  %v360_v6 = vadd.f32 %v807_v1, %v292_v59  ;;  %v237_v57 = vld [vmem:[%s802_s21 + $0xd8] sm:$0xff] }
  0x1d   : > { %544 = vst.msk [vmem:[%s836_s27 + $0x14] sm:$0xf] %vm538_vm0, %v479_v44  ;;  %v421_v8 = vmax.f32 %v357_v60, 0.0  ;;  %v422_v9 = vmax.f32 %v358_v61, 0.0  ;;  %v423_v10 = vmax.f32 %v359_v62, 0.0  ;;  %v361_v11 = vadd.f32 %v807_v1, %v293_v63  ;;  %v238_v58 = vld [vmem:[%s802_s21 + $0xe0] sm:$0xff] }
  0x1e   : > { %545 = vst.msk [vmem:[%s836_s27 + $0x18] sm:$0xf] %vm538_vm0, %v480_v47  ;;  %v482_v13 = vpack.c.bf16 %v418_v3, %v418_v3  ;;  %v483_v14 = vpack.c.bf16 %v419_v4, %v419_v4  ;;  %v484_v15 = vpack.c.bf16 %v420_v5, %v420_v5  ;;  %v424_v16 = vmax.f32 %v360_v6, 0.0  ;;  %v235_v47 = vld [vmem:[%s802_s21 + $0xc8] sm:$0xff] }
  0x1f   : > { %546 = vst.msk [vmem:[%s836_s27 + $0x1c] sm:$0xf] %vm538_vm0, %v481_v52  ;;  %v485_v20 = vpack.c.bf16 %v421_v8, %v421_v8  ;;  %v486_v21 = vpack.c.bf16 %v422_v9, %v422_v9  ;;  %v487_v22 = vpack.c.bf16 %v423_v10, %v423_v10  ;;  %v425_v23 = vmax.f32 %v361_v11, 0.0  ;;  %v236_v52 = vld [vmem:[%s802_s21 + $0xd0] sm:$0xff]  ;;  %v239_v59 = vld [vmem:[%s802_s21 + $0xe8] sm:$0xff] }
  0x20   : > { %547 = vst.msk [vmem:[%s836_s27 + $0x20] sm:$0xf] %vm538_vm0, %v482_v13  ;;  %v488_v25 = vpack.c.bf16 %v424_v16, %v424_v16  ;;  %v294_v26 = vmul.f32 %v796_v0, %v226_v2  ;;  %v295_v27 = vmul.f32 %v796_v0, %v227_v7  ;;  %v296_v28 = vmul.f32 %v796_v0, %v228_v12  ;;  %v240_v2 = vld [vmem:[%s802_s21 + $0xf0] sm:$0xff]  ;;  %v241_v7 = vld [vmem:[%s802_s21 + $0xf8] sm:$0xff] }
  0x21   : > { %548 = vst.msk [vmem:[%s836_s27 + $0x24] sm:$0xf] %vm538_vm0, %v483_v14  ;;  %v489_v30 = vpack.c.bf16 %v425_v23, %v425_v23  ;;  %v297_v31 = vmul.f32 %v796_v0, %v229_v17  ;;  %v298_v32 = vmul.f32 %v796_v0, %v230_v18  ;;  %v299_v33 = vmul.f32 %v796_v0, %v231_v19 }
  0x22   : > { %549 = vst.msk [vmem:[%s836_s27 + $0x28] sm:$0xf] %vm538_vm0, %v484_v15  ;;  %v362_v34 = vadd.f32 %v807_v1, %v294_v26  ;;  %v363_v35 = vadd.f32 %v807_v1, %v295_v27  ;;  %v364_v36 = vadd.f32 %v807_v1, %v296_v28  ;;  %v300_v37 = vmul.f32 %v796_v0, %v232_v24 }
  0x23   : > { %550 = vst.msk [vmem:[%s836_s27 + $0x2c] sm:$0xf] %vm538_vm0, %v485_v20  ;;  %v365_v38 = vadd.f32 %v807_v1, %v297_v31  ;;  %v366_v39 = vadd.f32 %v807_v1, %v298_v32  ;;  %v367_v40 = vadd.f32 %v807_v1, %v299_v33  ;;  %v301_v41 = vmul.f32 %v796_v0, %v233_v29  ;;  %v242_v20 = vld [vmem:[%s802_s21 + $0x100] sm:$0xff] }
  0x24   : > { %551 = vst.msk [vmem:[%s836_s27 + $0x30] sm:$0xf] %vm538_vm0, %v486_v21  ;;  %v426_v43 = vmax.f32 %v362_v34, 0.0  ;;  %v427_v44 = vmax.f32 %v363_v35, 0.0  ;;  %v428_v45 = vmax.f32 %v364_v36, 0.0  ;;  %v368_v46 = vadd.f32 %v807_v1, %v300_v37  ;;  %v245_v35 = vld [vmem:[%s802_s21 + $0x118] sm:$0xff] }
  0x25   : > { %552 = vst.msk [vmem:[%s836_s27 + $0x34] sm:$0xf] %vm538_vm0, %v487_v22  ;;  %v429_v48 = vmax.f32 %v365_v38, 0.0  ;;  %v430_v49 = vmax.f32 %v366_v39, 0.0  ;;  %v431_v50 = vmax.f32 %v367_v40, 0.0  ;;  %v369_v51 = vadd.f32 %v807_v1, %v301_v41  ;;  %v246_v36 = vld [vmem:[%s802_s21 + $0x120] sm:$0xff] }
  0x26   : > { %553 = vst.msk [vmem:[%s836_s27 + $0x38] sm:$0xf] %vm538_vm0, %v488_v25  ;;  %v490_v53 = vpack.c.bf16 %v426_v43, %v426_v43  ;;  %v491_v54 = vpack.c.bf16 %v427_v44, %v427_v44  ;;  %v492_v55 = vpack.c.bf16 %v428_v45, %v428_v45  ;;  %v432_v56 = vmax.f32 %v368_v46, 0.0  ;;  %v243_v25 = vld [vmem:[%s802_s21 + $0x108] sm:$0xff] }
  0x27   : > { %554 = vst.msk [vmem:[%s836_s27 + $0x3c] sm:$0xf] %vm538_vm0, %v489_v30  ;;  %v493_v60 = vpack.c.bf16 %v429_v48, %v429_v48  ;;  %v494_v61 = vpack.c.bf16 %v430_v49, %v430_v49  ;;  %v495_v62 = vpack.c.bf16 %v431_v50, %v431_v50  ;;  %v433_v63 = vmax.f32 %v369_v51, 0.0  ;;  %v244_v30 = vld [vmem:[%s802_s21 + $0x110] sm:$0xff]  ;;  %v247_v37 = vld [vmem:[%s802_s21 + $0x128] sm:$0xff] }
  0x28   : > { %555 = vst.msk [vmem:[%s836_s27 + $0x40] sm:$0xf] %vm538_vm0, %v490_v53  ;;  %v496_v3 = vpack.c.bf16 %v432_v56, %v432_v56  ;;  %v302_v4 = vmul.f32 %v796_v0, %v234_v42  ;;  %v303_v5 = vmul.f32 %v796_v0, %v235_v47  ;;  %v304_v6 = vmul.f32 %v796_v0, %v236_v52  ;;  %v248_v42 = vld [vmem:[%s802_s21 + $0x130] sm:$0xff]  ;;  %v249_v47 = vld [vmem:[%s802_s21 + $0x138] sm:$0xff] }
  0x29   : > { %556 = vst.msk [vmem:[%s836_s27 + $0x44] sm:$0xf] %vm538_vm0, %v491_v54  ;;  %v497_v8 = vpack.c.bf16 %v433_v63, %v433_v63  ;;  %v305_v9 = vmul.f32 %v796_v0, %v237_v57  ;;  %v306_v10 = vmul.f32 %v796_v0, %v238_v58  ;;  %v307_v11 = vmul.f32 %v796_v0, %v239_v59 }
  0x2a   : > { %557 = vst.msk [vmem:[%s836_s27 + $0x48] sm:$0xf] %vm538_vm0, %v492_v55  ;;  %v370_v12 = vadd.f32 %v807_v1, %v302_v4  ;;  %v371_v13 = vadd.f32 %v807_v1, %v303_v5  ;;  %v372_v14 = vadd.f32 %v807_v1, %v304_v6  ;;  %v308_v15 = vmul.f32 %v796_v0, %v240_v2 }
  0x2b   : > { %558 = vst.msk [vmem:[%s836_s27 + $0x4c] sm:$0xf] %vm538_vm0, %v493_v60  ;;  %v373_v16 = vadd.f32 %v807_v1, %v305_v9  ;;  %v374_v17 = vadd.f32 %v807_v1, %v306_v10  ;;  %v375_v18 = vadd.f32 %v807_v1, %v307_v11  ;;  %v309_v19 = vmul.f32 %v796_v0, %v241_v7  ;;  %v250_v60 = vld [vmem:[%s802_s21 + $0x140] sm:$0xff] }
  0x2c   : > { %559 = vst.msk [vmem:[%s836_s27 + $0x50] sm:$0xf] %vm538_vm0, %v494_v61  ;;  %v434_v21 = vmax.f32 %v370_v12, 0.0  ;;  %v435_v22 = vmax.f32 %v371_v13, 0.0  ;;  %v436_v23 = vmax.f32 %v372_v14, 0.0  ;;  %v376_v24 = vadd.f32 %v807_v1, %v308_v15  ;;  %v253_v13 = vld [vmem:[%s802_s21 + $0x158] sm:$0xff] }
  0x2d   : > { %560 = vst.msk [vmem:[%s836_s27 + $0x54] sm:$0xf] %vm538_vm0, %v495_v62  ;;  %v437_v26 = vmax.f32 %v373_v16, 0.0  ;;  %v438_v27 = vmax.f32 %v374_v17, 0.0  ;;  %v439_v28 = vmax.f32 %v375_v18, 0.0  ;;  %v377_v29 = vadd.f32 %v807_v1, %v309_v19  ;;  %v254_v14 = vld [vmem:[%s802_s21 + $0x160] sm:$0xff] }
  0x2e   : > { %561 = vst.msk [vmem:[%s836_s27 + $0x58] sm:$0xf] %vm538_vm0, %v496_v3  ;;  %v498_v31 = vpack.c.bf16 %v434_v21, %v434_v21  ;;  %v499_v32 = vpack.c.bf16 %v435_v22, %v435_v22  ;;  %v500_v33 = vpack.c.bf16 %v436_v23, %v436_v23  ;;  %v440_v34 = vmax.f32 %v376_v24, 0.0  ;;  %v251_v3 = vld [vmem:[%s802_s21 + $0x148] sm:$0xff] }
  0x2f   : > { %562 = vst.msk [vmem:[%s836_s27 + $0x5c] sm:$0xf] %vm538_vm0, %v497_v8  ;;  %v501_v38 = vpack.c.bf16 %v437_v26, %v437_v26  ;;  %v502_v39 = vpack.c.bf16 %v438_v27, %v438_v27  ;;  %v503_v40 = vpack.c.bf16 %v439_v28, %v439_v28  ;;  %v441_v41 = vmax.f32 %v377_v29, 0.0  ;;  %v252_v8 = vld [vmem:[%s802_s21 + $0x150] sm:$0xff]  ;;  %v255_v15 = vld [vmem:[%s802_s21 + $0x168] sm:$0xff] }
  0x30   : > { %563 = vst.msk [vmem:[%s836_s27 + $0x60] sm:$0xf] %vm538_vm0, %v498_v31  ;;  %v504_v43 = vpack.c.bf16 %v440_v34, %v440_v34  ;;  %v310_v44 = vmul.f32 %v796_v0, %v242_v20  ;;  %v311_v45 = vmul.f32 %v796_v0, %v243_v25  ;;  %v312_v46 = vmul.f32 %v796_v0, %v244_v30  ;;  %v256_v20 = vld [vmem:[%s802_s21 + $0x170] sm:$0xff]  ;;  %v257_v25 = vld [vmem:[%s802_s21 + $0x178] sm:$0xff] }
  0x31   : > { %564 = vst.msk [vmem:[%s836_s27 + $0x64] sm:$0xf] %vm538_vm0, %v499_v32  ;;  %v505_v48 = vpack.c.bf16 %v441_v41, %v441_v41  ;;  %v313_v49 = vmul.f32 %v796_v0, %v245_v35  ;;  %v314_v50 = vmul.f32 %v796_v0, %v246_v36  ;;  %v315_v51 = vmul.f32 %v796_v0, %v247_v37 }
  0x32   : > { %565 = vst.msk [vmem:[%s836_s27 + $0x68] sm:$0xf] %vm538_vm0, %v500_v33  ;;  %v378_v52 = vadd.f32 %v807_v1, %v310_v44  ;;  %v379_v53 = vadd.f32 %v807_v1, %v311_v45  ;;  %v380_v54 = vadd.f32 %v807_v1, %v312_v46  ;;  %v316_v55 = vmul.f32 %v796_v0, %v248_v42 }
  0x33   : > { %566 = vst.msk [vmem:[%s836_s27 + $0x6c] sm:$0xf] %vm538_vm0, %v501_v38  ;;  %v381_v56 = vadd.f32 %v807_v1, %v313_v49  ;;  %v382_v57 = vadd.f32 %v807_v1, %v314_v50  ;;  %v383_v58 = vadd.f32 %v807_v1, %v315_v51  ;;  %v317_v59 = vmul.f32 %v796_v0, %v249_v47  ;;  %v258_v38 = vld [vmem:[%s802_s21 + $0x180] sm:$0xff] }
  0x34   : > { %567 = vst.msk [vmem:[%s836_s27 + $0x70] sm:$0xf] %vm538_vm0, %v502_v39  ;;  %v442_v61 = vmax.f32 %v378_v52, 0.0  ;;  %v443_v62 = vmax.f32 %v379_v53, 0.0  ;;  %v444_v63 = vmax.f32 %v380_v54, 0.0  ;;  %v384_v2 = vadd.f32 %v807_v1, %v316_v55  ;;  %v261_v53 = vld [vmem:[%s802_s21 + $0x198] sm:$0xff] }
  0x35   : > { %568 = vst.msk [vmem:[%s836_s27 + $0x74] sm:$0xf] %vm538_vm0, %v503_v40  ;;  %v445_v4 = vmax.f32 %v381_v56, 0.0  ;;  %v446_v5 = vmax.f32 %v382_v57, 0.0  ;;  %v447_v6 = vmax.f32 %v383_v58, 0.0  ;;  %v385_v7 = vadd.f32 %v807_v1, %v317_v59  ;;  %v262_v54 = vld [vmem:[%s802_s21 + $0x1a0] sm:$0xff] }
  0x36   : > { %569 = vst.msk [vmem:[%s836_s27 + $0x78] sm:$0xf] %vm538_vm0, %v504_v43  ;;  %v506_v9 = vpack.c.bf16 %v442_v61, %v442_v61  ;;  %v507_v10 = vpack.c.bf16 %v443_v62, %v443_v62  ;;  %v508_v11 = vpack.c.bf16 %v444_v63, %v444_v63  ;;  %v448_v12 = vmax.f32 %v384_v2, 0.0  ;;  %v259_v43 = vld [vmem:[%s802_s21 + $0x188] sm:$0xff] }
  0x37   : > { %570 = vst.msk [vmem:[%s836_s27 + $0x7c] sm:$0xf] %vm538_vm0, %v505_v48  ;;  %v509_v16 = vpack.c.bf16 %v445_v4, %v445_v4  ;;  %v510_v17 = vpack.c.bf16 %v446_v5, %v446_v5  ;;  %v511_v18 = vpack.c.bf16 %v447_v6, %v447_v6  ;;  %v449_v19 = vmax.f32 %v385_v7, 0.0  ;;  %v260_v48 = vld [vmem:[%s802_s21 + $0x190] sm:$0xff]  ;;  %v263_v55 = vld [vmem:[%s802_s21 + $0x1a8] sm:$0xff] }
  0x38   : > { %571 = vst.msk [vmem:[%s836_s27 + $0x80] sm:$0xf] %vm538_vm0, %v506_v9  ;;  %v512_v21 = vpack.c.bf16 %v448_v12, %v448_v12  ;;  %v318_v22 = vmul.f32 %v796_v0, %v250_v60  ;;  %v319_v23 = vmul.f32 %v796_v0, %v251_v3  ;;  %v320_v24 = vmul.f32 %v796_v0, %v252_v8  ;;  %v264_v60 = vld [vmem:[%s802_s21 + $0x1b0] sm:$0xff]  ;;  %v265_v3 = vld [vmem:[%s802_s21 + $0x1b8] sm:$0xff] }
  0x39   : > { %572 = vst.msk [vmem:[%s836_s27 + $0x84] sm:$0xf] %vm538_vm0, %v507_v10  ;;  %v513_v26 = vpack.c.bf16 %v449_v19, %v449_v19  ;;  %v321_v27 = vmul.f32 %v796_v0, %v253_v13  ;;  %v322_v28 = vmul.f32 %v796_v0, %v254_v14  ;;  %v323_v29 = vmul.f32 %v796_v0, %v255_v15 }
  0x3a   : > { %573 = vst.msk [vmem:[%s836_s27 + $0x88] sm:$0xf] %vm538_vm0, %v508_v11  ;;  %v386_v30 = vadd.f32 %v807_v1, %v318_v22  ;;  %v387_v31 = vadd.f32 %v807_v1, %v319_v23  ;;  %v388_v32 = vadd.f32 %v807_v1, %v320_v24  ;;  %v324_v33 = vmul.f32 %v796_v0, %v256_v20 }
  0x3b   : > { %574 = vst.msk [vmem:[%s836_s27 + $0x8c] sm:$0xf] %vm538_vm0, %v509_v16  ;;  %v389_v34 = vadd.f32 %v807_v1, %v321_v27  ;;  %v390_v35 = vadd.f32 %v807_v1, %v322_v28  ;;  %v391_v36 = vadd.f32 %v807_v1, %v323_v29  ;;  %v325_v37 = vmul.f32 %v796_v0, %v257_v25  ;;  %v266_v16 = vld [vmem:[%s802_s21 + $0x1c0] sm:$0xff] }
  0x3c   : > { %575 = vst.msk [vmem:[%s836_s27 + $0x90] sm:$0xf] %vm538_vm0, %v510_v17  ;;  %v450_v39 = vmax.f32 %v386_v30, 0.0  ;;  %v451_v40 = vmax.f32 %v387_v31, 0.0  ;;  %v452_v41 = vmax.f32 %v388_v32, 0.0  ;;  %v392_v42 = vadd.f32 %v807_v1, %v324_v33  ;;  %v269_v31 = vld [vmem:[%s802_s21 + $0x1d8] sm:$0xff] }
  0x3d   : > { %576 = vst.msk [vmem:[%s836_s27 + $0x94] sm:$0xf] %vm538_vm0, %v511_v18  ;;  %v453_v44 = vmax.f32 %v389_v34, 0.0  ;;  %v454_v45 = vmax.f32 %v390_v35, 0.0  ;;  %v455_v46 = vmax.f32 %v391_v36, 0.0  ;;  %v393_v47 = vadd.f32 %v807_v1, %v325_v37  ;;  %v270_v32 = vld [vmem:[%s802_s21 + $0x1e0] sm:$0xff] }
  0x3e   : > { %577 = vst.msk [vmem:[%s836_s27 + $0x98] sm:$0xf] %vm538_vm0, %v512_v21  ;;  %v514_v49 = vpack.c.bf16 %v450_v39, %v450_v39  ;;  %v515_v50 = vpack.c.bf16 %v451_v40, %v451_v40  ;;  %v516_v51 = vpack.c.bf16 %v452_v41, %v452_v41  ;;  %v456_v52 = vmax.f32 %v392_v42, 0.0  ;;  %v267_v21 = vld [vmem:[%s802_s21 + $0x1c8] sm:$0xff] }
  0x3f   : > { %578 = vst.msk [vmem:[%s836_s27 + $0x9c] sm:$0xf] %vm538_vm0, %v513_v26  ;;  %v517_v56 = vpack.c.bf16 %v453_v44, %v453_v44  ;;  %v518_v57 = vpack.c.bf16 %v454_v45, %v454_v45  ;;  %v519_v58 = vpack.c.bf16 %v455_v46, %v455_v46  ;;  %v457_v59 = vmax.f32 %v393_v47, 0.0  ;;  %v268_v26 = vld [vmem:[%s802_s21 + $0x1d0] sm:$0xff]  ;;  %v271_v33 = vld [vmem:[%s802_s21 + $0x1e8] sm:$0xff] }
  0x40   : > { %579 = vst.msk [vmem:[%s836_s27 + $0xa0] sm:$0xf] %vm538_vm0, %v514_v49  ;;  %v520_v61 = vpack.c.bf16 %v456_v52, %v456_v52  ;;  %v326_v62 = vmul.f32 %v796_v0, %v258_v38  ;;  %v327_v63 = vmul.f32 %v796_v0, %v259_v43  ;;  %v328_v2 = vmul.f32 %v796_v0, %v260_v48  ;;  %v272_v38 = vld [vmem:[%s802_s21 + $0x1f0] sm:$0xff]  ;;  %v273_v43 = vld [vmem:[%s802_s21 + $0x1f8] sm:$0xff] }
  0x41   : > { %580 = vst.msk [vmem:[%s836_s27 + $0xa4] sm:$0xf] %vm538_vm0, %v515_v50  ;;  %v521_v4 = vpack.c.bf16 %v457_v59, %v457_v59  ;;  %v329_v5 = vmul.f32 %v796_v0, %v261_v53  ;;  %v330_v6 = vmul.f32 %v796_v0, %v262_v54  ;;  %v331_v7 = vmul.f32 %v796_v0, %v263_v55 }
  0x42   : > { %581 = vst.msk [vmem:[%s836_s27 + $0xa8] sm:$0xf] %vm538_vm0, %v516_v51  ;;  %v394_v8 = vadd.f32 %v807_v1, %v326_v62  ;;  %v395_v9 = vadd.f32 %v807_v1, %v327_v63  ;;  %v396_v10 = vadd.f32 %v807_v1, %v328_v2  ;;  %v332_v11 = vmul.f32 %v796_v0, %v264_v60 }
  0x43   : > { %582 = vst.msk [vmem:[%s836_s27 + $0xac] sm:$0xf] %vm538_vm0, %v517_v56  ;;  %v397_v12 = vadd.f32 %v807_v1, %v329_v5  ;;  %v398_v13 = vadd.f32 %v807_v1, %v330_v6  ;;  %v399_v14 = vadd.f32 %v807_v1, %v331_v7  ;;  %v333_v15 = vmul.f32 %v796_v0, %v265_v3 }
  0x44   : > { %583 = vst.msk [vmem:[%s836_s27 + $0xb0] sm:$0xf] %vm538_vm0, %v518_v57  ;;  %v458_v17 = vmax.f32 %v394_v8, 0.0  ;;  %v459_v18 = vmax.f32 %v395_v9, 0.0  ;;  %v460_v19 = vmax.f32 %v396_v10, 0.0  ;;  %v400_v20 = vadd.f32 %v807_v1, %v332_v11 }
  0x45   : > { %584 = vst.msk [vmem:[%s836_s27 + $0xb4] sm:$0xf] %vm538_vm0, %v519_v58  ;;  %v461_v22 = vmax.f32 %v397_v12, 0.0  ;;  %v462_v23 = vmax.f32 %v398_v13, 0.0  ;;  %v463_v24 = vmax.f32 %v399_v14, 0.0  ;;  %v401_v25 = vadd.f32 %v807_v1, %v333_v15 }
  0x46   : > { %585 = vst.msk [vmem:[%s836_s27 + $0xb8] sm:$0xf] %vm538_vm0, %v520_v61  ;;  %v522_v27 = vpack.c.bf16 %v458_v17, %v458_v17  ;;  %v523_v28 = vpack.c.bf16 %v459_v18, %v459_v18  ;;  %v524_v29 = vpack.c.bf16 %v460_v19, %v460_v19  ;;  %v464_v30 = vmax.f32 %v400_v20, 0.0 }
  0x47   : > { %586 = vst.msk [vmem:[%s836_s27 + $0xbc] sm:$0xf] %vm538_vm0, %v521_v4  ;;  %v525_v34 = vpack.c.bf16 %v461_v22, %v461_v22  ;;  %v526_v35 = vpack.c.bf16 %v462_v23, %v462_v23  ;;  %v527_v36 = vpack.c.bf16 %v463_v24, %v463_v24  ;;  %v465_v37 = vmax.f32 %v401_v25, 0.0 }
  0x48   : > { %587 = vst.msk [vmem:[%s836_s27 + $0xc0] sm:$0xf] %vm538_vm0, %v522_v27  ;;  %v528_v39 = vpack.c.bf16 %v464_v30, %v464_v30  ;;  %v334_v40 = vmul.f32 %v796_v0, %v266_v16  ;;  %v335_v41 = vmul.f32 %v796_v0, %v267_v21  ;;  %v336_v42 = vmul.f32 %v796_v0, %v268_v26 }
  0x49   : > { %588 = vst.msk [vmem:[%s836_s27 + $0xc4] sm:$0xf] %vm538_vm0, %v523_v28  ;;  %v529_v44 = vpack.c.bf16 %v465_v37, %v465_v37  ;;  %v337_v45 = vmul.f32 %v796_v0, %v269_v31  ;;  %v338_v46 = vmul.f32 %v796_v0, %v270_v32  ;;  %v339_v47 = vmul.f32 %v796_v0, %v271_v33 }
  0x4a   : > { %589 = vst.msk [vmem:[%s836_s27 + $0xc8] sm:$0xf] %vm538_vm0, %v524_v29  ;;  %v402_v48 = vadd.f32 %v807_v1, %v334_v40  ;;  %v403_v49 = vadd.f32 %v807_v1, %v335_v41  ;;  %v404_v50 = vadd.f32 %v807_v1, %v336_v42  ;;  %v340_v51 = vmul.f32 %v796_v0, %v272_v38 }
  0x4b   : > { %590 = vst.msk [vmem:[%s836_s27 + $0xcc] sm:$0xf] %vm538_vm0, %v525_v34  ;;  %v405_v52 = vadd.f32 %v807_v1, %v337_v45  ;;  %v406_v53 = vadd.f32 %v807_v1, %v338_v46  ;;  %v407_v54 = vadd.f32 %v807_v1, %v339_v47  ;;  %v341_v55 = vmul.f32 %v796_v0, %v273_v43 }
  0x4c   : > { %591 = vst.msk [vmem:[%s836_s27 + $0xd0] sm:$0xf] %vm538_vm0, %v526_v35  ;;  %v466_v56 = vmax.f32 %v402_v48, 0.0  ;;  %v467_v57 = vmax.f32 %v403_v49, 0.0  ;;  %v468_v58 = vmax.f32 %v404_v50, 0.0  ;;  %v408_v59 = vadd.f32 %v807_v1, %v340_v51 }
  0x4d   : > { %592 = vst.msk [vmem:[%s836_s27 + $0xd4] sm:$0xf] %vm538_vm0, %v527_v36  ;;  %v469_v60 = vmax.f32 %v405_v52, 0.0  ;;  %v470_v61 = vmax.f32 %v406_v53, 0.0  ;;  %v471_v62 = vmax.f32 %v407_v54, 0.0  ;;  %v409_v63 = vadd.f32 %v807_v1, %v341_v55 }
  0x4e   : > { %593 = vst.msk [vmem:[%s836_s27 + $0xd8] sm:$0xf] %vm538_vm0, %v528_v39  ;;  %v530_v0 = vpack.c.bf16 %v466_v56, %v466_v56  ;;  %v531_v2 = vpack.c.bf16 %v467_v57, %v467_v57  ;;  %v532_v3 = vpack.c.bf16 %v468_v58, %v468_v58  ;;  %v472_v4 = vmax.f32 %v408_v59, 0.0 }
  0x4f   : > { %594 = vst.msk [vmem:[%s836_s27 + $0xdc] sm:$0xf] %vm538_vm0, %v529_v44  ;;  %v533_v5 = vpack.c.bf16 %v469_v60, %v469_v60  ;;  %v473_v6 = vmax.f32 %v409_v63, 0.0  ;;  %v534_v7 = vpack.c.bf16 %v470_v61, %v470_v61  ;;  %v535_v1 = vpack.c.bf16 %v471_v62, %v471_v62 }
  0x50   : > { %595 = vst.msk [vmem:[%s836_s27 + $0xe0] sm:$0xf] %vm538_vm0, %v530_v0  ;;  %v536_v8 = vpack.c.bf16 %v472_v4, %v472_v4 }
  0x51   : > { %596 = vst.msk [vmem:[%s836_s27 + $0xe4] sm:$0xf] %vm538_vm0, %v531_v2  ;;  %v537_v9 = vpack.c.bf16 %v473_v6, %v473_v6 }
  0x52   : > { %597 = vst.msk [vmem:[%s836_s27 + $0xe8] sm:$0xf] %vm538_vm0, %v532_v3 }
  0x53   : > { %598 = vst.msk [vmem:[%s836_s27 + $0xec] sm:$0xf] %vm538_vm0, %v533_v5 }
  0x54   : > { %599 = vst.msk [vmem:[%s836_s27 + $0xf0] sm:$0xf] %vm538_vm0, %v534_v7 }
  0x55   : > { %600 = vst.msk [vmem:[%s836_s27 + $0xf4] sm:$0xf] %vm538_vm0, %v535_v1 }
  0x56   : > { %601 = vst.msk [vmem:[%s836_s27 + $0xf8] sm:$0xf] %vm538_vm0, %v536_v8 }
  0x57   : > { %602 = vst.msk [vmem:[%s836_s27 + $0xfc] sm:$0xf] %vm538_vm0, %v537_v9 }
  0x58 PF: > { %s13_s14 = sadd.s32 1, %s751_s14   ;;  %s1148_s12 = smov %s747_s13 }
  0x59   : > { %p10_p5 = scmp.ge.s32.totalorder %s13_s14, 6   ;;  %s1149_s13 = smov %s1151_s15 }
  0x5b   :  { %12 = sbr.rel (!%p10_p5) target bundleno = 2 (0x2), region = 62 }

// kernel: _lambda_.17
= control target key start
LH: loop header
LB: loop body
LE: loop exit
PB: predicated region body
PF: predicated region fallthrough
CT: control target
= control target key end

     0   :  { %s960_s12 = smov 0   ;;  %s962_s13 = smov 0   ;;  %s1123_s0 = inlined_call_operand.vmem [shape: bf16[4,2048,32], index: 0, kind: input, shape index: {}]   ;;  %s1124_s1 = inlined_call_operand.vmem [shape: bf16[4,32,128], index: 1, kind: input, shape index: {}]   ;;  %s1125_s2 = inlined_call_operand.vmem [shape: f32[1,128], index: 2, kind: input, shape index: {}]   ;;  %s1126_s3 = inlined_call_operand.vmem [shape: f32[4,2048,128], index: 3, kind: output, shape index: {}]  }
   0x1   :  { %s964_s14 = smov 0   ;;  %s966_s15 = smov 0  }
   0x2   :  { %s968_s16 = smov 0  }
   0x3 LB: > { %s22_s17 = sadd.s32 1, %s930_s14  ;;  %s25_s18 = sadd.s32 1, %s934_s15  ;;  %s938_s16 = sphi %s968_s16, %s13_s16   ;;  %s934_s15 = sphi %s966_s15, %s1130_s15   ;;  %s930_s14 = sphi %s964_s14, %s1129_s14   ;;  %s926_s13 = sphi %s962_s13, %s1128_s13   ;;  %s922_s12 = sphi %s960_s12, %s1127_s12  }
   0x4   : > { %p23_p0 = scmp.ge.s32.totalorder %s22_s17, 8  ;;  %p671_p1 = scmp.ge.s32.totalorder %s938_s16, 1 }
   0x5   : > { %p168_p2 = scmp.lt.s32.totalorder %s938_s16, 33 }
   0x6   : > { %s1132_s17 = smov (%p23_p0, %s22_s17), 0  ;;  %s1134_s18 = smov (!%p23_p0, %s25_s18), %s934_s15 }
   0x7   : > { %p169_p3 = pnand %p671_p1, %p168_p2  ;;  %p27_p4 = scmp.ge.s32.totalorder %s1134_s18, 4 }
   0x8   : > { %s672_s19 = sshll.u32 (!%p169_p3), %s922_s12, 5  ;;  %p206_p5 = scmp.lt.s32.totalorder (!%p169_p3), %s926_s13, 3 }
   0x9   : > { %s1136_s18 = smov (%p27_p4, %s1134_s18), 0  ;;  %172 = sbr.rel (%p169_p3) target bundleno = 225 (0xe1), region = 32 }
   0xa   : > { %p208_p6 = scmp.lt.s32.totalorder (!%p169_p3), %s672_s19, 255 }
   0xe   : > { %s1138_s13 = smov (!%p206_p5, %s926_s13), 3  ;;  %s1140_s19 = smov (!%p208_p6, %s672_s19), 255  ;;  %vm363_vm0 = vcmask 261120   ;;  %v1036_v18 = vld [vmem:[%s1125_s2] ss:$0 sm:$0xff] }
   0xf   : > { %s673_s20 = sshll.u32 %s1138_s13, 8  ;;  %s770_s21 = sshll.u32 %s1138_s13, 4 }
  0x10   : > { %s990_s22 = sadd.s32 %s673_s20, %s1140_s19  ;;  %s219_s25 = scalar_lea.vmem %s1124_s1, %s770_s21 }
  0x11   : > { %s674_s26 = sshll.u32 %s990_s22, 2  ;;  %v788_v0 = vld [vmem:[%s219_s25 + $0x8] sm:$0xff]  ;;  %v787_v1 = vld [vmem:[%s219_s25] sm:$0xff]  ;;  %s679_s5 = sshll.u32 %s990_s22, 3 }
  0x12   : > { %s999_s29 = scalar_lea.vmem %s1123_s0, %s674_s26  ;;  %418 = vmatpush.bf16.msra.mxu0 %v788_v0  ;;  %789 = vmatpush.bf16.msra.mxu1 %v788_v0  ;;  %s1044_s8 = scalar_lea.vmem %s1126_s3, %s679_s5 }
  0x13   : > { %790 = vmatpush.bf16.msra.mxu2 %v788_v0  ;;  %791 = vmatpush.bf16.msra.mxu3 %v788_v0  ;;  %v771_v2 = vld [vmem:[%s999_s29] sm:$0xff]  ;;  %v772_v6 = vld [vmem:[%s999_s29 + $0x8] sm:$0xff]  ;;  %v773_v10 = vld [vmem:[%s999_s29 + $0x10] sm:$0xff] }
  0x14   : > { %v775_v3 = vld [vmem:[%s999_s29 + $0x20] sm:$0xff]  ;;  %v776_v7 = vld [vmem:[%s999_s29 + $0x28] sm:$0xff]  ;;  %v777_v11 = vld [vmem:[%s999_s29 + $0x30] sm:$0xff] }
  0x15   : > { %v779_v4 = vld [vmem:[%s999_s29 + $0x40] sm:$0xff]  ;;  %v780_v8 = vld [vmem:[%s999_s29 + $0x48] sm:$0xff]  ;;  %v781_v12 = vld [vmem:[%s999_s29 + $0x50] sm:$0xff] }
  0x16   : > { %419 = vmatpush.bf16.msra.mxu0 %v787_v1  ;;  %792 = vmatpush.bf16.msra.mxu1 %v787_v1  ;;  %v783_v5 = vld [vmem:[%s999_s29 + $0x60] sm:$0xff]  ;;  %v784_v9 = vld [vmem:[%s999_s29 + $0x68] sm:$0xff]  ;;  %v785_v13 = vld [vmem:[%s999_s29 + $0x70] sm:$0xff] }
  0x17   : > { %793 = vmatpush.bf16.msra.mxu2 %v787_v1  ;;  %794 = vmatpush.bf16.msra.mxu3 %v787_v1  ;;  %v774_v14 = vld [vmem:[%s999_s29 + $0x18] sm:$0xff] }
  0x18   : > { %v778_v15 = vld [vmem:[%s999_s29 + $0x38] sm:$0xff] }
  0x19   : > { %752 = vmatmul.msk.bf16.vlgmr.msra.gmra.mxu0 %vm363_vm0, %v771_v2  ;;  %756 = vmatmul.msk.bf16.vlgmr.msra.gmra.mxu1 %vm363_vm0, %v775_v3  ;;  %v782_v16 = vld [vmem:[%s999_s29 + $0x58] sm:$0xff] }
  0x1a   : > { %760 = vmatmul.msk.bf16.vlgmr.msra.gmra.mxu2 %vm363_vm0, %v779_v4  ;;  %764 = vmatmul.msk.bf16.vlgmr.msra.gmra.mxu3 %vm363_vm0, %v783_v5  ;;  %v786_v17 = vld [vmem:[%s999_s29 + $0x78] sm:$0xff] }
  0x29   : > { %753 = vmatmul.msk.bf16.gmra.mxu0 %vm363_vm0, %v772_v6  ;;  %757 = vmatmul.msk.bf16.gmra.mxu1 %vm363_vm0, %v776_v7 }
  0x2a   : > { %761 = vmatmul.msk.bf16.gmra.mxu2 %vm363_vm0, %v780_v8  ;;  %765 = vmatmul.msk.bf16.gmra.mxu3 %vm363_vm0, %v784_v9 }
  0x39   : > { %754 = vmatmul.msk.bf16.gmra.mxu0 %vm363_vm0, %v773_v10  ;;  %758 = vmatmul.msk.bf16.gmra.mxu1 %vm363_vm0, %v777_v11 }
  0x3a   : > { %762 = vmatmul.msk.bf16.gmra.mxu2 %vm363_vm0, %v781_v12  ;;  %766 = vmatmul.msk.bf16.gmra.mxu3 %vm363_vm0, %v785_v13 }
  0x49   : > { %755 = vmatmul.msk.bf16.gmra.mxu0 %vm363_vm0, %v774_v14  ;;  %759 = vmatmul.msk.bf16.gmra.mxu1 %vm363_vm0, %v778_v15 }
  0x4a   : > { %763 = vmatmul.msk.bf16.gmra.mxu2 %vm363_vm0, %v782_v16  ;;  %767 = vmatmul.msk.bf16.gmra.mxu3 %vm363_vm0, %v786_v17 }
  0x96   : > { %v421_v19 = vpop.f32.mrf.mxu0  ;;  %v441_v20 = vpop.f32.mrf.mxu1 }
  0x97   : > { %v422_v21 = vadd.f32 %v1036_v18, %v421_v19  ;;  %v442_v22 = vadd.f32 %v1036_v18, %v441_v20 }
  0x99   : > { %836 = vtanh.f32 %v422_v21 }
  0x9a   : > { %838 = vtanh.f32 %v442_v22 }
  0x9d   : > { %v461_v23 = vpop.f32.mrf.mxu2  ;;  %v481_v24 = vpop.f32.mrf.mxu3 }
  0x9e   : > { %v462_v25 = vadd.f32 %v1036_v18, %v461_v23  ;;  %v482_v26 = vadd.f32 %v1036_v18, %v481_v24  ;;  %v423_v27 = vpop.f32.mrf.mxu0  ;;  %v443_v28 = vpop.f32.mrf.mxu1 }
  0x9f   : > { %v837_v29 = vpop.eup %836  ;;  %v424_v30 = vadd.f32 %v1036_v18, %v423_v27  ;;  %v444_v31 = vadd.f32 %v1036_v18, %v443_v28 }
  0xa0   : > { %v839_v32 = vpop.eup %838  ;;  %533 = vst [vmem:[%s1044_s8] sm:$0xff] %v837_v29  ;;  %840 = vtanh.f32 %v462_v25 }
  0xa1   : > { %541 = vst [vmem:[%s1044_s8 + $0x40] sm:$0xff] %v839_v32  ;;  %842 = vtanh.f32 %v482_v26 }
  0xa2   : > { %844 = vtanh.f32 %v424_v30 }
  0xa3   : > { %846 = vtanh.f32 %v444_v31 }
  0xa5   : > { %v463_v33 = vpop.f32.mrf.mxu2  ;;  %v483_v34 = vpop.f32.mrf.mxu3 }
  0xa6   : > { %v841_v35 = vpop.eup %840  ;;  %v464_v36 = vadd.f32 %v1036_v18, %v463_v33  ;;  %v484_v37 = vadd.f32 %v1036_v18, %v483_v34  ;;  %v426_v38 = vpop.f32.mrf.mxu0 }
  0xa7   : > { %v446_v39 = vpop.f32.mrf.mxu1  ;;  %v843_v40 = vpop.eup %842  ;;  %549 = vst [vmem:[%s1044_s8 + $0x80] sm:$0xff] %v841_v35  ;;  %v427_v41 = vadd.f32 %v1036_v18, %v426_v38 }
  0xa8   : > { %v447_v42 = vadd.f32 %v1036_v18, %v446_v39  ;;  %v845_v43 = vpop.eup %844  ;;  %557 = vst [vmem:[%s1044_s8 + $0xc0] sm:$0xff] %v843_v40  ;;  %848 = vtanh.f32 %v464_v36 }
  0xa9   : > { %v847_v44 = vpop.eup %846  ;;  %534 = vst [vmem:[%s1044_s8 + $0x8] sm:$0xff] %v845_v43  ;;  %850 = vtanh.f32 %v484_v37 }
  0xaa   : > { %542 = vst [vmem:[%s1044_s8 + $0x48] sm:$0xff] %v847_v44  ;;  %852 = vtanh.f32 %v427_v41 }
  0xab   : > { %854 = vtanh.f32 %v447_v42 }
  0xad   : > { %v466_v45 = vpop.f32.mrf.mxu2  ;;  %v486_v46 = vpop.f32.mrf.mxu3 }
  0xae   : > { %v849_v47 = vpop.eup %848  ;;  %v467_v48 = vadd.f32 %v1036_v18, %v466_v45  ;;  %v487_v49 = vadd.f32 %v1036_v18, %v486_v46  ;;  %v428_v50 = vpop.f32.mrf.mxu0 }
  0xaf   : > { %v448_v51 = vpop.f32.mrf.mxu1  ;;  %v851_v52 = vpop.eup %850  ;;  %550 = vst [vmem:[%s1044_s8 + $0x88] sm:$0xff] %v849_v47  ;;  %v429_v53 = vadd.f32 %v1036_v18, %v428_v50 }
  0xb0   : > { %v449_v54 = vadd.f32 %v1036_v18, %v448_v51  ;;  %v853_v55 = vpop.eup %852  ;;  %558 = vst [vmem:[%s1044_s8 + $0xc8] sm:$0xff] %v851_v52  ;;  %856 = vtanh.f32 %v467_v48 }
  0xb1   : > { %v855_v56 = vpop.eup %854  ;;  %535 = vst [vmem:[%s1044_s8 + $0x10] sm:$0xff] %v853_v55  ;;  %858 = vtanh.f32 %v487_v49 }
  0xb2   : > { %543 = vst [vmem:[%s1044_s8 + $0x50] sm:$0xff] %v855_v56  ;;  %860 = vtanh.f32 %v429_v53 }
  0xb3   : > { %862 = vtanh.f32 %v449_v54 }
  0xb5   : > { %v468_v57 = vpop.f32.mrf.mxu2  ;;  %v488_v58 = vpop.f32.mrf.mxu3 }
  0xb6   : > { %v857_v59 = vpop.eup %856  ;;  %v469_v60 = vadd.f32 %v1036_v18, %v468_v57  ;;  %v489_v61 = vadd.f32 %v1036_v18, %v488_v58  ;;  %v431_v62 = vpop.f32.mrf.mxu0 }
  0xb7   : > { %v451_v63 = vpop.f32.mrf.mxu1  ;;  %v859_v0 = vpop.eup %858  ;;  %551 = vst [vmem:[%s1044_s8 + $0x90] sm:$0xff] %v857_v59  ;;  %v432_v1 = vadd.f32 %v1036_v18, %v431_v62 }
  0xb8   : > { %v452_v2 = vadd.f32 %v1036_v18, %v451_v63  ;;  %v861_v3 = vpop.eup %860  ;;  %559 = vst [vmem:[%s1044_s8 + $0xd0] sm:$0xff] %v859_v0  ;;  %864 = vtanh.f32 %v469_v60 }
  0xb9   : > { %v863_v4 = vpop.eup %862  ;;  %536 = vst [vmem:[%s1044_s8 + $0x18] sm:$0xff] %v861_v3  ;;  %866 = vtanh.f32 %v489_v61 }
  0xba   : > { %544 = vst [vmem:[%s1044_s8 + $0x58] sm:$0xff] %v863_v4  ;;  %868 = vtanh.f32 %v432_v1 }
  0xbb   : > { %870 = vtanh.f32 %v452_v2 }
  0xbd   : > { %v471_v5 = vpop.f32.mrf.mxu2  ;;  %v491_v6 = vpop.f32.mrf.mxu3 }
  0xbe   : > { %v865_v7 = vpop.eup %864  ;;  %v472_v8 = vadd.f32 %v1036_v18, %v471_v5  ;;  %v492_v9 = vadd.f32 %v1036_v18, %v491_v6  ;;  %v433_v10 = vpop.f32.mrf.mxu0 }
  0xbf   : > { %v453_v11 = vpop.f32.mrf.mxu1  ;;  %v867_v12 = vpop.eup %866  ;;  %552 = vst [vmem:[%s1044_s8 + $0x98] sm:$0xff] %v865_v7  ;;  %v434_v13 = vadd.f32 %v1036_v18, %v433_v10 }
  0xc0   : > { %v454_v14 = vadd.f32 %v1036_v18, %v453_v11  ;;  %v869_v15 = vpop.eup %868  ;;  %560 = vst [vmem:[%s1044_s8 + $0xd8] sm:$0xff] %v867_v12  ;;  %872 = vtanh.f32 %v472_v8 }
  0xc1   : > { %v871_v16 = vpop.eup %870  ;;  %537 = vst [vmem:[%s1044_s8 + $0x20] sm:$0xff] %v869_v15  ;;  %874 = vtanh.f32 %v492_v9 }
  0xc2   : > { %545 = vst [vmem:[%s1044_s8 + $0x60] sm:$0xff] %v871_v16  ;;  %876 = vtanh.f32 %v434_v13 }
  0xc3   : > { %878 = vtanh.f32 %v454_v14 }
  0xc5   : > { %v473_v17 = vpop.f32.mrf.mxu2  ;;  %v493_v19 = vpop.f32.mrf.mxu3 }
  0xc6   : > { %v873_v20 = vpop.eup %872  ;;  %v474_v21 = vadd.f32 %v1036_v18, %v473_v17  ;;  %v494_v22 = vadd.f32 %v1036_v18, %v493_v19  ;;  %v436_v23 = vpop.f32.mrf.mxu0 }
  0xc7   : > { %v456_v24 = vpop.f32.mrf.mxu1  ;;  %v875_v25 = vpop.eup %874  ;;  %553 = vst [vmem:[%s1044_s8 + $0xa0] sm:$0xff] %v873_v20  ;;  %v437_v26 = vadd.f32 %v1036_v18, %v436_v23 }
  0xc8   : > { %v457_v27 = vadd.f32 %v1036_v18, %v456_v24  ;;  %v877_v28 = vpop.eup %876  ;;  %561 = vst [vmem:[%s1044_s8 + $0xe0] sm:$0xff] %v875_v25  ;;  %880 = vtanh.f32 %v474_v21 }
  0xc9   : > { %v879_v29 = vpop.eup %878  ;;  %538 = vst [vmem:[%s1044_s8 + $0x28] sm:$0xff] %v877_v28  ;;  %882 = vtanh.f32 %v494_v22 }
  0xca   : > { %546 = vst [vmem:[%s1044_s8 + $0x68] sm:$0xff] %v879_v29  ;;  %884 = vtanh.f32 %v437_v26 }
  0xcb   : > { %886 = vtanh.f32 %v457_v27 }
  0xcd   : > { %v476_v30 = vpop.f32.mrf.mxu2  ;;  %v496_v31 = vpop.f32.mrf.mxu3 }
  0xce   : > { %v881_v32 = vpop.eup %880  ;;  %v477_v33 = vadd.f32 %v1036_v18, %v476_v30  ;;  %v497_v34 = vadd.f32 %v1036_v18, %v496_v31  ;;  %v438_v35 = vpop.f32.mrf.mxu0 }
  0xcf   : > { %v458_v36 = vpop.f32.mrf.mxu1  ;;  %v883_v37 = vpop.eup %882  ;;  %554 = vst [vmem:[%s1044_s8 + $0xa8] sm:$0xff] %v881_v32  ;;  %v439_v38 = vadd.f32 %v1036_v18, %v438_v35 }
  0xd0   : > { %v459_v39 = vadd.f32 %v1036_v18, %v458_v36  ;;  %v885_v40 = vpop.eup %884  ;;  %562 = vst [vmem:[%s1044_s8 + $0xe8] sm:$0xff] %v883_v37  ;;  %888 = vtanh.f32 %v477_v33 }
  0xd1   : > { %v887_v41 = vpop.eup %886  ;;  %539 = vst [vmem:[%s1044_s8 + $0x30] sm:$0xff] %v885_v40  ;;  %890 = vtanh.f32 %v497_v34 }
  0xd2   : > { %547 = vst [vmem:[%s1044_s8 + $0x70] sm:$0xff] %v887_v41  ;;  %892 = vtanh.f32 %v439_v38 }
  0xd3   : > { %894 = vtanh.f32 %v459_v39 }
  0xd5   : > { %v478_v42 = vpop.f32.mrf.mxu2  ;;  %v498_v43 = vpop.f32.mrf.mxu3 }
  0xd6   : > { %v889_v44 = vpop.eup %888  ;;  %v479_v45 = vadd.f32 %v1036_v18, %v478_v42  ;;  %v499_v46 = vadd.f32 %v1036_v18, %v498_v43 }
  0xd7   : > { %v891_v47 = vpop.eup %890  ;;  %555 = vst [vmem:[%s1044_s8 + $0xb0] sm:$0xff] %v889_v44 }
  0xd8   : > { %v893_v48 = vpop.eup %892  ;;  %563 = vst [vmem:[%s1044_s8 + $0xf0] sm:$0xff] %v891_v47  ;;  %896 = vtanh.f32 %v479_v45 }
  0xd9   : > { %v895_v49 = vpop.eup %894  ;;  %540 = vst [vmem:[%s1044_s8 + $0x38] sm:$0xff] %v893_v48  ;;  %898 = vtanh.f32 %v499_v46 }
  0xda   : > { %548 = vst [vmem:[%s1044_s8 + $0x78] sm:$0xff] %v895_v49 }
  0xde   : > { %v897_v50 = vpop.eup %896 }
  0xdf   : > { %v899_v51 = vpop.eup %898  ;;  %556 = vst [vmem:[%s1044_s8 + $0xb8] sm:$0xff] %v897_v50 }
  0xe0   : > { %564 = vst [vmem:[%s1044_s8 + $0xf8] sm:$0xff] %v899_v51 }
  0xe1 PF: > { %s13_s16 = sadd.s32 1, %s938_s16   ;;  %s1127_s12 = smov %s930_s14 }
  0xe2   : > { %p10_p7 = scmp.ge.s32.totalorder %s13_s16, 34   ;;  %s1128_s13 = smov %s934_s15 }
  0xe3   : > { %s1129_s14 = smov %s1132_s17  ;;  %s1130_s15 = smov %s1136_s18 }
  0xe4   :  { %12 = sbr.rel (!%p10_p7) target bundleno = 3 (0x3), region = 65 }

</bundles_post_ra>
